<compile_context>
chip_gen: v6e
topology: v6e:2x2x1
jax: 0.10.0
libtpu: 0.0.40
codegen_flags: <defaults>
</compile_context>

<pallas_src>
import jax
import jax.numpy as jnp
from jax.experimental import pallas as pl
from jax.experimental.pallas import tpu as pltpu

EPS = 1e-5


def _resblock_kernel(x_ref, w1_ref, w2_ref, o_ref):
    # x_ref block: (1, H, W, C); weights: (3, 3*C, C) = (kh, kw*Cin, Cout)
    x = x_ref[0].astype(jnp.float32)               # (H, W, C)
    H, W, C = x.shape
    n_pix = H * W
    inv_n = 1.0 / n_pix

    def conv3x3(t, w_ref):
        # Reflection-pad along W, then fold the 3 kw taps into the channel
        # (lane) axis -> one (H, W, 3C) im2col tensor built once per conv.
        tw = jnp.concatenate([t[:, 1:2, :], t, t[:, W - 2:W - 1, :]], axis=1)
        tri = jnp.concatenate(
            [tw[:, 0:W, :], tw[:, 1:W + 1, :], tw[:, 2:W + 2, :]], axis=-1)
        # Reflection-pad along H on the leading (untiled) axis — cheap.
        trip = jnp.concatenate([tri[1:2], tri, tri[H - 2:H - 1]], axis=0)
        # Flatten once; the 3 kh-tap operands are contiguous sublane slices
        # (offsets 0, W, 2W — tile-aligned when W % 8 == 0).
        flat = trip.reshape((H + 2) * W, 3 * C)
        # 3 MXU matmuls with K = 3*C; accumulator initialized by the first.
        acc = jnp.dot(flat[0:n_pix], w_ref[0],
                      preferred_element_type=jnp.float32)
        acc = acc + jnp.dot(flat[W:W + n_pix], w_ref[1],
                            preferred_element_type=jnp.float32)
        acc = acc + jnp.dot(flat[2 * W:2 * W + n_pix], w_ref[2],
                            preferred_element_type=jnp.float32)
        return acc.reshape(H, W, C)
        # (conv bias omitted: a per-channel bias is exactly cancelled by the
        #  mean subtraction of the affine-free InstanceNorm that follows)

    def instance_norm(t):
        # Single-pass stats: E[x] and E[x^2]; biased variance (PyTorch IN).
        s = jnp.sum(t, axis=(0, 1), keepdims=True)
        s2 = jnp.sum(t * t, axis=(0, 1), keepdims=True)
        mean = s * inv_n
        var = s2 * inv_n - mean * mean
        return (t - mean) * jax.lax.rsqrt(var + EPS)

    y = conv3x3(x, w1_ref)
    y = jnp.maximum(instance_norm(y), 0.0)
    y = conv3x3(y, w2_ref)
    y = instance_norm(y)

    o_ref[0] = (x + y).astype(o_ref.dtype)


def residual_block(x_nchw, w1, b1, w2, b2):
    """x_nchw: (N, C, H, W); w*: (Cout, Cin, 3, 3) [PyTorch OIHW]; b*: (C,).

    Biases are accepted for parameter parity with the PyTorch module but are
    not used: they are mathematically cancelled by the affine-free
    InstanceNorm mean subtraction directly following each conv.
    """
    del b1, b2
    x = jnp.transpose(x_nchw, (0, 2, 3, 1))        # NCHW -> NHWC
    N, H, W, C = x.shape
    # OIHW -> (kh, kw, Cin, Cout) -> (kh, kw*Cin, Cout): kw folded into K.
    w1k = jnp.transpose(w1, (2, 3, 1, 0)).reshape(3, 3 * C, C)
    w2k = jnp.transpose(w2, (2, 3, 1, 0)).reshape(3, 3 * C, C)

    out = pl.pallas_call(
        _resblock_kernel,
        out_shape=jax.ShapeDtypeStruct((N, H, W, C), x.dtype),
        grid_spec=pltpu.PrefetchScalarGridSpec(
            num_scalar_prefetch=0,
            grid=(N,),
            in_specs=[
                pl.BlockSpec((1, H, W, C), lambda n: (n, 0, 0, 0)),
                pl.BlockSpec((3, 3 * C, C), lambda n: (0, 0, 0)),
                pl.BlockSpec((3, 3 * C, C), lambda n: (0, 0, 0)),
            ],
            out_specs=pl.BlockSpec((1, H, W, C), lambda n: (n, 0, 0, 0)),
        ),
        compiler_params=pltpu.CompilerParams(
            dimension_semantics=("parallel",),
            vmem_limit_bytes=48 * 1024 * 1024,
        ),
    )(x, w1k, w2k)

    return jnp.transpose(out, (0, 3, 1, 2))        # NHWC -> NCHW


def _reference(x, w1, b1, w2, b2):
    # Pure-JAX reference (NCHW), mirrors the PyTorch module semantics
    # (including the — mathematically cancelled — bias adds).
    def block(t, w, b):
        tp = jnp.pad(t, ((0, 0), (0, 0), (1, 1), (1, 1)), mode="reflect")
        y = jax.lax.conv_general_dilated(
            tp, w, (1, 1), "VALID",
            dimension_numbers=("NCHW", "OIHW", "NCHW"))
        y = y + b[None, :, None, None]
        mean = y.mean(axis=(2, 3), keepdims=True)
        var = ((y - mean) ** 2).mean(axis=(2, 3), keepdims=True)
        return (y - mean) / jnp.sqrt(var + EPS)

    h = jnp.maximum(block(x, w1, b1), 0.0)
    h = block(h, w2, b2)
    return x + h


if __name__ == "__main__":
    N, C, H, W = 2, 4, 16, 16
    key = jax.random.PRNGKey(0)
    kx, kw1, kb1, kw2, kb2 = jax.random.split(key, 5)

    # Deterministic parameter init (PyTorch-style uniform bound 1/sqrt(fan_in)).
    fan_in = C * 3 * 3
    bound = 1.0 / (fan_in ** 0.5)
    x = jax.random.normal(kx, (N, C, H, W), jnp.float32)
    w1 = jax.random.uniform(kw1, (C, C, 3, 3), jnp.float32, -bound, bound)
    b1 = jax.random.uniform(kb1, (C,), jnp.float32, -bound, bound)
    w2 = jax.random.uniform(kw2, (C, C, 3, 3), jnp.float32, -bound, bound)
    b2 = jax.random.uniform(kb2, (C,), jnp.float32, -bound, bound)

    out = jax.block_until_ready(residual_block(x, w1, b1, w2, b2))
    ref = jax.block_until_ready(_reference(x, w1, b1, w2, b2))

    assert out.shape == (N, C, H, W)
    assert jnp.allclose(out, ref, atol=1e-4, rtol=1e-4), (
        float(jnp.max(jnp.abs(out - ref))))
    print("KERNEL_OK")
</pallas_src>

<mosaic_0001>
module attributes {stable_mosaic.version = 11 : i64} {
  func.func @_resblock_kernel(%arg0: i32, %arg1: memref<1x16x16x4xf32, #tpu.memory_space<vmem>>, %arg2: memref<3x12x4xf32, #tpu.memory_space<vmem>>, %arg3: memref<3x12x4xf32, #tpu.memory_space<vmem>>, %arg4: memref<1x16x16x4xf32, #tpu.memory_space<vmem>>) attributes {dimension_semantics = [#tpu.dimension_semantics<parallel>], iteration_bounds = array<i64: 2>, scalar_prefetch = 0 : i64, scratch_operands = 0 : i64, tpu.core_type = #tpu.core_type<tc>, window_params = [{transform_indices = @transform_0, window_bounds = array<i64: 1, 16, 16, 4>}, {pipeline_mode = #tpu.pipeline_mode<synchronous>, transform_indices = @transform_1, window_bounds = array<i64: 3, 12, 4>}, {pipeline_mode = #tpu.pipeline_mode<synchronous>, transform_indices = @transform_2, window_bounds = array<i64: 3, 12, 4>}, {transform_indices = @transform_3, window_bounds = array<i64: 1, 16, 16, 4>}]} {
    %c0 = arith.constant 0 : index
    %c0_0 = arith.constant 0 : index
    %c0_1 = arith.constant 0 : index
    %c0_2 = arith.constant 0 : index
    %0 = vector.load %arg1[%c0, %c0_0, %c0_1, %c0_2] : memref<1x16x16x4xf32, #tpu.memory_space<vmem>>, vector<1x16x16x4xf32>
    %1 = vector.shape_cast %0 : vector<1x16x16x4xf32> to vector<16x16x4xf32>
    %2 = vector.extract_strided_slice %1 {offsets = [0, 1, 0], sizes = [16, 1, 4], strides = [1, 1, 1]} : vector<16x16x4xf32> to vector<16x1x4xf32>
    %3 = vector.extract_strided_slice %1 {offsets = [0, 14, 0], sizes = [16, 1, 4], strides = [1, 1, 1]} : vector<16x16x4xf32> to vector<16x1x4xf32>
    %4 = tpu.concatenate %2, %1, %3 in 1 : vector<16x1x4xf32>, vector<16x16x4xf32>, vector<16x1x4xf32> -> vector<16x18x4xf32>
    %5 = vector.extract_strided_slice %4 {offsets = [0, 0, 0], sizes = [16, 16, 4], strides = [1, 1, 1]} : vector<16x18x4xf32> to vector<16x16x4xf32>
    %6 = vector.extract_strided_slice %4 {offsets = [0, 1, 0], sizes = [16, 16, 4], strides = [1, 1, 1]} : vector<16x18x4xf32> to vector<16x16x4xf32>
    %7 = vector.extract_strided_slice %4 {offsets = [0, 2, 0], sizes = [16, 16, 4], strides = [1, 1, 1]} : vector<16x18x4xf32> to vector<16x16x4xf32>
    %8 = tpu.concatenate %5, %6, %7 in 2 : vector<16x16x4xf32>, vector<16x16x4xf32>, vector<16x16x4xf32> -> vector<16x16x12xf32>
    %9 = vector.extract_strided_slice %8 {offsets = [1, 0, 0], sizes = [1, 16, 12], strides = [1, 1, 1]} : vector<16x16x12xf32> to vector<1x16x12xf32>
    %10 = vector.extract_strided_slice %8 {offsets = [14, 0, 0], sizes = [1, 16, 12], strides = [1, 1, 1]} : vector<16x16x12xf32> to vector<1x16x12xf32>
    %11 = tpu.concatenate %9, %8, %10 in 0 : vector<1x16x12xf32>, vector<16x16x12xf32>, vector<1x16x12xf32> -> vector<18x16x12xf32>
    %12 = vector.shape_cast %11 : vector<18x16x12xf32> to vector<288x12xf32>
    %13 = vector.extract_strided_slice %12 {offsets = [0, 0], sizes = [256, 12], strides = [1, 1]} : vector<288x12xf32> to vector<256x12xf32>
    %c0_3 = arith.constant 0 : index
    %c0_4 = arith.constant 0 : index
    %c0_5 = arith.constant 0 : index
    %14 = vector.load %arg2[%c0_3, %c0_4, %c0_5] : memref<3x12x4xf32, #tpu.memory_space<vmem>>, vector<1x12x4xf32>
    %15 = vector.shape_cast %14 : vector<1x12x4xf32> to vector<12x4xf32>
    %cst = arith.constant dense<0.000000e+00> : vector<256x4xf32>
    %16 = tpu.matmul %13, %15, %cst {dimension_numbers = #tpu.dot_dimension_numbers<[1], [0], [0], [1], [0, 0, 1, 1], [], []>} : vector<256x12xf32>, vector<12x4xf32>, vector<256x4xf32> -> vector<256x4xf32>
    %17 = vector.extract_strided_slice %12 {offsets = [16, 0], sizes = [256, 12], strides = [1, 1]} : vector<288x12xf32> to vector<256x12xf32>
    %c1 = arith.constant 1 : index
    %c0_6 = arith.constant 0 : index
    %c0_7 = arith.constant 0 : index
    %18 = vector.load %arg2[%c1, %c0_6, %c0_7] : memref<3x12x4xf32, #tpu.memory_space<vmem>>, vector<1x12x4xf32>
    %19 = vector.shape_cast %18 : vector<1x12x4xf32> to vector<12x4xf32>
    %cst_8 = arith.constant dense<0.000000e+00> : vector<256x4xf32>
    %20 = tpu.matmul %17, %19, %cst_8 {dimension_numbers = #tpu.dot_dimension_numbers<[1], [0], [0], [1], [0, 0, 1, 1], [], []>} : vector<256x12xf32>, vector<12x4xf32>, vector<256x4xf32> -> vector<256x4xf32>
    %21 = arith.addf %16, %20 : vector<256x4xf32>
    %22 = vector.extract_strided_slice %12 {offsets = [32, 0], sizes = [256, 12], strides = [1, 1]} : vector<288x12xf32> to vector<256x12xf32>
    %c2 = arith.constant 2 : index
    %c0_9 = arith.constant 0 : index
    %c0_10 = arith.constant 0 : index
    %23 = vector.load %arg2[%c2, %c0_9, %c0_10] : memref<3x12x4xf32, #tpu.memory_space<vmem>>, vector<1x12x4xf32>
    %24 = vector.shape_cast %23 : vector<1x12x4xf32> to vector<12x4xf32>
    %cst_11 = arith.constant dense<0.000000e+00> : vector<256x4xf32>
    %25 = tpu.matmul %22, %24, %cst_11 {dimension_numbers = #tpu.dot_dimension_numbers<[1], [0], [0], [1], [0, 0, 1, 1], [], []>} : vector<256x12xf32>, vector<12x4xf32>, vector<256x4xf32> -> vector<256x4xf32>
    %26 = arith.addf %21, %25 : vector<256x4xf32>
    %27 = vector.shape_cast %26 : vector<256x4xf32> to vector<16x16x4xf32>
    %cst_12 = arith.constant dense<0.000000e+00> : vector<4xf32>
    %28 = vector.multi_reduction <add>, %27, %cst_12 [0, 1] : vector<16x16x4xf32> to vector<4xf32>
    %29 = vector.shape_cast %28 : vector<4xf32> to vector<1x1x4xf32>
    %30 = arith.mulf %27, %27 : vector<16x16x4xf32>
    %cst_13 = arith.constant dense<0.000000e+00> : vector<4xf32>
    %31 = vector.multi_reduction <add>, %30, %cst_13 [0, 1] : vector<16x16x4xf32> to vector<4xf32>
    %32 = vector.shape_cast %31 : vector<4xf32> to vector<1x1x4xf32>
    %cst_14 = arith.constant 3.906250e-03 : f32
    %33 = vector.broadcast %cst_14 : f32 to vector<1x1x4xf32>
    %34 = arith.mulf %29, %33 : vector<1x1x4xf32>
    %cst_15 = arith.constant 3.906250e-03 : f32
    %35 = vector.broadcast %cst_15 : f32 to vector<1x1x4xf32>
    %36 = arith.mulf %32, %35 : vector<1x1x4xf32>
    %37 = arith.mulf %34, %34 : vector<1x1x4xf32>
    %38 = arith.subf %36, %37 : vector<1x1x4xf32>
    %39 = vector.broadcast %34 : vector<1x1x4xf32> to vector<16x16x4xf32>
    %40 = arith.subf %27, %39 : vector<16x16x4xf32>
    %cst_16 = arith.constant 9.99999974E-6 : f32
    %41 = vector.broadcast %cst_16 : f32 to vector<1x1x4xf32>
    %42 = arith.addf %38, %41 : vector<1x1x4xf32>
    %43 = math.rsqrt %42 : vector<1x1x4xf32>
    %44 = vector.broadcast %43 : vector<1x1x4xf32> to vector<16x16x4xf32>
    %45 = arith.mulf %40, %44 : vector<16x16x4xf32>
    %cst_17 = arith.constant 0.000000e+00 : f32
    %46 = vector.broadcast %cst_17 : f32 to vector<16x16x4xf32>
    %47 = arith.maximumf %45, %46 : vector<16x16x4xf32>
    %48 = vector.extract_strided_slice %47 {offsets = [0, 1, 0], sizes = [16, 1, 4], strides = [1, 1, 1]} : vector<16x16x4xf32> to vector<16x1x4xf32>
    %49 = vector.extract_strided_slice %47 {offsets = [0, 14, 0], sizes = [16, 1, 4], strides = [1, 1, 1]} : vector<16x16x4xf32> to vector<16x1x4xf32>
    %50 = tpu.concatenate %48, %47, %49 in 1 : vector<16x1x4xf32>, vector<16x16x4xf32>, vector<16x1x4xf32> -> vector<16x18x4xf32>
    %51 = vector.extract_strided_slice %50 {offsets = [0, 0, 0], sizes = [16, 16, 4], strides = [1, 1, 1]} : vector<16x18x4xf32> to vector<16x16x4xf32>
    %52 = vector.extract_strided_slice %50 {offsets = [0, 1, 0], sizes = [16, 16, 4], strides = [1, 1, 1]} : vector<16x18x4xf32> to vector<16x16x4xf32>
    %53 = vector.extract_strided_slice %50 {offsets = [0, 2, 0], sizes = [16, 16, 4], strides = [1, 1, 1]} : vector<16x18x4xf32> to vector<16x16x4xf32>
    %54 = tpu.concatenate %51, %52, %53 in 2 : vector<16x16x4xf32>, vector<16x16x4xf32>, vector<16x16x4xf32> -> vector<16x16x12xf32>
    %55 = vector.extract_strided_slice %54 {offsets = [1, 0, 0], sizes = [1, 16, 12], strides = [1, 1, 1]} : vector<16x16x12xf32> to vector<1x16x12xf32>
    %56 = vector.extract_strided_slice %54 {offsets = [14, 0, 0], sizes = [1, 16, 12], strides = [1, 1, 1]} : vector<16x16x12xf32> to vector<1x16x12xf32>
    %57 = tpu.concatenate %55, %54, %56 in 0 : vector<1x16x12xf32>, vector<16x16x12xf32>, vector<1x16x12xf32> -> vector<18x16x12xf32>
    %58 = vector.shape_cast %57 : vector<18x16x12xf32> to vector<288x12xf32>
    %59 = vector.extract_strided_slice %58 {offsets = [0, 0], sizes = [256, 12], strides = [1, 1]} : vector<288x12xf32> to vector<256x12xf32>
    %c0_18 = arith.constant 0 : index
    %c0_19 = arith.constant 0 : index
    %c0_20 = arith.constant 0 : index
    %60 = vector.load %arg3[%c0_18, %c0_19, %c0_20] : memref<3x12x4xf32, #tpu.memory_space<vmem>>, vector<1x12x4xf32>
    %61 = vector.shape_cast %60 : vector<1x12x4xf32> to vector<12x4xf32>
    %cst_21 = arith.constant dense<0.000000e+00> : vector<256x4xf32>
    %62 = tpu.matmul %59, %61, %cst_21 {dimension_numbers = #tpu.dot_dimension_numbers<[1], [0], [0], [1], [0, 0, 1, 1], [], []>} : vector<256x12xf32>, vector<12x4xf32>, vector<256x4xf32> -> vector<256x4xf32>
    %63 = vector.extract_strided_slice %58 {offsets = [16, 0], sizes = [256, 12], strides = [1, 1]} : vector<288x12xf32> to vector<256x12xf32>
    %c1_22 = arith.constant 1 : index
    %c0_23 = arith.constant 0 : index
    %c0_24 = arith.constant 0 : index
    %64 = vector.load %arg3[%c1_22, %c0_23, %c0_24] : memref<3x12x4xf32, #tpu.memory_space<vmem>>, vector<1x12x4xf32>
    %65 = vector.shape_cast %64 : vector<1x12x4xf32> to vector<12x4xf32>
    %cst_25 = arith.constant dense<0.000000e+00> : vector<256x4xf32>
    %66 = tpu.matmul %63, %65, %cst_25 {dimension_numbers = #tpu.dot_dimension_numbers<[1], [0], [0], [1], [0, 0, 1, 1], [], []>} : vector<256x12xf32>, vector<12x4xf32>, vector<256x4xf32> -> vector<256x4xf32>
    %67 = arith.addf %62, %66 : vector<256x4xf32>
    %68 = vector.extract_strided_slice %58 {offsets = [32, 0], sizes = [256, 12], strides = [1, 1]} : vector<288x12xf32> to vector<256x12xf32>
    %c2_26 = arith.constant 2 : index
    %c0_27 = arith.constant 0 : index
    %c0_28 = arith.constant 0 : index
    %69 = vector.load %arg3[%c2_26, %c0_27, %c0_28] : memref<3x12x4xf32, #tpu.memory_space<vmem>>, vector<1x12x4xf32>
    %70 = vector.shape_cast %69 : vector<1x12x4xf32> to vector<12x4xf32>
    %cst_29 = arith.constant dense<0.000000e+00> : vector<256x4xf32>
    %71 = tpu.matmul %68, %70, %cst_29 {dimension_numbers = #tpu.dot_dimension_numbers<[1], [0], [0], [1], [0, 0, 1, 1], [], []>} : vector<256x12xf32>, vector<12x4xf32>, vector<256x4xf32> -> vector<256x4xf32>
    %72 = arith.addf %67, %71 : vector<256x4xf32>
    %73 = vector.shape_cast %72 : vector<256x4xf32> to vector<16x16x4xf32>
    %cst_30 = arith.constant dense<0.000000e+00> : vector<4xf32>
    %74 = vector.multi_reduction <add>, %73, %cst_30 [0, 1] : vector<16x16x4xf32> to vector<4xf32>
    %75 = vector.shape_cast %74 : vector<4xf32> to vector<1x1x4xf32>
    %76 = arith.mulf %73, %73 : vector<16x16x4xf32>
    %cst_31 = arith.constant dense<0.000000e+00> : vector<4xf32>
    %77 = vector.multi_reduction <add>, %76, %cst_31 [0, 1] : vector<16x16x4xf32> to vector<4xf32>
    %78 = vector.shape_cast %77 : vector<4xf32> to vector<1x1x4xf32>
    %cst_32 = arith.constant 3.906250e-03 : f32
    %79 = vector.broadcast %cst_32 : f32 to vector<1x1x4xf32>
    %80 = arith.mulf %75, %79 : vector<1x1x4xf32>
    %cst_33 = arith.constant 3.906250e-03 : f32
    %81 = vector.broadcast %cst_33 : f32 to vector<1x1x4xf32>
    %82 = arith.mulf %78, %81 : vector<1x1x4xf32>
    %83 = arith.mulf %80, %80 : vector<1x1x4xf32>
    %84 = arith.subf %82, %83 : vector<1x1x4xf32>
    %85 = vector.broadcast %80 : vector<1x1x4xf32> to vector<16x16x4xf32>
    %86 = arith.subf %73, %85 : vector<16x16x4xf32>
    %cst_34 = arith.constant 9.99999974E-6 : f32
    %87 = vector.broadcast %cst_34 : f32 to vector<1x1x4xf32>
    %88 = arith.addf %84, %87 : vector<1x1x4xf32>
    %89 = math.rsqrt %88 : vector<1x1x4xf32>
    %90 = vector.broadcast %89 : vector<1x1x4xf32> to vector<16x16x4xf32>
    %91 = arith.mulf %86, %90 : vector<16x16x4xf32>
    %92 = arith.addf %1, %91 : vector<16x16x4xf32>
    %c0_35 = arith.constant 0 : index
    %c0_36 = arith.constant 0 : index
    %c0_37 = arith.constant 0 : index
    %c0_38 = arith.constant 0 : index
    %93 = vector.load %arg4[%c0_35, %c0_36, %c0_37, %c0_38] : memref<1x16x16x4xf32, #tpu.memory_space<vmem>>, vector<1x16x16x4xf32>
    %94 = vector.shape_cast %93 : vector<1x16x16x4xf32> to vector<16x16x4xf32>
    %95 = vector.shape_cast %92 : vector<16x16x4xf32> to vector<1x16x16x4xf32>
    tpu.vector_store %arg4[%c0_35, %c0_36, %c0_37, %c0_38], %95 {strides = array<i32>} : memref<1x16x16x4xf32, #tpu.memory_space<vmem>>, vector<1x16x16x4xf32>,
    return
  }
  func.func @transform_0(%arg0: i32) -> (i32, i32, i32, i32) {
    %c0_i32 = arith.constant 0 : i32
    %c0_i32_0 = arith.constant 0 : i32
    %c0_i32_1 = arith.constant 0 : i32
    %c0_i32_2 = arith.constant 0 : i32
    return %arg0, %c0_i32, %c0_i32_0, %c0_i32_1 : i32, i32, i32, i32
  }
  func.func @transform_1(%arg0: i32) -> (i32, i32, i32) {
    %c0_i32 = arith.constant 0 : i32
    %c0_i32_0 = arith.constant 0 : i32
    %c0_i32_1 = arith.constant 0 : i32
    %c0_i32_2 = arith.constant 0 : i32
    return %c0_i32, %c0_i32_0, %c0_i32_1 : i32, i32, i32
  }
  func.func @transform_2(%arg0: i32) -> (i32, i32, i32) {
    %c0_i32 = arith.constant 0 : i32
    %c0_i32_0 = arith.constant 0 : i32
    %c0_i32_1 = arith.constant 0 : i32
    %c0_i32_2 = arith.constant 0 : i32
    return %c0_i32, %c0_i32_0, %c0_i32_1 : i32, i32, i32
  }
  func.func @transform_3(%arg0: i32) -> (i32, i32, i32, i32) {
    %c0_i32 = arith.constant 0 : i32
    %c0_i32_0 = arith.constant 0 : i32
    %c0_i32_1 = arith.constant 0 : i32
    %c0_i32_2 = arith.constant 0 : i32
    return %arg0, %c0_i32, %c0_i32_0, %c0_i32_1 : i32, i32, i32, i32
  }
}

</mosaic_0001>

<bundles_post_ra>
// kernel: tpu_custom_call.1
= control target key start
LH: loop header
LB: loop body
LE: loop exit
PB: predicated region body
PF: predicated region fallthrough
CT: control target
= control target key end

     0   :  { %s4636_s12 = smov 0   ;;  %s7183_s0 = inlined_call_operand.vmem [shape: f32[2,16,16,4], index: 0, kind: input, shape index: {}]   ;;  %s7184_s1 = inlined_call_operand.vmem [shape: f32[3,12,4], index: 1, kind: input, shape index: {}]   ;;  %s7185_s2 = inlined_call_operand.vmem [shape: f32[3,12,4], index: 2, kind: input, shape index: {}]   ;;  %s7186_s3 = inlined_call_operand.vmem [shape: f32[2,16,16,4], index: 3, kind: output, shape index: {}]  }
   0x1 LB: > { %s3825_s13 = sadd.s32 4294967295, %s4612_s12   ;;  %p3829_p0 = scmp.ge.s32.totalorder %s4612_s12, 1  ;;  %s4612_s12 = sphi %s4636_s12, %s13_s12  }
   0x2   : > { %p137_p1 = scmp.lt.s32.totalorder %s4612_s12, 3 }
   0x4   : > { %p138_p2 = pnand %p3829_p0, %p137_p1 }
   0x6   : > { %141 = sbr.rel (%p138_p2) target bundleno = 1148 (0x47c), region = 32 }
   0xb   : > { %p161_p3 = scmp.lt.s32.totalorder %s3825_s13, 1  ;;  %v3835_v0 = vld [vmem:[%s7184_s1 + $0x18] sm:$0xf]  ;;  %vm982_vm0 = vcmask 1043456   ;;  %v3834_v1 = vld [vmem:[%s7184_s1 + $0x10] sm:$0xff]  ;;  %vm267_vm1 = vcmask 1040384  }
   0xc   : > { %4248 = vmatprep.subr.msk.mxu0 %vm982_vm0, %v3835_v0  ;;  %vm637_vm2 = vcmask 1045504   ;;  %vm460_vm3 = vcmask 1046528   ;;  %s4614_s22 = smov 8   ;;  %s4615_s23 = smov 4   ;;  %v881_v49 = vld [vmem:[%s7184_s1 + $0x8] sm:$0xf] }
   0xd   : > { %s7249_s13 = smov (!%p161_p3, %s3825_s13), 1  ;;  %4249 = vmatpush3.msk.msra.mxu0 %vm982_vm0, %v3835_v0  ;;  %4300 = vmatprep.subr.msk.mxu1 %vm982_vm0, %v881_v49  ;;  %v880_v50 = vld [vmem:[%s7184_s1] sm:$0xff]  ;;  %vm814_vm4 = vcmask 31744   ;;  %vm847_vm5 = vcmask 64512   ;;  %vm885_vm6 = vcmask 97280  }
   0xe   : > { %s4042_s18 = sshll.u32 %s7249_s13, 8  ;;  %4250 = vmatprep.subr.mxu0 %v3834_v1  ;;  %4301 = vmatpush3.msk.msra.mxu1 %vm982_vm0, %v881_v49 }
   0xf   : > { %s4660_s21 = scalar_lea.vmem %s7183_s0, %s4042_s18  ;;  %4251 = vmatpush3.msra.mxu0 %v3834_v1  ;;  %4302 = vmatprep.subr.mxu1 %v880_v50 }
  0x10   : > { %v171_v2 = vld [vmem:[%s4660_s21] sm:$0xff]  ;;  %v172_v3 = vld [vmem:[%s4660_s21 + $0x8] sm:$0xff]  ;;  %v173_v4 = vld [vmem:[%s4660_s21 + $0x10] sm:$0xff]  ;;  %4303 = vmatpush3.msra.mxu1 %v880_v50 }
  0x11   : > { %v219_v5 = vrot.slane %v171_v2, 1  ;;  %v268_v6 = vrot.slane %v171_v2, 7  ;;  %v269_v7 = vrot.slane %v172_v3, 7  ;;  %v364_v8 = vrot.slane %v172_v3, 5  ;;  %v174_v9 = vld [vmem:[%s4660_s21 + $0x18] sm:$0xff]  ;;  %v175_v27 = vld [vmem:[%s4660_s21 + $0x20] sm:$0xff] }
  0x12   : > { %v271_v10 = vrot.slane %v173_v4, 7  ;;  %v272_v11 = vrot.slane %v174_v9, 7  ;;  %v365_v12 = vrot.slane %v174_v9, 5  ;;  %v220_v16 = vrot.slane %v173_v4, 1  ;;  %v176_v28 = vld [vmem:[%s4660_s21 + $0x28] sm:$0xff]  ;;  %v177_v44 = vld [vmem:[%s4660_s21 + $0x30] sm:$0xff] }
  0x13   : > { %v4667_v13 = vsel %vm267_vm1, %v268_v6, %v269_v7  ;;  %v4670_v14 = vsel %vm267_vm1, %v219_v5, %v268_v6  ;;  %v412_v15 = vsel %vm267_vm1, %v269_v7, %v364_v8  ;;  %v274_v35 = vrot.slane %v175_v27, 7  ;;  %v178_v48 = vld [vmem:[%s4660_s21 + $0x38] sm:$0xff]  ;;  %v179_v4 = vld [vmem:[%s4660_s21 + $0x40] sm:$0xff]  ;;  %v180_v5 = vld [vmem:[%s4660_s21 + $0x48] sm:$0xff] }
  0x14   : > { %v638_v17 = vrot.slane %v4670_v14, 2  ;;  %v639_v18 = vrot.slane %v4667_v13, 2  ;;  %v461_v19 = vrot.slane %v4670_v14, 1  ;;  %v462_v20 = vrot.slane %v4667_v13, 1  ;;  %v184_v49 = vld [vmem:[%s4660_s21 + $0x68] sm:$0xff] }
  0x15   : > { %v641_v21 = vrot.slane %v412_v15, 2  ;;  %v464_v22 = vrot.slane %v412_v15, 1  ;;  %v4678_v23 = vsel %vm267_vm1, %v271_v10, %v272_v11  ;;  %v413_v24 = vsel %vm267_vm1, %v272_v11, %v365_v12 }
  0x16   : > { %v640_v25 = vsel %vm637_vm2, %v638_v17, %v639_v18  ;;  %v463_v26 = vsel %vm460_vm3, %v461_v19, %v462_v20  ;;  %v467_v29 = vrot.slane %v4678_v23, 1  ;;  %v4689_v30 = vsel %vm267_vm1, %v220_v16, %v271_v10 }
  0x17   : > { %718 = vrot.lane.b32.xlu1 %v640_v25, %s4614_s22  ;;  %541 = vrot.lane.b32.xlu0 %v463_v26, %s4615_s23  ;;  %v642_v31 = vsel %vm637_vm2, %v639_v18, %v641_v21  ;;  %v465_v32 = vsel %vm460_vm3, %v462_v20, %v464_v22  ;;  %v469_v33 = vrot.slane %v413_v24, 1  ;;  %v466_v34 = vrot.slane %v4689_v30, 1  ;;  %v181_v26 = vld [vmem:[%s4660_s21 + $0x50] sm:$0xff] }
  0x18   : > { %v275_v36 = vrot.slane %v176_v28, 7  ;;  %v366_v37 = vrot.slane %v176_v28, 5  ;;  %v221_v38 = vrot.slane %v175_v27, 1  ;;  %v644_v39 = vrot.slane %v4678_v23, 2  ;;  %v182_v27 = vld [vmem:[%s4660_s21 + $0x58] sm:$0xff] }
  0x19   : > { %v646_v40 = vrot.slane %v413_v24, 2  ;;  %v643_v41 = vrot.slane %v4689_v30, 2  ;;  %v470_v42 = vsel %vm460_vm3, %v467_v29, %v469_v33  ;;  %v468_v43 = vsel %vm460_vm3, %v466_v34, %v467_v29 }
  0x1a   : > { %v4702_v45 = vsel %vm267_vm1, %v274_v35, %v275_v36  ;;  %v414_v46 = vsel %vm267_vm1, %v275_v36, %v366_v37  ;;  %v4706_v47 = vsel %vm267_vm1, %v221_v38, %v274_v35  ;;  %v277_v53 = vrot.slane %v177_v44, 7 }
  0x1b   : > { %720 = vrot.lane.b32.xlu1 %v642_v31, %s4614_s22  ;;  %543 = vrot.lane.b32.xlu0 %v465_v32, %s4615_s23  ;;  %v647_v51 = vsel %vm637_vm2, %v644_v39, %v646_v40  ;;  %v645_v52 = vsel %vm637_vm2, %v643_v41, %v644_v39  ;;  %v472_v54 = vrot.slane %v4702_v45, 1  ;;  %v474_v55 = vrot.slane %v414_v46, 1 }
  0x1c   : > { %v471_v56 = vrot.slane %v4706_v47, 1  ;;  %v278_v57 = vrot.slane %v178_v48, 7  ;;  %v367_v58 = vrot.slane %v178_v48, 5  ;;  %v222_v59 = vrot.slane %v177_v44, 1  ;;  %v183_v48 = vld [vmem:[%s4660_s21 + $0x60] sm:$0xff] }
  0x1d   : > { %v649_v60 = vrot.slane %v4702_v45, 2  ;;  %v651_v61 = vrot.slane %v414_v46, 2  ;;  %v475_v62 = vsel %vm460_vm3, %v472_v54, %v474_v55  ;;  %v648_v0 = vrot.slane %v4706_v47, 2 }
  0x1e   : > { %v473_v63 = vsel %vm460_vm3, %v471_v56, %v472_v54  ;;  %v4730_v1 = vsel %vm267_vm1, %v277_v53, %v278_v57  ;;  %v415_v2 = vsel %vm267_vm1, %v278_v57, %v367_v58  ;;  %v4734_v3 = vsel %vm267_vm1, %v222_v59, %v277_v53 }
  0x1f   : > { %547 = vrot.lane.b32.xlu1 %v470_v42, %s4615_s23  ;;  %545 = vrot.lane.b32.xlu0 %v468_v43, %s4615_s23  ;;  %v477_v6 = vrot.slane %v4730_v1, 1  ;;  %v652_v7 = vsel %vm637_vm2, %v649_v60, %v651_v61  ;;  %v650_v8 = vsel %vm637_vm2, %v648_v0, %v649_v60  ;;  %v479_v9 = vrot.slane %v415_v2, 1 }
  0x20   : > { %v476_v10 = vrot.slane %v4734_v3, 1  ;;  %v280_v11 = vrot.slane %v179_v4, 7  ;;  %v281_v12 = vrot.slane %v180_v5, 7  ;;  %v368_v15 = vrot.slane %v180_v5, 5  ;;  %v185_v5 = vld [vmem:[%s4660_s21 + $0x70] sm:$0xff] }
  0x21   : > { %v223_v16 = vrot.slane %v179_v4, 1  ;;  %v654_v17 = vrot.slane %v4730_v1, 2  ;;  %v656_v18 = vrot.slane %v415_v2, 2  ;;  %v480_v19 = vsel %vm460_vm3, %v477_v6, %v479_v9 }
  0x22   : > { %v478_v20 = vsel %vm460_vm3, %v476_v10, %v477_v6  ;;  %v653_v21 = vrot.slane %v4734_v3, 2  ;;  %v4751_v22 = vsel %vm267_vm1, %v280_v11, %v281_v12  ;;  %v416_v24 = vsel %vm267_vm1, %v281_v12, %v368_v15  ;;  %v186_v6 = vld [vmem:[%s4660_s21 + $0x78] sm:$0xff] }
  0x23   : > { %724 = vrot.lane.b32.xlu1 %v647_v51, %s4614_s22  ;;  %722 = vrot.lane.b32.xlu0 %v645_v52, %s4614_s22  ;;  %v4755_v25 = vsel %vm267_vm1, %v223_v16, %v280_v11  ;;  %v657_v28 = vsel %vm637_vm2, %v654_v17, %v656_v18  ;;  %v482_v31 = vrot.slane %v4751_v22, 1  ;;  %v484_v32 = vrot.slane %v416_v24, 1 }
  0x24   : > { %v655_v29 = vsel %vm637_vm2, %v653_v21, %v654_v17  ;;  %v481_v33 = vrot.slane %v4755_v25, 1  ;;  %v283_v34 = vrot.slane %v181_v26, 7  ;;  %v284_v35 = vrot.slane %v182_v27, 7 }
  0x25   : > { %v369_v36 = vrot.slane %v182_v27, 5  ;;  %v224_v37 = vrot.slane %v181_v26, 1  ;;  %v659_v38 = vrot.slane %v4751_v22, 2  ;;  %v661_v39 = vrot.slane %v416_v24, 2  ;;  %v187_v26 = vld [vmem:[%s4660_s21 + $0x80] sm:$0xff]  ;;  %v188_v27 = vld [vmem:[%s4660_s21 + $0x88] sm:$0xff] }
  0x26   : > { %v485_v40 = vsel %vm460_vm3, %v482_v31, %v484_v32  ;;  %v483_v41 = vsel %vm460_vm3, %v481_v33, %v482_v31  ;;  %v658_v42 = vrot.slane %v4755_v25, 2  ;;  %v4772_v43 = vsel %vm267_vm1, %v283_v34, %v284_v35 }
  0x27   : > { %551 = vrot.lane.b32.xlu1 %v475_v62, %s4615_s23  ;;  %549 = vrot.lane.b32.xlu0 %v473_v63, %s4615_s23  ;;  %v417_v44 = vsel %vm267_vm1, %v284_v35, %v369_v36  ;;  %v4776_v46 = vsel %vm267_vm1, %v224_v37, %v283_v34  ;;  %v662_v50 = vsel %vm637_vm2, %v659_v38, %v661_v39  ;;  %v487_v52 = vrot.slane %v4772_v43, 1 }
  0x28   : > { %v660_v51 = vsel %vm637_vm2, %v658_v42, %v659_v38  ;;  %v489_v53 = vrot.slane %v417_v44, 1  ;;  %v486_v54 = vrot.slane %v4776_v46, 1  ;;  %v286_v55 = vrot.slane %v183_v48, 7 }
  0x29   : > { %v287_v56 = vrot.slane %v184_v49, 7  ;;  %v370_v57 = vrot.slane %v184_v49, 5  ;;  %v225_v58 = vrot.slane %v183_v48, 1  ;;  %v664_v59 = vrot.slane %v4772_v43, 2 }
  0x2a   : > { %v666_v60 = vrot.slane %v417_v44, 2  ;;  %v490_v61 = vsel %vm460_vm3, %v487_v52, %v489_v53  ;;  %v488_v62 = vsel %vm460_vm3, %v486_v54, %v487_v52  ;;  %v663_v63 = vrot.slane %v4776_v46, 2  ;;  %v189_v54 = vld [vmem:[%s4660_s21 + $0x90] sm:$0xff] }
  0x2b   : > { %728 = vrot.lane.b32.xlu1 %v652_v7, %s4614_s22  ;;  %726 = vrot.lane.b32.xlu0 %v650_v8, %s4614_s22  ;;  %v4793_v0 = vsel %vm267_vm1, %v286_v55, %v287_v56  ;;  %v418_v2 = vsel %vm267_vm1, %v287_v56, %v370_v57  ;;  %v4797_v4 = vsel %vm267_vm1, %v225_v58, %v286_v55  ;;  %v289_v12 = vrot.slane %v185_v5, 7  ;;  %v190_v55 = vld [vmem:[%s4660_s21 + $0x98] sm:$0xff] }
  0x2c   : > { %v667_v7 = vsel %vm637_vm2, %v664_v59, %v666_v60  ;;  %v665_v8 = vsel %vm637_vm2, %v663_v63, %v664_v59  ;;  %v492_v9 = vrot.slane %v4793_v0, 1  ;;  %v494_v10 = vrot.slane %v418_v2, 1 }
  0x2d   : > { %v491_v11 = vrot.slane %v4797_v4, 1  ;;  %v290_v15 = vrot.slane %v186_v6, 7  ;;  %v371_v16 = vrot.slane %v186_v6, 5  ;;  %v226_v17 = vrot.slane %v185_v5, 1 }
  0x2e   : > { %v669_v18 = vrot.slane %v4793_v0, 2  ;;  %v668_v24 = vrot.slane %v4797_v4, 2  ;;  %v292_v33 = vrot.slane %v187_v26, 7  ;;  %v293_v34 = vrot.slane %v188_v27, 7 }
  0x2f   : > { %555 = vrot.lane.b32.xlu1 %v480_v19, %s4615_s23  ;;  %553 = vrot.lane.b32.xlu0 %v478_v20, %s4615_s23  ;;  %v671_v19 = vrot.slane %v418_v2, 2  ;;  %v495_v20 = vsel %vm460_vm3, %v492_v9, %v494_v10  ;;  %v493_v21 = vsel %vm460_vm3, %v491_v11, %v492_v9  ;;  %v4820_v31 = vsel %vm267_vm1, %v226_v17, %v289_v12 }
  0x30   : > { %v670_v35 = vsel %vm637_vm2, %v668_v24, %v669_v18  ;;  %v496_v38 = vrot.slane %v4820_v31, 1  ;;  %v372_v39 = vrot.slane %v188_v27, 5  ;;  %v373_v63 = vrot.slane %v190_v55, 5 }
  0x31   : > { %v672_v32 = vsel %vm637_vm2, %v669_v18, %v671_v19  ;;  %v228_v2 = vrot.slane %v189_v54, 1 }
  0x32   : > { %v420_v52 = vsel %vm267_vm1, %v293_v34, %v372_v39 }
  0x33   : > { %732 = vrot.lane.b32.xlu1 %v657_v28, %s4614_s22  ;;  %730 = vrot.lane.b32.xlu0 %v655_v29, %s4614_s22  ;;  %v4816_v28 = vsel %vm267_vm1, %v289_v12, %v290_v15  ;;  %v419_v29 = vsel %vm267_vm1, %v290_v15, %v371_v16  ;;  %v504_v59 = vrot.slane %v420_v52, 1  ;;  %v681_v6 = vrot.slane %v420_v52, 2  ;;  %v191_v15 = vld [vmem:[%s4660_s21 + $0xa0] sm:$0xff]  ;;  %v192_v16 = vld [vmem:[%s4660_s21 + $0xa8] sm:$0xff] }
  0x34   : > { %v497_v36 = vrot.slane %v4816_v28, 1  ;;  %v499_v37 = vrot.slane %v419_v29, 1  ;;  %v674_v42 = vrot.slane %v4816_v28, 2  ;;  %v676_v44 = vrot.slane %v419_v29, 2 }
  0x35   : > { %v298_v24 = vrot.slane %v191_v15, 7  ;;  %v374_v27 = vrot.slane %v192_v16, 5  ;;  %v229_v29 = vrot.slane %v191_v15, 1 }
  0x36   : > { %v500_v48 = vsel %vm460_vm3, %v497_v36, %v499_v37  ;;  %v498_v49 = vsel %vm460_vm3, %v496_v38, %v497_v36  ;;  %v677_v57 = vsel %vm637_vm2, %v674_v42, %v676_v44 }
  0x37   : > { %559 = vrot.lane.b32.xlu1 %v485_v40, %s4615_s23  ;;  %557 = vrot.lane.b32.xlu0 %v483_v41, %s4615_s23  ;;  %v227_v40 = vrot.slane %v187_v26, 1  ;;  %v4831_v41 = vld [vmem:[%s7184_s1 + $0x28] sm:$0xf]  ;;  %v299_v26 = vrot.slane %v192_v16, 7  ;;  %v4888_v39 = vsel %vm267_vm1, %v229_v29, %v298_v24 }
  0x38   : > { %4352 = vmatprep.subr.msk.mxu0 %vm982_vm0, %v4831_v41  ;;  %v511_v52 = vrot.slane %v4888_v39, 1 }
  0x39   : > { %v4846_v53 = vsel %vm267_vm1, %v227_v40, %v292_v33  ;;  %v4884_v37 = vsel %vm267_vm1, %v298_v24, %v299_v26  ;;  %v422_v38 = vsel %vm267_vm1, %v299_v26, %v374_v27  ;;  %v193_v40 = vld [vmem:[%s4660_s21 + $0xb0] sm:$0xff] }
  0x3a   : > { %v501_v60 = vrot.slane %v4846_v53, 1  ;;  %v678_v9 = vrot.slane %v4846_v53, 2 }
  0x3b   : > { %736 = vrot.lane.b32.xlu1 %v662_v50, %s4614_s22  ;;  %734 = vrot.lane.b32.xlu0 %v660_v51, %s4614_s22  ;;  %v673_v50 = vrot.slane %v4820_v31, 2  ;;  %v4840_v51 = vsel %vm267_vm1, %v292_v33, %v293_v34 }
  0x3c   : > { %v502_v56 = vrot.slane %v4840_v51, 1  ;;  %v679_v5 = vrot.slane %v4840_v51, 2 }
  0x3d   : > { %v675_v58 = vsel %vm637_vm2, %v673_v50, %v674_v42  ;;  %v194_v42 = vld [vmem:[%s4660_s21 + $0xb8] sm:$0xff]  ;;  %v514_v50 = vrot.slane %v422_v38, 1 }
  0x3e   : > { %v682_v17 = vsel %vm637_vm2, %v679_v5, %v681_v6  ;;  %v680_v18 = vsel %vm637_vm2, %v678_v9, %v679_v5 }
  0x3f   : > { %563 = vrot.lane.b32.xlu1 %v490_v61, %s4615_s23  ;;  %561 = vrot.lane.b32.xlu0 %v488_v62, %s4615_s23  ;;  %v295_v61 = vrot.slane %v189_v54, 7  ;;  %v296_v62 = vrot.slane %v190_v55, 7  ;;  %v301_v54 = vrot.slane %v193_v40, 7  ;;  %v302_v55 = vrot.slane %v194_v42, 7 }
  0x41   : > { %v4863_v10 = vsel %vm267_vm1, %v295_v61, %v296_v62  ;;  %v421_v11 = vsel %vm267_vm1, %v296_v62, %v373_v63  ;;  %v4867_v12 = vsel %vm267_vm1, %v228_v2, %v295_v61  ;;  %v195_v63 = vld [vmem:[%s4660_s21 + $0xc0] sm:$0xff]  ;;  %v4906_v2 = vsel %vm267_vm1, %v301_v54, %v302_v55 }
  0x42   : > { %v507_v19 = vrot.slane %v4863_v10, 1  ;;  %v686_v33 = vrot.slane %v421_v11, 2  ;;  %v683_v36 = vrot.slane %v4867_v12, 2  ;;  %v517_v15 = vrot.slane %v4906_v2, 1 }
  0x43   : > { %740 = vrot.lane.b32.xlu1 %v667_v7, %s4614_s22  ;;  %738 = vrot.lane.b32.xlu0 %v665_v8, %s4614_s22  ;;  %v505_v7 = vsel %vm460_vm3, %v502_v56, %v504_v59  ;;  %v503_v8 = vsel %vm460_vm3, %v501_v60, %v502_v56  ;;  %v375_v56 = vrot.slane %v194_v42, 5  ;;  %v691_v59 = vrot.slane %v422_v38, 2 }
  0x44   : > { %v688_v60 = vrot.slane %v4888_v39, 2 }
  0x45   : > { %v423_v5 = vsel %vm267_vm1, %v302_v55, %v375_v56 }
  0x46   : > { %v519_v16 = vrot.slane %v423_v5, 1  ;;  %v696_v24 = vrot.slane %v423_v5, 2  ;;  %v200_v5 = vld [vmem:[%s4660_s21 + $0xe8] sm:$0xff] }
  0x47   : > { %567 = vrot.lane.b32.xlu1 %v495_v20, %s4615_s23  ;;  %565 = vrot.lane.b32.xlu0 %v493_v21, %s4615_s23  ;;  %v509_v20 = vrot.slane %v421_v11, 1  ;;  %v506_v21 = vrot.slane %v4867_v12, 1  ;;  %v304_v11 = vrot.slane %v195_v63, 7 }
  0x48   : > { %v520_v26 = vsel %vm460_vm3, %v517_v15, %v519_v16 }
  0x49   : > { %v510_v34 = vsel %vm460_vm3, %v507_v19, %v509_v20  ;;  %v231_v20 = vrot.slane %v195_v63, 1  ;;  %v199_v63 = vld [vmem:[%s4660_s21 + $0xe0] sm:$0xff] }
  0x4a   : > { %v310_v16 = vrot.slane %v199_v63, 7 }
  0x4b   : > { %744 = vrot.lane.b32.xlu1 %v672_v32, %s4614_s22  ;;  %742 = vrot.lane.b32.xlu0 %v670_v35, %s4614_s22  ;;  %v684_v32 = vrot.slane %v4863_v10, 2  ;;  %v508_v35 = vsel %vm460_vm3, %v506_v21, %v507_v19  ;;  %v694_v21 = vrot.slane %v4906_v2, 2 }
  0x4d   : > { %v687_v44 = vsel %vm637_vm2, %v684_v32, %v686_v33 }
  0x4f   : > { %571 = vrot.lane.b32.xlu1 %v500_v48, %s4615_s23  ;;  %569 = vrot.lane.b32.xlu0 %v498_v49, %s4615_s23  ;;  %v685_v48 = vsel %vm637_vm2, %v683_v36, %v684_v32  ;;  %v512_v49 = vrot.slane %v4884_v37, 1  ;;  %v198_v36 = vld [vmem:[%s4660_s21 + $0xd8] sm:$0xff] }
  0x51   : > { %v515_v61 = vsel %vm460_vm3, %v512_v49, %v514_v50  ;;  %v513_v62 = vsel %vm460_vm3, %v511_v52, %v512_v49  ;;  %v308_v50 = vrot.slane %v198_v36, 7  ;;  %v377_v52 = vrot.slane %v198_v36, 5  ;;  %v201_v36 = vld [vmem:[%s4660_s21 + $0xf0] sm:$0xff] }
  0x53   : > { %748 = vrot.lane.b32.xlu1 %v677_v57, %s4614_s22  ;;  %746 = vrot.lane.b32.xlu0 %v675_v58, %s4614_s22  ;;  %v230_v57 = vrot.slane %v193_v40, 1  ;;  %v689_v58 = vrot.slane %v4884_v37, 2  ;;  %v697_v40 = vsel %vm637_vm2, %v694_v21, %v696_v24 }
  0x55   : > { %v4910_v6 = vsel %vm267_vm1, %v230_v57, %v301_v54  ;;  %v690_v9 = vsel %vm637_vm2, %v688_v60, %v689_v58 }
  0x56   : > { %v693_v29 = vrot.slane %v4910_v6, 2 }
  0x57   : > { %575 = vrot.lane.b32.xlu1 %v505_v7, %s4615_s23  ;;  %573 = vrot.lane.b32.xlu0 %v503_v8, %s4615_s23  ;;  %v196_v7 = vld [vmem:[%s4660_s21 + $0xc8] sm:$0xff]  ;;  %v692_v8 = vsel %vm637_vm2, %v689_v58, %v691_v59 }
  0x58   : > { %v376_v19 = vrot.slane %v196_v7, 5  ;;  %v695_v42 = vsel %vm637_vm2, %v693_v29, %v694_v21 }
  0x5b   : > { %752 = vrot.lane.b32.xlu1 %v682_v17, %s4614_s22  ;;  %750 = vrot.lane.b32.xlu0 %v680_v18, %s4614_s22  ;;  %v516_v17 = vrot.slane %v4910_v6, 1  ;;  %v305_v18 = vrot.slane %v196_v7, 7 }
  0x5d   : > { %v518_v27 = vsel %vm460_vm3, %v516_v17, %v517_v15  ;;  %v4926_v32 = vsel %vm267_vm1, %v304_v11, %v305_v18  ;;  %v424_v33 = vsel %vm267_vm1, %v305_v18, %v376_v19  ;;  %v311_v17 = vrot.slane %v200_v5, 7 }
  0x5e   : > { %v522_v38 = vrot.slane %v4926_v32, 1  ;;  %v699_v55 = vrot.slane %v4926_v32, 2  ;;  %v701_v56 = vrot.slane %v424_v33, 2  ;;  %v378_v18 = vrot.slane %v200_v5, 5 }
  0x5f   : > { %579 = vrot.lane.b32.xlu1 %v510_v34, %s4615_s23  ;;  %577 = vrot.lane.b32.xlu0 %v508_v35, %s4615_s23  ;;  %v4930_v34 = vsel %vm267_vm1, %v231_v20, %v304_v11  ;;  %v197_v35 = vld [vmem:[%s4660_s21 + $0xd0] sm:$0xff]  ;;  %v233_v19 = vrot.slane %v199_v63, 1  ;;  %v4968_v29 = vsel %vm267_vm1, %v310_v16, %v311_v17 }
  0x60   : > { %v307_v49 = vrot.slane %v197_v35, 7  ;;  %v232_v54 = vrot.slane %v197_v35, 1  ;;  %v698_v59 = vrot.slane %v4930_v34, 2  ;;  %v702_v7 = vsel %vm637_vm2, %v699_v55, %v701_v56 }
  0x61   : > { %v4972_v35 = vsel %vm267_vm1, %v233_v19, %v310_v16  ;;  %v709_v56 = vrot.slane %v4968_v29, 2 }
  0x62   : > { %v4947_v60 = vsel %vm267_vm1, %v307_v49, %v308_v50 }
  0x63   : > { %756 = vrot.lane.b32.xlu1 %v687_v44, %s4614_s22  ;;  %754 = vrot.lane.b32.xlu0 %v685_v48, %s4614_s22  ;;  %v524_v44 = vrot.slane %v424_v33, 1  ;;  %v521_v48 = vrot.slane %v4930_v34, 1  ;;  %v704_v20 = vrot.slane %v4947_v60, 2  ;;  %v426_v33 = vsel %vm267_vm1, %v311_v17, %v378_v18 }
  0x65   : > { %v525_v57 = vsel %vm460_vm3, %v522_v38, %v524_v44  ;;  %v523_v58 = vsel %vm460_vm3, %v521_v48, %v522_v38  ;;  %v202_v38 = vld [vmem:[%s4660_s21 + $0xf8] sm:$0xff]  ;;  %v532_v44 = vrot.slane %v4968_v29, 1  ;;  %v534_v48 = vrot.slane %v426_v33, 1 }
  0x67   : > { %583 = vrot.lane.b32.xlu1 %v515_v61, %s4615_s23  ;;  %581 = vrot.lane.b32.xlu0 %v513_v62, %s4615_s23  ;;  %v425_v61 = vsel %vm267_vm1, %v308_v50, %v377_v52  ;;  %v4951_v62 = vsel %vm267_vm1, %v232_v54, %v307_v49  ;;  %v531_v49 = vrot.slane %v4972_v35, 1  ;;  %v313_v50 = vrot.slane %v201_v36, 7 }
  0x68   : > { %v529_v11 = vrot.slane %v425_v61, 1  ;;  %v526_v15 = vrot.slane %v4951_v62, 1  ;;  %v706_v21 = vrot.slane %v425_v61, 2  ;;  %v314_v52 = vrot.slane %v202_v38, 7 }
  0x69   : > { %v379_v54 = vrot.slane %v202_v38, 5  ;;  %v708_v61 = vrot.slane %v4972_v35, 2 }
  0x6a   : > { %v4989_v63 = vsel %vm267_vm1, %v313_v50, %v314_v52 }
  0x6b   : > { %760 = vrot.lane.b32.xlu1 %v692_v8, %s4614_s22  ;;  %758 = vrot.lane.b32.xlu0 %v690_v9, %s4614_s22  ;;  %v700_v8 = vsel %vm637_vm2, %v698_v59, %v699_v55  ;;  %v527_v9 = vrot.slane %v4947_v60, 1  ;;  %v234_v55 = vrot.slane %v201_v36, 1  ;;  %v533_v59 = vsel %vm460_vm3, %v531_v49, %v532_v44 }
  0x6c   : > { %v427_v5 = vsel %vm267_vm1, %v314_v52, %v379_v54 }
  0x6d   : > { %v530_v24 = vsel %vm460_vm3, %v527_v9, %v529_v11  ;;  %v537_v11 = vrot.slane %v4989_v63, 1 }
  0x6f   : > { %587 = vrot.lane.b32.xlu1 %v520_v26, %s4615_s23  ;;  %585 = vrot.lane.b32.xlu0 %v518_v27, %s4615_s23  ;;  %v528_v26 = vsel %vm460_vm3, %v526_v15, %v527_v9  ;;  %v703_v27 = vrot.slane %v4951_v62, 2  ;;  %v710_v9 = vsel %vm637_vm2, %v708_v61, %v709_v56  ;;  %v539_v15 = vrot.slane %v427_v5, 1 }
  0x73   : > { %764 = vrot.lane.b32.xlu1 %v697_v40, %s4614_s22  ;;  %762 = vrot.lane.b32.xlu0 %v695_v42, %s4614_s22  ;;  %v707_v40 = vsel %vm637_vm2, %v704_v20, %v706_v21  ;;  %v705_v42 = vsel %vm637_vm2, %v703_v27, %v704_v20  ;;  %v714_v21 = vrot.slane %v4989_v63, 2  ;;  %v716_v27 = vrot.slane %v427_v5, 2 }
  0x77   : > { %591 = vrot.lane.b32.xlu1 %v525_v57, %s4615_s23  ;;  %589 = vrot.lane.b32.xlu0 %v523_v58, %s4615_s23  ;;  %v711_v57 = vrot.slane %v426_v33, 2  ;;  %v535_v58 = vsel %vm460_vm3, %v532_v44, %v534_v48  ;;  %v717_v44 = vsel %vm637_vm2, %v714_v21, %v716_v27 }
  0x7b   : > { %768 = vrot.lane.b32.xlu1 %v702_v7, %s4614_s22  ;;  %766 = vrot.lane.b32.xlu0 %v700_v8, %s4614_s22  ;;  %v4993_v7 = vsel %vm267_vm1, %v234_v55, %v313_v50  ;;  %v712_v8 = vsel %vm637_vm2, %v709_v56, %v711_v57 }
  0x7c   : > { %v536_v16 = vrot.slane %v4993_v7, 1  ;;  %v713_v33 = vrot.slane %v4993_v7, 2 }
  0x7e   : > { %v715_v48 = vsel %vm637_vm2, %v713_v33, %v714_v21 }
  0x7f   : > { %595 = vrot.lane.b32.xlu1 %v530_v24, %s4615_s23  ;;  %593 = vrot.lane.b32.xlu0 %v528_v26, %s4615_s23  ;;  %v540_v24 = vsel %vm460_vm3, %v537_v11, %v539_v15  ;;  %v538_v26 = vsel %vm460_vm3, %v536_v16, %v537_v11 }
  0x83   : > { %772 = vrot.lane.b32.xlu1 %v707_v40, %s4614_s22  ;;  %770 = vrot.lane.b32.xlu0 %v705_v42, %s4614_s22  ;;  %v3902_v42 = vld [vmem:[%s7184_s1 + $0x20] sm:$0xff] }
  0x87   : > { %599 = vrot.lane.b32.xlu1 %v535_v58, %s4615_s23  ;;  %597 = vrot.lane.b32.xlu0 %v533_v59, %s4615_s23 }
  0x89   : > { %v719_v17 = vpop.permute.xlu1 %718  ;;  %v542_v18 = vpop.permute.xlu0 %541 }
  0x8a   : > { %v815_v19 = vsel %vm814_vm4, %v4670_v14, %v542_v18 }
  0x8b   : > { %776 = vrot.lane.b32.xlu1 %v712_v8, %s4614_s22  ;;  %774 = vrot.lane.b32.xlu0 %v710_v9, %s4614_s22  ;;  %v848_v20 = vsel %vm847_vm5, %v815_v19, %v719_v17 }
  0x8c   : > { %4252 = vmatprep.mubr.msk.f32.mxu0 %vm885_vm6, %v848_v20 }
  0x8d   : > { %v721_v36 = vpop.permute.xlu1 %720  ;;  %v544_v38 = vpop.permute.xlu0 %543 }
  0x8e   : > { %v816_v14 = vsel %vm814_vm4, %v4667_v13, %v544_v38 }
  0x8f   : > { %603 = vrot.lane.b32.xlu1 %v540_v24, %s4615_s23  ;;  %601 = vrot.lane.b32.xlu0 %v538_v26, %s4615_s23  ;;  %v849_v40 = vsel %vm847_vm5, %v816_v14, %v721_v36 }
  0x90   : > { %4253 = vmatmul.mubr.msk.f32.vlgmr.msra.gmra.mxu0 %vm885_vm6, %v849_v40 }
  0x91   : > { %v548_v49 = vpop.permute.xlu1 %547  ;;  %v546_v50 = vpop.permute.xlu0 %545  ;;  %4353 = vmatpush3.msk.msra.mxu0 %vm982_vm0, %v4831_v41 }
  0x92   : > { %4354 = vmatprep.subr.mxu0 %v3902_v42  ;;  %v818_v13 = vsel %vm814_vm4, %v4678_v23, %v548_v49  ;;  %v817_v52 = vsel %vm814_vm4, %v4689_v30, %v546_v50 }
  0x93   : > { %780 = vrot.lane.b32.xlu1 %v717_v44, %s4614_s22  ;;  %778 = vrot.lane.b32.xlu0 %v715_v48, %s4614_s22 }
  0x94   : > { %4355 = vmatpush3.msra.mxu0 %v3902_v42 }
  0x95   : > { %v725_v54 = vpop.permute.xlu1 %724  ;;  %v723_v55 = vpop.permute.xlu0 %722 }
  0x96   : > { %v5031_v56 = vsel %vm847_vm5, %v818_v13, %v725_v54  ;;  %v5034_v57 = vsel %vm847_vm5, %v817_v52, %v723_v55 }
  0x97   : > { %4255 = vmatprep.mubr.msk.f32.mxu0 %vm885_vm6, %v5034_v57  ;;  %4304 = vmatprep.mubr.msk.f32.mxu1 %vm885_vm6, %v5034_v57 }
  0x98   : > { %4256 = vmatmul.mubr.msk.f32.gmra.mxu0 %vm885_vm6, %v5031_v56  ;;  %4305 = vmatmul.mubr.msk.f32.vlgmr.msra.gmra.mxu1 %vm885_vm6, %v5031_v56 }
  0x99   : > { %v552_v23 = vpop.permute.xlu1 %551  ;;  %4307 = vmatprep.mubr.msk.f32.mxu1 %vm885_vm6, %v848_v20  ;;  %v550_v30 = vpop.permute.xlu0 %549 }
  0x9a   : > { %v820_v41 = vsel %vm814_vm4, %v4702_v45, %v552_v23  ;;  %v819_v58 = vsel %vm814_vm4, %v4706_v47, %v550_v30 }
  0x9c   : > { %4308 = vmatmul.mubr.msk.f32.gmra.mxu1 %vm885_vm6, %v849_v40 }
  0x9d   : > { %v729_v59 = vpop.permute.xlu1 %728  ;;  %4310 = vmatprep.mubr.msk.f32.mxu1 %vm885_vm6, %v5034_v57  ;;  %v727_v61 = vpop.permute.xlu0 %726 }
  0x9e   : > { %v5053_v5 = vsel %vm847_vm5, %v820_v41, %v729_v59  ;;  %v5056_v8 = vsel %vm847_vm5, %v819_v58, %v727_v61 }
  0x9f   : > { %4258 = vmatprep.mubr.msk.f32.mxu0 %vm885_vm6, %v5056_v8 }
  0xa0   : > { %4259 = vmatmul.mubr.msk.f32.gmra.mxu0 %vm885_vm6, %v5053_v5  ;;  %4311 = vmatmul.mubr.msk.f32.gmra.mxu1 %vm885_vm6, %v5031_v56 }
  0xa1   : > { %v556_v45 = vpop.permute.xlu1 %555  ;;  %4313 = vmatprep.mubr.msk.f32.mxu1 %vm885_vm6, %v5056_v8  ;;  %v554_v47 = vpop.permute.xlu0 %553 }
  0xa2   : > { %v822_v9 = vsel %vm814_vm4, %v4730_v1, %v556_v45  ;;  %v821_v11 = vsel %vm814_vm4, %v4734_v3, %v554_v47 }
  0xa4   : > { %4314 = vmatmul.mubr.msk.f32.gmra.mxu1 %vm885_vm6, %v5053_v5 }
  0xa5   : > { %v733_v15 = vpop.permute.xlu1 %732  ;;  %v731_v16 = vpop.permute.xlu0 %730 }
  0xa6   : > { %v5073_v17 = vsel %vm847_vm5, %v822_v9, %v733_v15  ;;  %v5076_v18 = vsel %vm847_vm5, %v821_v11, %v731_v16 }
  0xa7   : > { %4261 = vmatprep.mubr.msk.f32.mxu0 %vm885_vm6, %v5076_v18  ;;  %4316 = vmatprep.mubr.msk.f32.mxu1 %vm885_vm6, %v5076_v18 }
  0xa8   : > { %4262 = vmatmul.mubr.msk.f32.gmra.mxu0 %vm885_vm6, %v5073_v17  ;;  %4317 = vmatmul.mubr.msk.f32.gmra.mxu1 %vm885_vm6, %v5073_v17 }
  0xa9   : > { %v560_v1 = vpop.permute.xlu1 %559  ;;  %v558_v3 = vpop.permute.xlu0 %557 }
  0xaa   : > { %v824_v19 = vsel %vm814_vm4, %v4751_v22, %v560_v1  ;;  %v823_v20 = vsel %vm814_vm4, %v4755_v25, %v558_v3 }
  0xad   : > { %v737_v21 = vpop.permute.xlu1 %736  ;;  %v735_v24 = vpop.permute.xlu0 %734 }
  0xae   : > { %v5091_v26 = vsel %vm847_vm5, %v824_v19, %v737_v21  ;;  %v5094_v27 = vsel %vm847_vm5, %v823_v20, %v735_v24 }
  0xaf   : > { %4264 = vmatprep.mubr.msk.f32.mxu0 %vm885_vm6, %v5094_v27  ;;  %4319 = vmatprep.mubr.msk.f32.mxu1 %vm885_vm6, %v5094_v27 }
  0xb0   : > { %4265 = vmatmul.mubr.msk.f32.gmra.mxu0 %vm885_vm6, %v5091_v26  ;;  %4320 = vmatmul.mubr.msk.f32.gmra.mxu1 %vm885_vm6, %v5091_v26 }
  0xb1   : > { %v564_v22 = vpop.permute.xlu1 %563  ;;  %v562_v25 = vpop.permute.xlu0 %561 }
  0xb2   : > { %v826_v33 = vsel %vm814_vm4, %v4772_v43, %v564_v22  ;;  %v825_v36 = vsel %vm814_vm4, %v4776_v46, %v562_v25 }
  0xb5   : > { %v741_v38 = vpop.permute.xlu1 %740  ;;  %v739_v14 = vpop.permute.xlu0 %738 }
  0xb6   : > { %v5109_v40 = vsel %vm847_vm5, %v826_v33, %v741_v38  ;;  %v5112_v42 = vsel %vm847_vm5, %v825_v36, %v739_v14 }
  0xb7   : > { %4267 = vmatprep.mubr.msk.f32.mxu0 %vm885_vm6, %v5112_v42  ;;  %4322 = vmatprep.mubr.msk.f32.mxu1 %vm885_vm6, %v5112_v42 }
  0xb8   : > { %4268 = vmatmul.mubr.msk.f32.gmra.mxu0 %vm885_vm6, %v5109_v40  ;;  %4323 = vmatmul.mubr.msk.f32.gmra.mxu1 %vm885_vm6, %v5109_v40 }
  0xb9   : > { %v568_v43 = vpop.permute.xlu1 %567  ;;  %v566_v46 = vpop.permute.xlu0 %565 }
  0xba   : > { %v828_v44 = vsel %vm814_vm4, %v4793_v0, %v568_v43  ;;  %v827_v48 = vsel %vm814_vm4, %v4797_v4, %v566_v46 }
  0xbd   : > { %v745_v49 = vpop.permute.xlu1 %744  ;;  %v743_v50 = vpop.permute.xlu0 %742 }
  0xbe   : > { %v5127_v13 = vsel %vm847_vm5, %v828_v44, %v745_v49  ;;  %v5130_v52 = vsel %vm847_vm5, %v827_v48, %v743_v50 }
  0xbf   : > { %4270 = vmatprep.mubr.msk.f32.mxu0 %vm885_vm6, %v5130_v52  ;;  %4325 = vmatprep.mubr.msk.f32.mxu1 %vm885_vm6, %v5130_v52 }
  0xc0   : > { %4271 = vmatmul.mubr.msk.f32.gmra.mxu0 %vm885_vm6, %v5127_v13  ;;  %4326 = vmatmul.mubr.msk.f32.gmra.mxu1 %vm885_vm6, %v5127_v13 }
  0xc1   : > { %v572_v0 = vpop.permute.xlu1 %571  ;;  %v570_v4 = vpop.permute.xlu0 %569 }
  0xc2   : > { %v830_v54 = vsel %vm814_vm4, %v4816_v28, %v572_v0  ;;  %v829_v55 = vsel %vm814_vm4, %v4820_v31, %v570_v4 }
  0xc5   : > { %v749_v23 = vpop.permute.xlu1 %748  ;;  %v747_v30 = vpop.permute.xlu0 %746 }
  0xc6   : > { %v5145_v41 = vsel %vm847_vm5, %v830_v54, %v749_v23  ;;  %v5148_v58 = vsel %vm847_vm5, %v829_v55, %v747_v30 }
  0xc7   : > { %4273 = vmatprep.mubr.msk.f32.mxu0 %vm885_vm6, %v5148_v58  ;;  %4328 = vmatprep.mubr.msk.f32.mxu1 %vm885_vm6, %v5148_v58 }
  0xc8   : > { %4274 = vmatmul.mubr.msk.f32.gmra.mxu0 %vm885_vm6, %v5145_v41  ;;  %4329 = vmatmul.mubr.msk.f32.gmra.mxu1 %vm885_vm6, %v5145_v41 }
  0xc9   : > { %v576_v28 = vpop.permute.xlu1 %575  ;;  %v574_v31 = vpop.permute.xlu0 %573 }
  0xca   : > { %v832_v59 = vsel %vm814_vm4, %v4840_v51, %v576_v28  ;;  %v831_v61 = vsel %vm814_vm4, %v4846_v53, %v574_v31 }
  0xcd   : > { %v753_v45 = vpop.permute.xlu1 %752  ;;  %v751_v47 = vpop.permute.xlu0 %750 }
  0xce   : > { %v5163_v9 = vsel %vm847_vm5, %v832_v59, %v753_v45  ;;  %v5166_v11 = vsel %vm847_vm5, %v831_v61, %v751_v47 }
  0xcf   : > { %4276 = vmatprep.mubr.msk.f32.mxu0 %vm885_vm6, %v5166_v11  ;;  %4331 = vmatprep.mubr.msk.f32.mxu1 %vm885_vm6, %v5166_v11 }
  0xd0   : > { %4277 = vmatmul.mubr.msk.f32.gmra.mxu0 %vm885_vm6, %v5163_v9  ;;  %4332 = vmatmul.mubr.msk.f32.gmra.mxu1 %vm885_vm6, %v5163_v9 }
  0xd1   : > { %v580_v51 = vpop.permute.xlu1 %579  ;;  %v578_v53 = vpop.permute.xlu0 %577 }
  0xd2   : > { %v834_v15 = vsel %vm814_vm4, %v4863_v10, %v580_v51  ;;  %v833_v16 = vsel %vm814_vm4, %v4867_v12, %v578_v53 }
  0xd5   : > { %v757_v1 = vpop.permute.xlu1 %756  ;;  %v755_v3 = vpop.permute.xlu0 %754 }
  0xd6   : > { %v5181_v19 = vsel %vm847_vm5, %v834_v15, %v757_v1  ;;  %v5184_v20 = vsel %vm847_vm5, %v833_v16, %v755_v3 }
  0xd7   : > { %4279 = vmatprep.mubr.msk.f32.mxu0 %vm885_vm6, %v5184_v20  ;;  %4334 = vmatprep.mubr.msk.f32.mxu1 %vm885_vm6, %v5184_v20 }
  0xd8   : > { %4280 = vmatmul.mubr.msk.f32.gmra.mxu0 %vm885_vm6, %v5181_v19  ;;  %4335 = vmatmul.mubr.msk.f32.gmra.mxu1 %vm885_vm6, %v5181_v19 }
  0xd9   : > { %v584_v10 = vpop.permute.xlu1 %583  ;;  %v582_v12 = vpop.permute.xlu0 %581 }
  0xda   : > { %v836_v21 = vsel %vm814_vm4, %v4884_v37, %v584_v10  ;;  %v835_v24 = vsel %vm814_vm4, %v4888_v39, %v582_v12 }
  0xdd   : > { %v761_v22 = vpop.permute.xlu1 %760  ;;  %v759_v25 = vpop.permute.xlu0 %758 }
  0xde   : > { %v5199_v33 = vsel %vm847_vm5, %v836_v21, %v761_v22  ;;  %v5202_v36 = vsel %vm847_vm5, %v835_v24, %v759_v25 }
  0xdf   : > { %4282 = vmatprep.mubr.msk.f32.mxu0 %vm885_vm6, %v5202_v36  ;;  %4337 = vmatprep.mubr.msk.f32.mxu1 %vm885_vm6, %v5202_v36 }
  0xe0   : > { %4283 = vmatmul.mubr.msk.f32.gmra.mxu0 %vm885_vm6, %v5199_v33  ;;  %4338 = vmatmul.mubr.msk.f32.gmra.mxu1 %vm885_vm6, %v5199_v33 }
  0xe1   : > { %v588_v37 = vpop.permute.xlu1 %587  ;;  %v586_v39 = vpop.permute.xlu0 %585 }
  0xe2   : > { %v838_v38 = vsel %vm814_vm4, %v4906_v2, %v588_v37  ;;  %v837_v14 = vsel %vm814_vm4, %v4910_v6, %v586_v39 }
  0xe5   : > { %v765_v43 = vpop.permute.xlu1 %764  ;;  %v763_v46 = vpop.permute.xlu0 %762 }
  0xe6   : > { %v5217_v44 = vsel %vm847_vm5, %v838_v38, %v765_v43  ;;  %v5220_v48 = vsel %vm847_vm5, %v837_v14, %v763_v46 }
  0xe7   : > { %4285 = vmatprep.mubr.msk.f32.mxu0 %vm885_vm6, %v5220_v48  ;;  %4340 = vmatprep.mubr.msk.f32.mxu1 %vm885_vm6, %v5220_v48 }
  0xe8   : > { %4286 = vmatmul.mubr.msk.f32.gmra.mxu0 %vm885_vm6, %v5217_v44  ;;  %4341 = vmatmul.mubr.msk.f32.gmra.mxu1 %vm885_vm6, %v5217_v44 }
  0xe9   : > { %v592_v2 = vpop.permute.xlu1 %591  ;;  %v590_v6 = vpop.permute.xlu0 %589 }
  0xea   : > { %v840_v49 = vsel %vm814_vm4, %v4926_v32, %v592_v2  ;;  %v839_v50 = vsel %vm814_vm4, %v4930_v34, %v590_v6 }
  0xed   : > { %v769_v0 = vpop.permute.xlu1 %768  ;;  %v767_v4 = vpop.permute.xlu0 %766 }
  0xee   : > { %v5235_v54 = vsel %vm847_vm5, %v840_v49, %v769_v0  ;;  %v872_v55 = vsel %vm847_vm5, %v839_v50, %v767_v4 }
  0xef   : > { %4288 = vmatprep.mubr.msk.f32.mxu0 %vm885_vm6, %v872_v55  ;;  %4343 = vmatprep.mubr.msk.f32.mxu1 %vm885_vm6, %v872_v55 }
  0xf0   : > { %4289 = vmatmul.mubr.msk.f32.gmra.mxu0 %vm885_vm6, %v5235_v54  ;;  %4344 = vmatmul.mubr.msk.f32.gmra.mxu1 %vm885_vm6, %v5235_v54 }
  0xf1   : > { %v596_v32 = vpop.permute.xlu1 %595  ;;  %v594_v23 = vpop.permute.xlu0 %593 }
  0xf2   : > { %v842_v34 = vsel %vm814_vm4, %v4947_v60, %v596_v32  ;;  %v841_v30 = vsel %vm814_vm4, %v4951_v62, %v594_v23 }
  0xf5   : > { %v773_v28 = vpop.permute.xlu1 %772  ;;  %v771_v31 = vpop.permute.xlu0 %770 }
  0xf6   : > { %v875_v59 = vsel %vm847_vm5, %v842_v34, %v773_v28  ;;  %v874_v61 = vsel %vm847_vm5, %v841_v30, %v771_v31 }
  0xf7   : > { %4291 = vmatprep.mubr.msk.f32.mxu0 %vm885_vm6, %v874_v61  ;;  %4346 = vmatprep.mubr.msk.f32.mxu1 %vm885_vm6, %v874_v61 }
  0xf8   : > { %4292 = vmatmul.mubr.msk.f32.gmra.mxu0 %vm885_vm6, %v875_v59  ;;  %4347 = vmatmul.mubr.msk.f32.gmra.mxu1 %vm885_vm6, %v875_v59 }
  0xf9   : > { %v600_v45 = vpop.permute.xlu1 %599  ;;  %v598_v47 = vpop.permute.xlu0 %597 }
  0xfa   : > { %v844_v60 = vsel %vm814_vm4, %v4968_v29, %v600_v45  ;;  %v843_v62 = vsel %vm814_vm4, %v4972_v35, %v598_v47 }
  0xfd   : > { %v777_v51 = vpop.permute.xlu1 %776  ;;  %v775_v53 = vpop.permute.xlu0 %774 }
  0xfe   : > { %v877_v15 = vsel %vm847_vm5, %v844_v60, %v777_v51  ;;  %v876_v16 = vsel %vm847_vm5, %v843_v62, %v775_v53 }
  0xff   : > { %4294 = vmatprep.mubr.msk.f32.mxu0 %vm885_vm6, %v876_v16  ;;  %4349 = vmatprep.mubr.msk.f32.mxu1 %vm885_vm6, %v876_v16 }
 0x100   : > { %4295 = vmatmul.mubr.msk.f32.gmra.mxu0 %vm885_vm6, %v877_v15  ;;  %4350 = vmatmul.mubr.msk.f32.gmra.mxu1 %vm885_vm6, %v877_v15 }
 0x101   : > { %v604_v1 = vpop.permute.xlu1 %603  ;;  %v602_v3 = vpop.permute.xlu0 %601 }
 0x102   : > { %v846_v29 = vsel %vm814_vm4, %v4989_v63, %v604_v1  ;;  %v845_v35 = vsel %vm814_vm4, %v4993_v7, %v602_v3 }
 0x105   : > { %v781_v10 = vpop.permute.xlu1 %780  ;;  %v779_v12 = vpop.permute.xlu0 %778 }
 0x106   : > { %v879_v21 = vsel %vm847_vm5, %v846_v29, %v781_v10  ;;  %v878_v24 = vsel %vm847_vm5, %v845_v35, %v779_v12 }
 0x107   : > { %4297 = vmatprep.mubr.msk.f32.mxu0 %vm885_vm6, %v878_v24 }
 0x108   : > { %4298 = vmatmul.mubr.msk.f32.gmra.mxu0 %vm885_vm6, %v879_v21 }
 0x109   : > { %4356 = vmatprep.mubr.msk.f32.mxu0 %vm885_vm6, %v5034_v57 }
 0x10c   : > { %4357 = vmatmul.mubr.msk.f32.vlgmr.msra.gmra.mxu0 %vm885_vm6, %v5031_v56 }
 0x10d   : > { %4359 = vmatprep.mubr.msk.f32.mxu0 %vm885_vm6, %v5056_v8 }
 0x110   : > { %4360 = vmatmul.mubr.msk.f32.gmra.mxu0 %vm885_vm6, %v5053_v5 }
 0x111   : > { %4362 = vmatprep.mubr.msk.f32.mxu0 %vm885_vm6, %v5076_v18 }
 0x114   : > { %4363 = vmatmul.mubr.msk.f32.gmra.mxu0 %vm885_vm6, %v5073_v17 }
 0x115   : > { %4365 = vmatprep.mubr.msk.f32.mxu0 %vm885_vm6, %v5094_v27 }
 0x118   : > { %4366 = vmatmul.mubr.msk.f32.gmra.mxu0 %vm885_vm6, %v5091_v26 }
 0x119   : > { %4368 = vmatprep.mubr.msk.f32.mxu0 %vm885_vm6, %v5112_v42 }
 0x11c   : > { %4369 = vmatmul.mubr.msk.f32.gmra.mxu0 %vm885_vm6, %v5109_v40 }
 0x11d   : > { %4371 = vmatprep.mubr.msk.f32.mxu0 %vm885_vm6, %v5130_v52 }
 0x120   : > { %4372 = vmatmul.mubr.msk.f32.gmra.mxu0 %vm885_vm6, %v5127_v13 }
 0x121   : > { %4374 = vmatprep.mubr.msk.f32.mxu0 %vm885_vm6, %v5148_v58 }
 0x124   : > { %4375 = vmatmul.mubr.msk.f32.gmra.mxu0 %vm885_vm6, %v5145_v41 }
 0x125   : > { %4377 = vmatprep.mubr.msk.f32.mxu0 %vm885_vm6, %v5166_v11 }
 0x128   : > { %4378 = vmatmul.mubr.msk.f32.gmra.mxu0 %vm885_vm6, %v5163_v9 }
 0x129   : > { %4380 = vmatprep.mubr.msk.f32.mxu0 %vm885_vm6, %v5184_v20 }
 0x12c   : > { %4381 = vmatmul.mubr.msk.f32.gmra.mxu0 %vm885_vm6, %v5181_v19 }
 0x12d   : > { %4383 = vmatprep.mubr.msk.f32.mxu0 %vm885_vm6, %v5202_v36 }
 0x130   : > { %4384 = vmatmul.mubr.msk.f32.gmra.mxu0 %vm885_vm6, %v5199_v33 }
 0x131   : > { %4386 = vmatprep.mubr.msk.f32.mxu0 %vm885_vm6, %v5220_v48 }
 0x134   : > { %4387 = vmatmul.mubr.msk.f32.gmra.mxu0 %vm885_vm6, %v5217_v44 }
 0x135   : > { %4389 = vmatprep.mubr.msk.f32.mxu0 %vm885_vm6, %v872_v55 }
 0x138   : > { %4390 = vmatmul.mubr.msk.f32.gmra.mxu0 %vm885_vm6, %v5235_v54 }
 0x139   : > { %4392 = vmatprep.mubr.msk.f32.mxu0 %vm885_vm6, %v874_v61 }
 0x13c   : > { %4393 = vmatmul.mubr.msk.f32.gmra.mxu0 %vm885_vm6, %v875_v59 }
 0x13d   : > { %4395 = vmatprep.mubr.msk.f32.mxu0 %vm885_vm6, %v876_v16 }
 0x140   : > { %4396 = vmatmul.mubr.msk.f32.gmra.mxu0 %vm885_vm6, %v877_v15 }
 0x141   : > { %4398 = vmatprep.mubr.msk.f32.mxu0 %vm885_vm6, %v878_v24 }
 0x144   : > { %4399 = vmatmul.mubr.msk.f32.gmra.mxu0 %vm885_vm6, %v879_v21 }
 0x145   : > { %4401 = vmatprep.mubr.msk.f32.mxu0 %vm885_vm6, %v876_v16 }
 0x148   : > { %4402 = vmatmul.mubr.msk.f32.gmra.mxu0 %vm885_vm6, %v877_v15 }
 0x150   : > { %v4254_v63 = vpop.f32.mrf.mxu0 }
 0x152   : > { %v1052_v7 = vpop.f32.mrf.mxu0 }
 0x158   : > { %v4257_v56 = vpop.f32.mrf.mxu0  ;;  %v4306_v11 = vpop.f32.mrf.mxu1 }
 0x159   : > { %v1286_v30 = vadd.f32 %v4306_v11, %v4254_v63 }
 0x15a   : > { %v1062_v57 = vpop.f32.mrf.mxu0  ;;  %v1280_v22 = vpop.f32.mrf.mxu1 }
 0x15b   : > { %v1281_v59 = vadd.f32 %v1280_v22, %v1052_v7 }
 0x15c   : > { %v4309_v33 = vpop.f32.mrf.mxu1 }
 0x15d   : > { %v1296_v60 = vadd.f32 %v4309_v33, %v4257_v56 }
 0x15e   : > { %v1290_v37 = vpop.f32.mrf.mxu1 }
 0x15f   : > { %v1291_v51 = vadd.f32 %v1290_v37, %v1062_v57 }
 0x160   : > { %v4260_v5 = vpop.f32.mrf.mxu0  ;;  %v4312_v14 = vpop.f32.mrf.mxu1 }
 0x161   : > { %v1306_v10 = vadd.f32 %v4312_v14, %v4260_v5 }
 0x162   : > { %v1072_v8 = vpop.f32.mrf.mxu0  ;;  %v1300_v46 = vpop.f32.mrf.mxu1 }
 0x163   : > { %v1301_v7 = vadd.f32 %v1300_v46, %v1072_v8 }
 0x164   : > { %v4315_v48 = vpop.f32.mrf.mxu1 }
 0x166   : > { %v1310_v49 = vpop.f32.mrf.mxu1 }
 0x168   : > { %v5327_v17 = vpop.f32.mrf.mxu0  ;;  %v4318_v0 = vpop.f32.mrf.mxu1 }
 0x169   : > { %v1316_v8 = vadd.f32 %v4315_v48, %v5327_v17 }
 0x16a   : > { %v5329_v18 = vpop.f32.mrf.mxu0  ;;  %v1320_v54 = vpop.f32.mrf.mxu1 }
 0x170   : > { %v5331_v26 = vpop.f32.mrf.mxu0  ;;  %v5375_v32 = vpop.f32.mrf.mxu1 }
 0x172   : > { %v5333_v27 = vpop.f32.mrf.mxu0  ;;  %v5381_v28 = vpop.f32.mrf.mxu1 }
 0x178   : > { %v5335_v40 = vpop.f32.mrf.mxu0  ;;  %v5383_v61 = vpop.f32.mrf.mxu1 }
 0x17a   : > { %v5337_v42 = vpop.f32.mrf.mxu0  ;;  %v5389_v15 = vpop.f32.mrf.mxu1 }
 0x180   : > { %v5339_v13 = vpop.f32.mrf.mxu0  ;;  %v5399_v12 = vpop.f32.mrf.mxu1 }
 0x182   : > { %v5341_v52 = vpop.f32.mrf.mxu0  ;;  %v5416_v46 = vpop.f32.mrf.mxu1 }
 0x188   : > { %v5343_v41 = vpop.f32.mrf.mxu0 }
 0x18a   : > { %v5345_v58 = vpop.f32.mrf.mxu0 }
 0x190   : > { %v5347_v9 = vpop.f32.mrf.mxu0 }
 0x192   : > { %v5349_v19 = vpop.f32.mrf.mxu0 }
 0x198   : > { %v5351_v20 = vpop.f32.mrf.mxu0 }
 0x19a   : > { %v5353_v25 = vpop.f32.mrf.mxu0 }
 0x1a0   : > { %v5355_v36 = vpop.f32.mrf.mxu0 }
 0x1a2   : > { %v5357_v39 = vpop.f32.mrf.mxu0 }
 0x1a8   : > { %v5359_v38 = vpop.f32.mrf.mxu0 }
 0x1aa   : > { %v5361_v43 = vpop.f32.mrf.mxu0 }
 0x1b0   : > { %v5363_v44 = vpop.f32.mrf.mxu0 }
 0x1b2   : > { %v5365_v2 = vpop.f32.mrf.mxu0 }
 0x1b8   : > { %v5367_v6 = vpop.f32.mrf.mxu0 }
 0x1ba   : > { %v5369_v50 = vpop.f32.mrf.mxu0 }
 0x1c0   : > { %v5371_v4 = vpop.f32.mrf.mxu0 }
 0x1c2   : > { %v5373_v55 = vpop.f32.mrf.mxu0 }
 0x1c8   : > { %v5377_v23 = vpop.f32.mrf.mxu0 }
 0x1ca   : > { %v5379_v34 = vpop.f32.mrf.mxu0 }
 0x1cc   : > { %v4358_v31 = vpop.f32.mrf.mxu0 }
 0x1cd   : > { %v5385_v45 = vadd.f32 %v4358_v31, %v1286_v30 }
 0x1ce   : > { %v1511_v47 = vpop.f32.mrf.mxu0 }
 0x1cf   : > { %v5387_v62 = vadd.f32 %v1511_v47, %v1281_v59  ;;  %v1772_v16 = vmul.f32 %v5385_v45, %v5385_v45  ;;  %v1703_v21 = vsel %vm814_vm4, %v5385_v45, 0.0 }
 0x1d0   : > { %v4361_v53 = vpop.f32.mrf.mxu0 }
 0x1d1   : > { %v1702_v1 = vsel %vm814_vm4, %v5387_v62, 0.0  ;;  %v1771_v3 = vmul.f32 %v5387_v62, %v5387_v62  ;;  %v5397_v29 = vadd.f32 %v4361_v53, %v1296_v60  ;;  %v1804_v22 = vsel %vm814_vm4, %v1772_v16, 0.0 }
 0x1d2   : > { %v1521_v35 = vpop.f32.mrf.mxu0  ;;  %v1704_v56 = vadd.f32 %v1703_v21, %v1702_v1 }
 0x1d3   : > { %v1803_v24 = vsel %vm814_vm4, %v1771_v3, 0.0  ;;  %v5404_v63 = vadd.f32 %v1521_v35, %v1291_v51  ;;  %v1774_v57 = vmul.f32 %v5397_v29, %v5397_v29  ;;  %v1707_v59 = vsel %vm814_vm4, %v5397_v29, 0.0  ;;  %v5425_v35 = vpop.f32.mrf.mxu1 }
 0x1d4   : > { %v4364_v11 = vpop.f32.mrf.mxu0  ;;  %v1805_v14 = vadd.f32 %v1804_v22, %v1803_v24  ;;  %v1311_v51 = vadd.f32 %v1310_v49, %v5329_v18  ;;  %v1321_v22 = vadd.f32 %v1320_v54, %v5333_v27 }
 0x1d5   : > { %v1705_v5 = vsel %vm814_vm4, %v5404_v63, 0.0  ;;  %v1773_v33 = vmul.f32 %v5404_v63, %v5404_v63  ;;  %v5413_v37 = vadd.f32 %v4364_v11, %v1306_v10  ;;  %v1808_v53 = vsel %vm814_vm4, %v1774_v57, 0.0 }
 0x1d6   : > { %v1706_v30 = vadd.f32 %v1705_v5, %v1704_v56  ;;  %v1531_v31 = vpop.f32.mrf.mxu0 }
 0x1d7   : > { %v1806_v47 = vsel %vm814_vm4, %v1773_v33, 0.0  ;;  %v5421_v60 = vadd.f32 %v1531_v31, %v1301_v7  ;;  %v1776_v17 = vmul.f32 %v5413_v37, %v5413_v37  ;;  %v1326_v7 = vadd.f32 %v4318_v0, %v5331_v26  ;;  %v5444_v31 = vpop.f32.mrf.mxu1 }
 0x1d8   : > { %v1807_v16 = vadd.f32 %v1806_v47, %v1805_v14  ;;  %v1708_v1 = vadd.f32 %v1707_v59, %v1706_v30  ;;  %v4367_v3 = vpop.f32.mrf.mxu0  ;;  %v1711_v56 = vsel %vm814_vm4, %v5413_v37, 0.0 }
 0x1d9   : > { %v1709_v48 = vsel %vm814_vm4, %v5421_v60, 0.0  ;;  %v1775_v10 = vmul.f32 %v5421_v60, %v5421_v60  ;;  %v5433_v21 = vadd.f32 %v4367_v3, %v1316_v8  ;;  %v1812_v8 = vsel %vm814_vm4, %v1776_v17, 0.0 }
 0x1da   : > { %v1710_v24 = vadd.f32 %v1709_v48, %v1708_v1  ;;  %v1809_v18 = vadd.f32 %v1808_v53, %v1807_v16  ;;  %v1541_v49 = vpop.f32.mrf.mxu0  ;;  %v5455_v53 = vpop.f32.mrf.mxu1  ;;  %v1331_v17 = vadd.f32 %v5381_v28, %v5337_v42  ;;  %v1346_v42 = vadd.f32 %v5383_v61, %v5339_v13 }
 0x1db   : > { %v1810_v57 = vsel %vm814_vm4, %v1775_v10, 0.0  ;;  %v5439_v11 = vadd.f32 %v1541_v49, %v1311_v51  ;;  %v1778_v33 = vmul.f32 %v5433_v21, %v5433_v21  ;;  %v1336_v51 = vadd.f32 %v5375_v32, %v5335_v40 }
 0x1dc   : > { %v1811_v5 = vadd.f32 %v1810_v57, %v1809_v18  ;;  %v1712_v14 = vadd.f32 %v1711_v56, %v1710_v24  ;;  %v4370_v30 = vpop.f32.mrf.mxu0  ;;  %v1715_v16 = vsel %vm814_vm4, %v5433_v21, 0.0  ;;  %v1370_v28 = vpop.f32.mrf.mxu1 }
 0x1dd   : > { %v1713_v26 = vsel %vm814_vm4, %v5439_v11, 0.0  ;;  %v1777_v0 = vmul.f32 %v5439_v11, %v5439_v11  ;;  %v5451_v59 = vadd.f32 %v4370_v30, %v1326_v7  ;;  %v1816_v48 = vsel %vm814_vm4, %v1778_v33, 0.0 }
 0x1de   : > { %v1714_v47 = vadd.f32 %v1713_v26, %v1712_v14  ;;  %v1813_v27 = vadd.f32 %v1812_v8, %v1811_v5  ;;  %v1551_v54 = vpop.f32.mrf.mxu0  ;;  %v1341_v30 = vadd.f32 %v5389_v15, %v5341_v52  ;;  %v1356_v15 = vadd.f32 %v5399_v12, %v5343_v41 }
 0x1df   : > { %v1814_v1 = vsel %vm814_vm4, %v1777_v0, 0.0  ;;  %v5460_v3 = vadd.f32 %v1551_v54, %v1321_v22  ;;  %v1780_v40 = vmul.f32 %v5451_v59, %v5451_v59  ;;  %v1719_v5 = vsel %vm814_vm4, %v5451_v59, 0.0 }
 0x1e0   : > { %v1815_v10 = vadd.f32 %v1814_v1, %v1813_v27  ;;  %v1716_v24 = vadd.f32 %v1715_v16, %v1714_v47  ;;  %v4373_v18 = vpop.f32.mrf.mxu0  ;;  %v4336_v27 = vpop.f32.mrf.mxu1 }
 0x1e1   : > { %v1717_v32 = vsel %vm814_vm4, %v5460_v3, 0.0  ;;  %v1779_v49 = vmul.f32 %v5460_v3, %v5460_v3  ;;  %v5471_v7 = vadd.f32 %v4373_v18, %v1336_v51  ;;  %v1820_v13 = vsel %vm814_vm4, %v1780_v40, 0.0 }
 0x1e2   : > { %v1718_v56 = vadd.f32 %v1717_v32, %v1716_v24  ;;  %v1817_v57 = vadd.f32 %v1816_v48, %v1815_v10  ;;  %v1561_v22 = vpop.f32.mrf.mxu0  ;;  %v1351_v24 = vadd.f32 %v5416_v46, %v5345_v58  ;;  %v1366_v46 = vadd.f32 %v5425_v35, %v5347_v9 }
 0x1e3   : > { %v1818_v33 = vsel %vm814_vm4, %v1779_v49, 0.0  ;;  %v5478_v14 = vadd.f32 %v1561_v22, %v1331_v17  ;;  %v1782_v26 = vmul.f32 %v5471_v7, %v5471_v7  ;;  %v1723_v17 = vsel %vm814_vm4, %v5471_v7, 0.0 }
 0x1e4   : > { %v1819_v8 = vadd.f32 %v1818_v33, %v1817_v57  ;;  %v1720_v0 = vadd.f32 %v1719_v5, %v1718_v56  ;;  %v4376_v47 = vpop.f32.mrf.mxu0  ;;  %v1380_v56 = vpop.f32.mrf.mxu1 }
 0x1e5   : > { %v1721_v61 = vsel %vm814_vm4, %v5478_v14, 0.0  ;;  %v1781_v54 = vmul.f32 %v5478_v14, %v5478_v14  ;;  %v5489_v51 = vadd.f32 %v4376_v47, %v1346_v42  ;;  %v1824_v18 = vsel %vm814_vm4, %v1782_v26, 0.0 }
 0x1e6   : > { %v1722_v16 = vadd.f32 %v1721_v61, %v1720_v0  ;;  %v1821_v1 = vadd.f32 %v1820_v13, %v1819_v8  ;;  %v1571_v52 = vpop.f32.mrf.mxu0  ;;  %v4339_v33 = vpop.f32.mrf.mxu1  ;;  %v1361_v0 = vadd.f32 %v5444_v31, %v5349_v19  ;;  %v1376_v19 = vadd.f32 %v5455_v53, %v5351_v20 }
 0x1e7   : > { %v1822_v48 = vsel %vm814_vm4, %v1781_v54, 0.0  ;;  %v5496_v10 = vadd.f32 %v1571_v52, %v1341_v30  ;;  %v1784_v57 = vmul.f32 %v5489_v51, %v5489_v51  ;;  %v1727_v30 = vsel %vm814_vm4, %v5489_v51, 0.0 }
 0x1e8   : > { %v1823_v40 = vadd.f32 %v1822_v48, %v1821_v1  ;;  %v1724_v32 = vadd.f32 %v1723_v17, %v1722_v16  ;;  %v4379_v49 = vpop.f32.mrf.mxu0  ;;  %v1390_v31 = vpop.f32.mrf.mxu1 }
 0x1e9   : > { %v1725_v41 = vsel %vm814_vm4, %v5496_v10, 0.0  ;;  %v1783_v12 = vmul.f32 %v5496_v10, %v5496_v10  ;;  %v5507_v22 = vadd.f32 %v4379_v49, %v1356_v15  ;;  %v1828_v16 = vsel %vm814_vm4, %v1784_v57, 0.0 }
 0x1ea   : > { %v1726_v42 = vadd.f32 %v1725_v41, %v1724_v32  ;;  %v1825_v5 = vadd.f32 %v1824_v18, %v1823_v40  ;;  %v1581_v58 = vpop.f32.mrf.mxu0  ;;  %v1371_v40 = vadd.f32 %v1370_v28, %v5353_v25  ;;  %v1386_v28 = vadd.f32 %v4336_v27, %v5355_v36 }
 0x1eb   : > { %v1826_v8 = vsel %vm814_vm4, %v1783_v12, 0.0  ;;  %v5514_v26 = vadd.f32 %v1581_v58, %v1351_v24  ;;  %v1786_v13 = vmul.f32 %v5507_v22, %v5507_v22  ;;  %v1731_v48 = vsel %vm814_vm4, %v5507_v22, 0.0  ;;  %v4342_v12 = vpop.f32.mrf.mxu1 }
 0x1ec   : > { %v1827_v47 = vadd.f32 %v1826_v8, %v1825_v5  ;;  %v1728_v61 = vadd.f32 %v1727_v30, %v1726_v42  ;;  %v4382_v54 = vpop.f32.mrf.mxu0 }
 0x1ed   : > { %v1729_v9 = vsel %vm814_vm4, %v5514_v26, 0.0  ;;  %v1785_v35 = vmul.f32 %v5514_v26, %v5514_v26  ;;  %v5525_v1 = vadd.f32 %v4382_v54, %v1366_v46  ;;  %v1832_v32 = vsel %vm814_vm4, %v1786_v13, 0.0 }
 0x1ee   : > { %v1730_v52 = vadd.f32 %v1729_v9, %v1728_v61  ;;  %v1829_v15 = vadd.f32 %v1828_v16, %v1827_v47  ;;  %v1591_v17 = vpop.f32.mrf.mxu0  ;;  %v1381_v47 = vadd.f32 %v1380_v56, %v5357_v39  ;;  %v1400_v9 = vpop.f32.mrf.mxu1  ;;  %v1396_v56 = vadd.f32 %v4339_v33, %v5359_v38 }
 0x1ef   : > { %v1830_v24 = vsel %vm814_vm4, %v1785_v35, 0.0  ;;  %v5532_v18 = vadd.f32 %v1591_v17, %v1361_v0  ;;  %v1788_v42 = vmul.f32 %v5525_v1, %v5525_v1  ;;  %v1735_v30 = vsel %vm814_vm4, %v5525_v1, 0.0 }
 0x1f0   : > { %v1831_v49 = vadd.f32 %v1830_v24, %v1829_v15  ;;  %v1732_v57 = vadd.f32 %v1731_v48, %v1730_v52  ;;  %v4385_v41 = vpop.f32.mrf.mxu0 }
 0x1f1   : > { %v1733_v20 = vsel %vm814_vm4, %v5532_v18, 0.0  ;;  %v1787_v53 = vmul.f32 %v5532_v18, %v5532_v18  ;;  %v5542_v5 = vadd.f32 %v4385_v41, %v1376_v19  ;;  %v1836_v35 = vsel %vm814_vm4, %v1788_v42, 0.0  ;;  %v4345_v19 = vpop.f32.mrf.mxu1 }
 0x1f2   : > { %v1734_v58 = vadd.f32 %v1733_v20, %v1732_v57  ;;  %v1833_v46 = vadd.f32 %v1832_v32, %v1831_v49  ;;  %v1601_v25 = vpop.f32.mrf.mxu0  ;;  %v1391_v32 = vadd.f32 %v1390_v31, %v5361_v43  ;;  %v1406_v43 = vadd.f32 %v4342_v12, %v5363_v44 }
 0x1f3   : > { %v1834_v8 = vsel %vm814_vm4, %v1787_v53, 0.0  ;;  %v5548_v0 = vadd.f32 %v1601_v25, %v1371_v40  ;;  %v1790_v61 = vmul.f32 %v5542_v5, %v5542_v5  ;;  %v1739_v48 = vsel %vm814_vm4, %v5542_v5, 0.0  ;;  %v1410_v31 = vpop.f32.mrf.mxu1 }
 0x1f4   : > { %v1835_v13 = vadd.f32 %v1834_v8, %v1833_v46  ;;  %v1736_v54 = vadd.f32 %v1735_v30, %v1734_v58  ;;  %v4388_v16 = vpop.f32.mrf.mxu0 }
 0x1f5   : > { %v1737_v36 = vsel %vm814_vm4, %v5548_v0, 0.0  ;;  %v1789_v27 = vmul.f32 %v5548_v0, %v5548_v0  ;;  %v5558_v52 = vadd.f32 %v4388_v16, %v1386_v28  ;;  %v1840_v49 = vsel %vm814_vm4, %v1790_v61, 0.0 }
 0x1f6   : > { %v1738_v15 = vadd.f32 %v1737_v36, %v1736_v54  ;;  %v1837_v17 = vadd.f32 %v1836_v35, %v1835_v13  ;;  %v1611_v39 = vpop.f32.mrf.mxu0  ;;  %v4348_v35 = vpop.f32.mrf.mxu1 }
 0x1f7   : > { %v1838_v24 = vsel %vm814_vm4, %v1789_v27, 0.0  ;;  %v5564_v40 = vadd.f32 %v1611_v39, %v1381_v47  ;;  %v1792_v20 = vmul.f32 %v5558_v52, %v5558_v52  ;;  %v1743_v28 = vsel %vm814_vm4, %v5558_v52, 0.0 }
 0x1f8   : > { %v1839_v57 = vadd.f32 %v1838_v24, %v1837_v17  ;;  %v1740_v41 = vadd.f32 %v1739_v48, %v1738_v15  ;;  %v4391_v42 = vpop.f32.mrf.mxu0  ;;  %v1401_v47 = vadd.f32 %v1400_v9, %v5365_v2  ;;  %v1416_v9 = vadd.f32 %v4345_v19, %v5367_v6 }
 0x1f9   : > { %v1741_v38 = vsel %vm814_vm4, %v5564_v40, 0.0  ;;  %v1791_v33 = vmul.f32 %v5564_v40, %v5564_v40  ;;  %v5574_v53 = vadd.f32 %v4391_v42, %v1396_v56  ;;  %v1844_v36 = vsel %vm814_vm4, %v1792_v20, 0.0  ;;  %v1420_v42 = vpop.f32.mrf.mxu1 }
 0x1fa   : > { %v1742_v58 = vadd.f32 %v1741_v38, %v1740_v41  ;;  %v1841_v46 = vadd.f32 %v1840_v49, %v1839_v57  ;;  %v1621_v25 = vpop.f32.mrf.mxu0  ;;  %v1411_v24 = vadd.f32 %v1410_v31, %v5369_v50 }
 0x1fb   : > { %v1842_v30 = vsel %vm814_vm4, %v1791_v33, 0.0  ;;  %v5580_v8 = vadd.f32 %v1621_v25, %v1391_v32  ;;  %v1794_v61 = vmul.f32 %v5574_v53, %v5574_v53  ;;  %v1747_v39 = vsel %vm814_vm4, %v5574_v53, 0.0  ;;  %v4351_v25 = vpop.f32.mrf.mxu1 }
 0x1fc   : > { %v1843_v13 = vadd.f32 %v1842_v30, %v1841_v46  ;;  %v1744_v54 = vadd.f32 %v1743_v28, %v1742_v58  ;;  %v4394_v16 = vpop.f32.mrf.mxu0  ;;  %v1426_v46 = vadd.f32 %v4348_v35, %v5371_v4  ;;  %v1421_v30 = vadd.f32 %v1420_v42, %v5373_v55 }
 0x1fd   : > { %v1745_v44 = vsel %vm814_vm4, %v5580_v8, 0.0  ;;  %v1793_v12 = vmul.f32 %v5580_v8, %v5580_v8  ;;  %v5590_v27 = vadd.f32 %v4394_v16, %v1406_v43  ;;  %v1848_v32 = vsel %vm814_vm4, %v1794_v61, 0.0  ;;  %v1430_v55 = vpop.f32.mrf.mxu1 }
 0x1fe   : > { %v1746_v15 = vadd.f32 %v1745_v44, %v1744_v54  ;;  %v1845_v17 = vadd.f32 %v1844_v36, %v1843_v13  ;;  %v1631_v2 = vpop.f32.mrf.mxu0 }
 0x1ff   : > { %v1846_v56 = vsel %vm814_vm4, %v1793_v12, 0.0  ;;  %v5596_v48 = vadd.f32 %v1631_v2, %v1401_v47  ;;  %v1796_v20 = vmul.f32 %v5590_v27, %v5590_v27  ;;  %v1751_v43 = vsel %vm814_vm4, %v5590_v27, 0.0 }
 0x200   : > { %v1847_v49 = vadd.f32 %v1846_v56, %v1845_v17  ;;  %v1748_v57 = vadd.f32 %v1747_v39, %v1746_v15  ;;  %v4397_v41 = vpop.f32.mrf.mxu0  ;;  %v1436_v17 = vadd.f32 %v4351_v25, %v5377_v23  ;;  %v1431_v56 = vadd.f32 %v1430_v55, %v5379_v34 }
 0x201   : > { %v1749_v6 = vsel %vm814_vm4, %v5596_v48, 0.0  ;;  %v1795_v19 = vmul.f32 %v5596_v48, %v5596_v48  ;;  %v5606_v38 = vadd.f32 %v4397_v41, %v1416_v9  ;;  %v1852_v16 = vsel %vm814_vm4, %v1796_v20, 0.0 }
 0x202   : > { %v1750_v33 = vadd.f32 %v1749_v6, %v1748_v57  ;;  %v1849_v58 = vadd.f32 %v1848_v32, %v1847_v49  ;;  %v1641_v50 = vpop.f32.mrf.mxu0 }
 0x203   : > { %v1850_v31 = vsel %vm814_vm4, %v1795_v19, 0.0  ;;  %v5612_v28 = vadd.f32 %v1641_v50, %v1411_v24  ;;  %v1798_v13 = vmul.f32 %v5606_v38, %v5606_v38  ;;  %v1755_v2 = vsel %vm814_vm4, %v5606_v38, 0.0 }
 0x204   : > { %v1851_v47 = vadd.f32 %v1850_v31, %v1849_v58  ;;  %v1752_v61 = vadd.f32 %v1751_v43, %v1750_v33  ;;  %v4400_v54 = vpop.f32.mrf.mxu0 }
 0x205   : > { %v1753_v4 = vsel %vm814_vm4, %v5612_v28, 0.0  ;;  %v1797_v35 = vmul.f32 %v5612_v28, %v5612_v28  ;;  %v5622_v36 = vadd.f32 %v4400_v54, %v1426_v46  ;;  %v1856_v24 = vsel %vm814_vm4, %v1798_v13, 0.0 }
 0x206   : > { %v1754_v44 = vadd.f32 %v1753_v4, %v1752_v61  ;;  %v1853_v12 = vadd.f32 %v1852_v16, %v1851_v47  ;;  %v1651_v15 = vpop.f32.mrf.mxu0 }
 0x207   : > { %v1854_v9 = vsel %vm814_vm4, %v1797_v35, 0.0  ;;  %v5628_v39 = vadd.f32 %v1651_v15, %v1421_v30  ;;  %v1800_v41 = vmul.f32 %v5622_v36, %v5622_v36  ;;  %v1759_v34 = vsel %vm814_vm4, %v5622_v36, 0.0 }
 0x208   : > { %v1855_v32 = vadd.f32 %v1854_v9, %v1853_v12  ;;  %v1756_v49 = vadd.f32 %v1755_v2, %v1754_v44  ;;  %v4403_v57 = vpop.f32.mrf.mxu0 }
 0x209   : > { %v1757_v23 = vsel %vm814_vm4, %v5628_v39, 0.0  ;;  %v1799_v42 = vmul.f32 %v5628_v39, %v5628_v39  ;;  %v5638_v20 = vadd.f32 %v4403_v57, %v1436_v17  ;;  %v1860_v43 = vsel %vm814_vm4, %v1800_v41, 0.0 }
 0x20a   : > { %v1758_v6 = vadd.f32 %v1757_v23, %v1756_v49  ;;  %v1857_v19 = vadd.f32 %v1856_v24, %v1855_v32  ;;  %v1661_v33 = vpop.f32.mrf.mxu0 }
 0x20b   : > { %v1858_v58 = vsel %vm814_vm4, %v1799_v42, 0.0  ;;  %v5643_v50 = vadd.f32 %v1661_v33, %v1431_v56  ;;  %v1802_v31 = vmul.f32 %v5638_v20, %v5638_v20  ;;  %v1763_v54 = vsel %vm814_vm4, %v5638_v20, 0.0 }
 0x20c   : > { %v1859_v46 = vadd.f32 %v1858_v58, %v1857_v19  ;;  %v1760_v25 = vadd.f32 %v1759_v34, %v1758_v6 }
 0x20d   : > { %v1761_v30 = vsel %vm814_vm4, %v5643_v50, 0.0  ;;  %v1801_v47 = vmul.f32 %v5643_v50, %v5643_v50  ;;  %v1864_v44 = vsel %vm814_vm4, %v1802_v31, 0.0 }
 0x20e   : > { %v1762_v13 = vadd.f32 %v1761_v30, %v1760_v25  ;;  %v1861_v61 = vadd.f32 %v1860_v43, %v1859_v46 }
 0x20f   : > { %v1862_v16 = vsel %vm814_vm4, %v1801_v47, 0.0 }
 0x210   : > { %v1764_v4 = vadd.f32 %v1763_v54, %v1762_v13  ;;  %v1863_v35 = vadd.f32 %v1862_v16, %v1861_v61 }
 0x212   : > { %v1765_v12 = vrot.slane %v1764_v4, 4  ;;  %v1865_v15 = vadd.f32 %v1864_v44, %v1863_v35 }
 0x214   : > { %v1766_v55 = vadd.f32 %v1765_v12, %v1764_v4  ;;  %v1866_v17 = vrot.slane %v1865_v15, 4 }
 0x216   : > { %v1767_v2 = vrot.slane %v1766_v55, 2  ;;  %v1867_v9 = vadd.f32 %v1866_v17, %v1865_v15 }
 0x218   : > { %v1768_v56 = vadd.f32 %v1767_v2, %v1766_v55  ;;  %v1868_v24 = vrot.slane %v1867_v9, 2 }
 0x21a   : > { %v1769_v32 = vrot.slane %v1768_v56, 1  ;;  %v1869_v49 = vadd.f32 %v1868_v24, %v1867_v9 }
 0x21c   : > { %v1770_v57 = vadd.f32 %v1769_v32, %v1768_v56  ;;  %v1870_v41 = vrot.slane %v1869_v49, 1 }
 0x21e   : > { %v1871_v23 = vadd.f32 %v1870_v41, %v1869_v49  ;;  %v5656_v42 = vmul.f32 0.00390625, %v1770_v57 }
 0x220   : > { %v1873_v6 = vmul.f32 0.00390625, %v1871_v23  ;;  %v1874_v19 = vmul.f32 %v5656_v42, %v5656_v42  ;;  %v1906_v33 = vsub.f32 %v5643_v50, %v5656_v42  ;;  %v1886_v58 = vsub.f32 %v5478_v14, %v5656_v42 }
 0x221   : > { %v1887_v46 = vsub.f32 %v5471_v7, %v5656_v42  ;;  %v1888_v43 = vsub.f32 %v5496_v10, %v5656_v42  ;;  %v1889_v31 = vsub.f32 %v5489_v51, %v5656_v42  ;;  %v1890_v30 = vsub.f32 %v5514_v26, %v5656_v42 }
 0x222   : > { %v1875_v34 = vsub.f32 %v1873_v6, %v1874_v19  ;;  %v1891_v50 = vsub.f32 %v5507_v22, %v5656_v42  ;;  %v1892_v47 = vsub.f32 %v5532_v18, %v5656_v42  ;;  %v1893_v14 = vsub.f32 %v5525_v1, %v5656_v42 }
 0x223   : > { %v1894_v7 = vsub.f32 %v5548_v0, %v5656_v42  ;;  %v1895_v10 = vsub.f32 %v5542_v5, %v5656_v42  ;;  %v1896_v51 = vsub.f32 %v5564_v40, %v5656_v42  ;;  %v1897_v26 = vsub.f32 %v5558_v52, %v5656_v42 }
 0x224   : > { %v1908_v25 = vadd.f32 1e-05, %v1875_v34  ;;  %v1898_v22 = vsub.f32 %v5580_v8, %v5656_v42  ;;  %v1899_v18 = vsub.f32 %v5574_v53, %v5656_v42  ;;  %v1900_v1 = vsub.f32 %v5596_v48, %v5656_v42 }
 0x225   : > { %v1901_v0 = vsub.f32 %v5590_v27, %v5656_v42  ;;  %v1902_v5 = vsub.f32 %v5612_v28, %v5656_v42  ;;  %v1903_v40 = vsub.f32 %v5606_v38, %v5656_v42  ;;  %v1904_v52 = vsub.f32 %v5628_v39, %v5656_v42 }
 0x226   : > { %4570 = vrsqrt.f32 %v1908_v25  ;;  %v1905_v8 = vsub.f32 %v5622_v36, %v5656_v42  ;;  %v1907_v53 = vsub.f32 %v5638_v20, %v5656_v42  ;;  %v1876_v48 = vsub.f32 %v5387_v62, %v5656_v42 }
 0x227   : > { %v1877_v27 = vsub.f32 %v5385_v45, %v5656_v42  ;;  %v1878_v28 = vsub.f32 %v5404_v63, %v5656_v42  ;;  %v1879_v38 = vsub.f32 %v5397_v29, %v5656_v42  ;;  %v1880_v39 = vsub.f32 %v5421_v60, %v5656_v42 }
 0x228   : > { %v1881_v36 = vsub.f32 %v5413_v37, %v5656_v42  ;;  %v1882_v20 = vsub.f32 %v5439_v11, %v5656_v42  ;;  %v1883_v62 = vsub.f32 %v5433_v21, %v5656_v42  ;;  %v1884_v45 = vsub.f32 %v5460_v3, %v5656_v42 }
 0x229   : > { %v1885_v63 = vsub.f32 %v5451_v59, %v5656_v42 }
 0x233   : > { %v4571_v13 = vpop.eup %4570 }
 0x234   : > { %v5724_v29 = vmul.f32 %v4571_v13, %v1906_v33  ;;  %v1910_v61 = vmul.f32 %v4571_v13, %v1876_v48  ;;  %v1911_v60 = vmul.f32 %v4571_v13, %v1877_v27  ;;  %v1912_v54 = vmul.f32 %v4571_v13, %v1878_v28  ;;  %v2647_v28 = vld [vmem:[%s7185_s2 + $0x8] sm:$0xf] }
 0x235   : > { %v5726_v16 = vmul.f32 %v4571_v13, %v1879_v38  ;;  %v5728_v37 = vmul.f32 %v4571_v13, %v1880_v39  ;;  %v5730_v4 = vmul.f32 %v4571_v13, %v1881_v36  ;;  %v5732_v11 = vmul.f32 %v4571_v13, %v1882_v20  ;;  %4456 = vmatprep.subr.msk.mxu0 %vm982_vm0, %v2647_v28 }
 0x236   : > { %v1942_v21 = vmax.f32 %v1910_v61, 0.0  ;;  %v1943_v35 = vmax.f32 %v1911_v60, 0.0  ;;  %v5734_v44 = vmul.f32 %v4571_v13, %v1883_v62  ;;  %v5736_v3 = vmul.f32 %v4571_v13, %v1884_v45  ;;  %4457 = vmatpush3.msk.msra.mxu0 %vm982_vm0, %v2647_v28  ;;  %v2646_v45 = vld [vmem:[%s7185_s2] sm:$0xff] }
 0x237   : > { %v5738_v59 = vmul.f32 %v4571_v13, %v1885_v63  ;;  %v5740_v12 = vmul.f32 %v4571_v13, %v1886_v58  ;;  %v5742_v15 = vmul.f32 %v4571_v13, %v1887_v46  ;;  %v5744_v9 = vmul.f32 %v4571_v13, %v1888_v43  ;;  %4458 = vmatprep.subr.mxu0 %v2646_v45 }
 0x238   : > { %v2038_v55 = vrot.slane %v1942_v21, 7  ;;  %v2039_v17 = vrot.slane %v1943_v35, 7  ;;  %v2134_v2 = vrot.slane %v1943_v35, 5  ;;  %v5746_v56 = vmul.f32 %v4571_v13, %v1889_v31  ;;  %4459 = vmatpush3.msra.mxu0 %v2646_v45 }
 0x239   : > { %v5748_v24 = vmul.f32 %v4571_v13, %v1890_v30  ;;  %v5753_v49 = vmul.f32 %v4571_v13, %v1891_v50  ;;  %v5755_v57 = vmul.f32 %v4571_v13, %v1892_v47  ;;  %v5757_v41 = vmul.f32 %v4571_v13, %v1893_v14 }
 0x23a   : > { %v5751_v32 = vsel %vm267_vm1, %v2038_v55, %v2039_v17  ;;  %v2182_v23 = vsel %vm267_vm1, %v2039_v17, %v2134_v2  ;;  %v5761_v6 = vmul.f32 %v4571_v13, %v1894_v7  ;;  %v5763_v19 = vmul.f32 %v4571_v13, %v1895_v10 }
 0x23b   : > { %v2231_v42 = vrot.slane %v5751_v32, 1  ;;  %v2233_v33 = vrot.slane %v2182_v23, 1  ;;  %v5765_v34 = vmul.f32 %v4571_v13, %v1896_v51  ;;  %v5767_v58 = vmul.f32 %v4571_v13, %v1897_v26 }
 0x23c   : > { %v5769_v46 = vmul.f32 %v4571_v13, %v1898_v22  ;;  %v5771_v25 = vmul.f32 %v4571_v13, %v1899_v18  ;;  %v5773_v43 = vmul.f32 %v4571_v13, %v1900_v1  ;;  %v5775_v31 = vmul.f32 %v4571_v13, %v1901_v0  ;;  %v3938_v1 = vld [vmem:[%s7185_s2 + $0x18] sm:$0xf] }
 0x23d   : > { %v5777_v30 = vmul.f32 %v4571_v13, %v1902_v5  ;;  %v2234_v50 = vsel %vm460_vm3, %v2231_v42, %v2233_v33  ;;  %v5780_v47 = vmul.f32 %v4571_v13, %v1903_v40  ;;  %v5782_v14 = vmul.f32 %v4571_v13, %v1904_v52  ;;  %4404 = vmatprep.subr.msk.mxu1 %vm982_vm0, %v3938_v1  ;;  %v3937_v52 = vld [vmem:[%s7185_s2 + $0x10] sm:$0xff] }
 0x23e   : > { %v5784_v7 = vmul.f32 %v4571_v13, %v1905_v8  ;;  %2312 = vrot.lane.b32.xlu1 %v2234_v50, %s4615_s23  ;;  %v5787_v10 = vmul.f32 %v4571_v13, %v1907_v53  ;;  %v1990_v51 = vrot.slane %v1942_v21, 1  ;;  %v2407_v0 = vrot.slane %v5751_v32, 2  ;;  %4405 = vmatpush3.msk.msra.mxu1 %vm982_vm0, %v3938_v1 }
 0x23f   : > { %v2409_v5 = vrot.slane %v2182_v23, 2  ;;  %4406 = vmatprep.subr.mxu1 %v3937_v52  ;;  %v1944_v8 = vmax.f32 %v1912_v54, 0.0  ;;  %v1945_v53 = vmax.f32 %v5726_v16, 0.0  ;;  %v1946_v48 = vmax.f32 %v5728_v37, 0.0 }
 0x240   : > { %v5790_v26 = vsel %vm267_vm1, %v1990_v51, %v2038_v55  ;;  %4407 = vmatpush3.msra.mxu1 %v3937_v52  ;;  %v1947_v27 = vmax.f32 %v5730_v4, 0.0  ;;  %v1948_v63 = vmax.f32 %v5732_v11, 0.0  ;;  %v1949_v61 = vmax.f32 %v5734_v44, 0.0 }
 0x241   : > { %v2230_v22 = vrot.slane %v5790_v26, 1  ;;  %v2410_v40 = vsel %vm637_vm2, %v2407_v0, %v2409_v5  ;;  %v1991_v38 = vrot.slane %v1944_v8, 1  ;;  %v2041_v39 = vrot.slane %v1944_v8, 7 }
 0x242   : > { %2488 = vrot.lane.b32.xlu1 %v2410_v40, %s4614_s22  ;;  %v2042_v36 = vrot.slane %v1945_v53, 7  ;;  %v2044_v13 = vrot.slane %v1946_v48, 7  ;;  %v2045_v20 = vrot.slane %v1947_v27, 7  ;;  %v2135_v62 = vrot.slane %v1945_v53, 5 }
 0x243   : > { %v2232_v18 = vsel %vm460_vm3, %v2230_v22, %v2231_v42  ;;  %v1950_v60 = vmax.f32 %v5736_v3, 0.0  ;;  %v1951_v54 = vmax.f32 %v5738_v59, 0.0  ;;  %v1992_v16 = vrot.slane %v1946_v48, 1 }
 0x244   : > { %2310 = vrot.lane.b32.xlu0 %v2232_v18, %s4615_s23  ;;  %v2136_v37 = vrot.slane %v1947_v27, 5  ;;  %v2406_v4 = vrot.slane %v5790_v26, 2  ;;  %v5823_v21 = vsel %vm267_vm1, %v2041_v39, %v2042_v36  ;;  %v2183_v35 = vsel %vm267_vm1, %v2042_v36, %v2135_v62 }
 0x245   : > { %v5827_v55 = vsel %vm267_vm1, %v1991_v38, %v2041_v39  ;;  %v5830_v11 = vsel %vm267_vm1, %v2044_v13, %v2045_v20  ;;  %v2236_v17 = vrot.slane %v5823_v21, 1  ;;  %v2238_v2 = vrot.slane %v2183_v35, 1 }
 0x246   : > { %v2408_v44 = vsel %vm637_vm2, %v2406_v4, %v2407_v0  ;;  %v2235_v23 = vrot.slane %v5827_v55, 1  ;;  %v2047_v42 = vrot.slane %v1948_v63, 7  ;;  %v2048_v33 = vrot.slane %v1949_v61, 7 }
 0x247   : > { %v5837_v50 = vrot.slane %v1950_v60, 7  ;;  %v5841_v51 = vrot.slane %v1951_v54, 7  ;;  %v2239_v22 = vsel %vm460_vm3, %v2236_v17, %v2238_v2  ;;  %v2412_v18 = vrot.slane %v5823_v21, 2 }
 0x248   : > { %2486 = vrot.lane.b32.xlu0 %v2408_v44, %s4614_s22  ;;  %v2414_v1 = vrot.slane %v2183_v35, 2  ;;  %v1952_v0 = vmax.f32 %v5740_v12, 0.0  ;;  %v1953_v5 = vmax.f32 %v5742_v15, 0.0  ;;  %2316 = vrot.lane.b32.xlu1 %v2239_v22, %s4615_s23  ;;  %v2184_v40 = vsel %vm267_vm1, %v2045_v20, %v2136_v37 }
 0x249   : > { %v2237_v52 = vsel %vm460_vm3, %v2235_v23, %v2236_v17  ;;  %v2411_v8 = vrot.slane %v5827_v55, 2  ;;  %v7191_v53 = vmax.f32 %v5744_v9, 0.0  ;;  %v5855_v48 = vsel %vm267_vm1, %v1992_v16, %v2044_v13 }
 0x24a   : > { %7209 = vst [vmem:[#allocation2_spill] sm:$0xff] %v5855_v48  ;;  %v5858_v27 = vsel %vm267_vm1, %v2047_v42, %v2048_v33  ;;  %v5863_v28 = vsel %vm267_vm1, %v5837_v50, %v5841_v51  ;;  %v7192_v38 = vmax.f32 %v5746_v56, 0.0  ;;  %v2415_v39 = vsel %vm637_vm2, %v2412_v18, %v2414_v1 }
 0x24b   : > { %7210 = vst [vmem:[#allocation3_spill] sm:$0xff] %v5858_v27  ;;  %7211 = vst [vmem:[#allocation4_spill] sm:$0xff] %v5863_v28  ;;  %v2241_v36 = vrot.slane %v5830_v11, 1  ;;  %v2243_v20 = vrot.slane %v2184_v40, 1  ;;  %v5870_v62 = vrot.slane %v1952_v0, 7  ;;  %v5874_v13 = vrot.slane %v1953_v5, 7 }
 0x24c   : > { %2314 = vrot.lane.b32.xlu0 %v2237_v52, %s4615_s23  ;;  %v2137_v45 = vrot.slane %v1949_v61, 5  ;;  %2492 = vrot.lane.b32.xlu1 %v2415_v39, %s4614_s22  ;;  %v2413_v16 = vsel %vm637_vm2, %v2411_v8, %v2412_v18  ;;  %v2240_v37 = vrot.slane %v5855_v48, 1  ;;  %v7187_v4 = vmax.f32 %v5748_v24, 0.0 }
 0x24d   : > { %v7188_v35 = vmax.f32 %v5753_v49, 0.0  ;;  %v1993_v44 = vrot.slane %v1948_v63, 1  ;;  %v5883_v17 = vrot.slane %v7191_v53, 7  ;;  %v5888_v61 = vrot.slane %v7192_v38, 7 }
 0x24e   : > { %v2244_v2 = vsel %vm460_vm3, %v2241_v36, %v2243_v20  ;;  %v2417_v23 = vrot.slane %v5830_v11, 2  ;;  %v2419_v22 = vrot.slane %v2184_v40, 2  ;;  %v2185_v18 = vsel %vm267_vm1, %v2048_v33, %v2137_v45 }
 0x24f   : > { %v5897_v63 = vsel %vm267_vm1, %v5870_v62, %v5874_v13  ;;  %v7189_v1 = vmax.f32 %v5755_v57, 0.0  ;;  %v2242_v52 = vsel %vm460_vm3, %v2240_v37, %v2241_v36  ;;  %v2416_v8 = vrot.slane %v5855_v48, 2 }
 0x250   : > { %2490 = vrot.lane.b32.xlu0 %v2413_v16, %s4614_s22  ;;  %2320 = vrot.lane.b32.xlu1 %v2244_v2, %s4615_s23  ;;  %7212 = vst [vmem:[#allocation5_spill] sm:$0xff] %v5897_v63  ;;  %v7190_v39 = vmax.f32 %v5757_v41, 0.0  ;;  %v5905_v40 = vrot.slane %v7187_v4, 7  ;;  %v5909_v33 = vrot.slane %v7188_v35, 7  ;;  %v5913_v20 = vsel %vm267_vm1, %v1993_v44, %v2047_v42 }
 0x251   : > { %7213 = vst [vmem:[#allocation6_spill] sm:$0xff] %v5913_v20  ;;  %v2420_v45 = vsel %vm637_vm2, %v2417_v23, %v2419_v22  ;;  %v2246_v36 = vrot.slane %v5858_v27, 1  ;;  %v2248_v16 = vrot.slane %v2185_v18, 1  ;;  %v5920_v37 = vsel %vm267_vm1, %v5883_v17, %v5888_v61 }
 0x252   : > { %v2138_v2 = vrot.slane %v1951_v54, 5  ;;  %v7194_v42 = vmax.f32 %v5763_v19, 0.0  ;;  %v2418_v44 = vsel %vm637_vm2, %v2416_v8, %v2417_v23  ;;  %v2245_v22 = vrot.slane %v5913_v20, 1 }
 0x253   : > { %v1994_v4 = vrot.slane %v1950_v60, 1  ;;  %v5933_v35 = vrot.slane %v7189_v1, 7  ;;  %v5937_v59 = vrot.slane %v7190_v39, 7  ;;  %v5943_v54 = vsel %vm267_vm1, %v5905_v40, %v5909_v33 }
 0x254   : > { %2318 = vrot.lane.b32.xlu0 %v2242_v52, %s4615_s23  ;;  %2496 = vrot.lane.b32.xlu1 %v2420_v45, %s4614_s22  ;;  %v7193_v52 = vmax.f32 %v5761_v6, 0.0  ;;  %v2249_v23 = vsel %vm460_vm3, %v2246_v36, %v2248_v16  ;;  %v2422_v3 = vrot.slane %v5858_v27, 2  ;;  %v2424_v60 = vrot.slane %v2185_v18, 2 }
 0x255   : > { %v7195_v8 = vmax.f32 %v5765_v34, 0.0  ;;  %v7196_v45 = vmax.f32 %v5767_v58, 0.0  ;;  %v2186_v1 = vsel %vm267_vm1, %v5841_v51, %v2138_v2  ;;  %v5958_v39 = vrot.slane %v7194_v42, 7 }
 0x256   : > { %v2247_v16 = vsel %vm460_vm3, %v2245_v22, %v2246_v36  ;;  %v2421_v18 = vrot.slane %v5913_v20, 2  ;;  %v7198_v53 = vmax.f32 %v5769_v46, 0.0  ;;  %v7199_v38 = vmax.f32 %v5771_v25, 0.0 }
 0x257   : > { %v5967_v51 = vsel %vm267_vm1, %v1994_v4, %v5837_v50  ;;  %v5972_v2 = vsel %vm267_vm1, %v5933_v35, %v5937_v59  ;;  %v2425_v36 = vsel %vm637_vm2, %v2422_v3, %v2424_v60  ;;  %v2251_v22 = vrot.slane %v5863_v28, 1 }
 0x258   : > { %2494 = vrot.lane.b32.xlu0 %v2418_v44, %s4614_s22  ;;  %2324 = vrot.lane.b32.xlu1 %v2249_v23, %s4615_s23  ;;  %v5954_v44 = vrot.slane %v7193_v52, 7  ;;  %7214 = vst [vmem:[#allocation7_spill] sm:$0xff] %v5967_v51  ;;  %v2253_v52 = vrot.slane %v2186_v1, 1  ;;  %v5984_v50 = vrot.slane %v7196_v45, 7  ;;  %v2139_v4 = vrot.slane %v1953_v5, 5 }
 0x259   : > { %v2423_v60 = vsel %vm637_vm2, %v2421_v18, %v2422_v3  ;;  %v2250_v23 = vrot.slane %v5967_v51, 1  ;;  %v6000_v45 = vrot.slane %v7198_v53, 7  ;;  %v6005_v15 = vrot.slane %v7199_v38, 7 }
 0x25a   : > { %v5994_v42 = vsel %vm267_vm1, %v5954_v44, %v5958_v39  ;;  %v2254_v5 = vsel %vm460_vm3, %v2251_v22, %v2253_v52  ;;  %v2427_v3 = vrot.slane %v5863_v28, 2  ;;  %v2429_v18 = vrot.slane %v2186_v1, 2 }
 0x25b   : > { %v7216_v12 = vmax.f32 %v5775_v31, 0.0  ;;  %v2252_v1 = vsel %vm460_vm3, %v2250_v23, %v2251_v22  ;;  %v2426_v53 = vrot.slane %v5967_v51, 2  ;;  %v7218_v28 = vmax.f32 %v5746_v56, 0.0 }
 0x25c   : > { %2322 = vrot.lane.b32.xlu0 %v2247_v16, %s4615_s23  ;;  %v5980_v16 = vrot.slane %v7195_v8, 7  ;;  %2500 = vrot.lane.b32.xlu1 %v2425_v36, %s4614_s22  ;;  %v1995_v8 = vrot.slane %v1952_v0, 1  ;;  %v7215_v36 = vmax.f32 %v5773_v43, 0.0  ;;  %v6042_v22 = vsel %vm267_vm1, %v6000_v45, %v6005_v15 }
 0x25d   : > { %v6015_v0 = vrot.slane %v7216_v12, 7  ;;  %v2140_v23 = vrot.slane %v7218_v28, 5  ;;  %v7219_v28 = vmax.f32 %v5744_v9, 0.0  ;;  %v7220_v51 = vmax.f32 %v5780_v47, 0.0 }
 0x25e   : > { %v6011_v20 = vrot.slane %v7215_v36, 7  ;;  %v6023_v52 = vsel %vm267_vm1, %v5980_v16, %v5984_v50  ;;  %v7203_v36 = vmax.f32 %v5777_v30, 0.0  ;;  %v7208_v9 = vmax.f32 %v5787_v10, 0.0 }
 0x25f   : > { %v6061_v27 = vrot.slane %v7220_v51, 7 }
 0x260   : > { %2498 = vrot.lane.b32.xlu0 %v2423_v60, %s4614_s22  ;;  %2328 = vrot.lane.b32.xlu1 %v2254_v5, %s4615_s23  ;;  %v2187_v60 = vsel %vm267_vm1, %v5874_v13, %v2139_v4  ;;  %v6032_v5 = vsel %vm267_vm1, %v1995_v8, %v5870_v62  ;;  %v2430_v13 = vsel %vm637_vm2, %v2427_v3, %v2429_v18  ;;  %v2256_v4 = vrot.slane %v5897_v63, 1 }
 0x261   : > { %7217 = vst [vmem:[#allocation8_spill] sm:$0xff] %v6032_v5  ;;  %v2258_v12 = vrot.slane %v2187_v60, 1  ;;  %v6047_v62 = vsel %vm267_vm1, %v6011_v20, %v6015_v0  ;;  %v2255_v56 = vrot.slane %v6032_v5, 1  ;;  %v6057_v38 = vrot.slane %v7203_v36, 7 }
 0x262   : > { %v2432_v18 = vrot.slane %v5897_v63, 2  ;;  %v7221_v36 = vmax.f32 %v5782_v14, 0.0 }
 0x263   : > { %v2259_v8 = vsel %vm460_vm3, %v2256_v4, %v2258_v12  ;;  %v2257_v12 = vsel %vm460_vm3, %v2255_v56, %v2256_v4  ;;  %v6099_v56 = vrot.slane %v7208_v9, 7 }
 0x264   : > { %2326 = vrot.lane.b32.xlu0 %v2252_v1, %s4615_s23  ;;  %2504 = vrot.lane.b32.xlu1 %v2430_v13, %s4614_s22  ;;  %v2428_v1 = vsel %vm637_vm2, %v2426_v53, %v2427_v3  ;;  %v1996_v13 = vrot.slane %v7219_v28, 1  ;;  %v2434_v53 = vrot.slane %v2187_v60, 2  ;;  %v7206_v3 = vmax.f32 %v5724_v29, 0.0 }
 0x265   : > { %v2188_v28 = vsel %vm267_vm1, %v5888_v61, %v2140_v23  ;;  %v6073_v51 = vrot.slane %v7221_v36, 7  ;;  %v2431_v60 = vrot.slane %v6032_v5, 2  ;;  %v6089_v61 = vsel %vm267_vm1, %v6057_v38, %v6061_v27 }
 0x266   : > { %v2435_v36 = vsel %vm637_vm2, %v2432_v18, %v2434_v53  ;;  %v2261_v23 = vrot.slane %v5920_v37, 1  ;;  %v6095_v4 = vrot.slane %v7206_v3, 7  ;;  %v7224_v3 = vmax.f32 %v5748_v24, 0.0 }
 0x268   : > { %2502 = vrot.lane.b32.xlu0 %v2428_v1, %s4614_s22  ;;  %2332 = vrot.lane.b32.xlu1 %v2259_v8, %s4615_s23  ;;  %v7222_v1 = vmax.f32 %v5784_v7, 0.0  ;;  %v6084_v8 = vsel %vm267_vm1, %v1996_v13, %v5883_v17  ;;  %v7223_v17 = vmax.f32 %v5753_v49, 0.0  ;;  %v1997_v63 = vrot.slane %v7224_v3, 1 }
 0x269   : > { %v2260_v53 = vrot.slane %v6084_v8, 1  ;;  %v2437_v49 = vrot.slane %v5920_v37, 2  ;;  %v2436_v3 = vrot.slane %v6084_v8, 2 }
 0x26a   : > { %v6077_v48 = vrot.slane %v7222_v1, 7  ;;  %v2263_v1 = vrot.slane %v2188_v28, 1  ;;  %v2141_v13 = vrot.slane %v7223_v17, 5  ;;  %v2439_v17 = vrot.slane %v2188_v28, 2 }
 0x26b   : > { %v2262_v24 = vsel %vm460_vm3, %v2260_v53, %v2261_v23  ;;  %v2266_v28 = vrot.slane %v5943_v54, 1  ;;  %v6141_v53 = vld [vmem:[%s7185_s2 + $0x28] sm:$0xf] }
 0x26c   : > { %2330 = vrot.lane.b32.xlu0 %v2257_v12, %s4615_s23  ;;  %2508 = vrot.lane.b32.xlu1 %v2435_v36, %s4614_s22  ;;  %v2433_v12 = vsel %vm637_vm2, %v2431_v60, %v2432_v18  ;;  %v6109_v5 = vsel %vm267_vm1, %v6073_v51, %v6077_v48  ;;  %v2264_v9 = vsel %vm460_vm3, %v2261_v23, %v2263_v1  ;;  %v7225_v1 = vmax.f32 %v5757_v41, 0.0 }
 0x26d   : > { %v2189_v18 = vsel %vm267_vm1, %v5909_v33, %v2141_v13  ;;  %v6122_v60 = vsel %vm267_vm1, %v6095_v4, %v6099_v56  ;;  %v6129_v36 = vsel %vm267_vm1, %v1997_v63, %v5905_v40  ;;  %v2438_v23 = vsel %vm637_vm2, %v2436_v3, %v2437_v49  ;;  %4508 = vmatprep.subr.msk.mxu1 %vm982_vm0, %v6141_v53 }
 0x26e   : > { %v2268_v33 = vrot.slane %v2189_v18, 1  ;;  %v2142_v13 = vrot.slane %v7225_v1, 5  ;;  %v7226_v63 = vmax.f32 %v5755_v57, 0.0  ;;  %v2441_v57 = vrot.slane %v6129_v36, 2 }
 0x26f   : > { %v2271_v1 = vrot.slane %v5972_v2, 1 }
 0x270   : > { %2506 = vrot.lane.b32.xlu0 %v2433_v12, %s4614_s22  ;;  %2336 = vrot.lane.b32.xlu1 %v2264_v9, %s4615_s23  ;;  %v2440_v9 = vsel %vm637_vm2, %v2437_v49, %v2439_v17  ;;  %v2265_v12 = vrot.slane %v6129_v36, 1  ;;  %v1998_v40 = vrot.slane %v7226_v63, 1  ;;  %v2269_v41 = vsel %vm460_vm3, %v2266_v28, %v2268_v33 }
 0x271   : > { %v2442_v17 = vrot.slane %v5943_v54, 2  ;;  %v2444_v49 = vrot.slane %v2189_v18, 2 }
 0x272   : > { %v2267_v3 = vsel %vm460_vm3, %v2265_v12, %v2266_v28 }
 0x273   : > { %v2445_v33 = vsel %vm637_vm2, %v2442_v17, %v2444_v49 }
 0x274   : > { %2334 = vrot.lane.b32.xlu0 %v2262_v24, %s4615_s23  ;;  %2512 = vrot.lane.b32.xlu1 %v2440_v9, %s4614_s22  ;;  %v2190_v24 = vsel %vm267_vm1, %v5937_v59, %v2142_v13  ;;  %v6158_v9 = vsel %vm267_vm1, %v1998_v40, %v5933_v35  ;;  %v2443_v59 = vsel %vm637_vm2, %v2441_v57, %v2442_v17  ;;  %v7228_v13 = vmax.f32 %v5761_v6, 0.0 }
 0x275   : > { %v2273_v18 = vrot.slane %v2190_v24, 1  ;;  %v2270_v28 = vrot.slane %v6158_v9, 1  ;;  %v2447_v40 = vrot.slane %v5972_v2, 2  ;;  %v2446_v17 = vrot.slane %v6158_v9, 2 }
 0x276   : > { %v1999_v12 = vrot.slane %v7228_v13, 1  ;;  %v2276_v57 = vrot.slane %v5994_v42, 1 }
 0x277   : > { %v2274_v35 = vsel %vm460_vm3, %v2271_v1, %v2273_v18  ;;  %v2272_v49 = vsel %vm460_vm3, %v2270_v28, %v2271_v1 }
 0x278   : > { %2510 = vrot.lane.b32.xlu0 %v2438_v23, %s4614_s22  ;;  %2340 = vrot.lane.b32.xlu1 %v2269_v41, %s4615_s23  ;;  %v7227_v23 = vmax.f32 %v5763_v19, 0.0  ;;  %v2449_v41 = vrot.slane %v2190_v24, 2  ;;  %v6180_v6 = vsel %vm267_vm1, %v1999_v12, %v5954_v44 }
 0x279   : > { %v2275_v1 = vrot.slane %v6180_v6, 1  ;;  %v2451_v12 = vrot.slane %v6180_v6, 2 }
 0x27a   : > { %v2143_v63 = vrot.slane %v7227_v23, 5  ;;  %v7230_v23 = vmax.f32 %v5765_v34, 0.0 }
 0x27b   : > { %v2277_v13 = vsel %vm460_vm3, %v2275_v1, %v2276_v57 }
 0x27c   : > { %2338 = vrot.lane.b32.xlu0 %v2267_v3, %s4615_s23  ;;  %2516 = vrot.lane.b32.xlu1 %v2445_v33, %s4614_s22  ;;  %v2191_v19 = vsel %vm267_vm1, %v5958_v39, %v2143_v63  ;;  %v2450_v3 = vsel %vm637_vm2, %v2447_v40, %v2449_v41  ;;  %v7229_v33 = vmax.f32 %v5767_v58, 0.0  ;;  %v2448_v39 = vsel %vm637_vm2, %v2446_v17, %v2447_v40 }
 0x27d   : > { %v2278_v24 = vrot.slane %v2191_v19, 1  ;;  %v2000_v63 = vrot.slane %v7230_v23, 1  ;;  %v2454_v28 = vrot.slane %v2191_v19, 2  ;;  %v2281_v40 = vrot.slane %v6023_v52, 1 }
 0x27e   : > { %v2144_v18 = vrot.slane %v7229_v33, 5  ;;  %v7231_v19 = vmax.f32 %v5771_v25, 0.0  ;;  %v2286_v23 = vrot.slane %v6042_v22, 1 }
 0x27f   : > { %v2279_v44 = vsel %vm460_vm3, %v2276_v57, %v2278_v24  ;;  %v6202_v34 = vsel %vm267_vm1, %v2000_v63, %v5980_v16  ;;  %v2457_v24 = vrot.slane %v6023_v52, 2 }
 0x280   : > { %2514 = vrot.lane.b32.xlu0 %v2443_v59, %s4614_s22  ;;  %2344 = vrot.lane.b32.xlu1 %v2274_v35, %s4615_s23  ;;  %v2452_v59 = vrot.slane %v5994_v42, 2  ;;  %v2192_v58 = vsel %vm267_vm1, %v5984_v50, %v2144_v18  ;;  %v2280_v17 = vrot.slane %v6202_v34, 1 }
 0x281   : > { %v2283_v41 = vrot.slane %v2192_v58, 1  ;;  %v2459_v33 = vrot.slane %v2192_v58, 2  ;;  %v7234_v58 = vmax.f32 %v5773_v43, 0.0 }
 0x282   : > { %v2455_v35 = vsel %vm637_vm2, %v2452_v59, %v2454_v28  ;;  %v2453_v50 = vsel %vm637_vm2, %v2451_v12, %v2452_v59  ;;  %v2282_v18 = vsel %vm460_vm3, %v2280_v17, %v2281_v40  ;;  %v2462_v12 = vrot.slane %v6042_v22, 2 }
 0x283   : > { %v2284_v16 = vsel %vm460_vm3, %v2281_v40, %v2283_v41  ;;  %v2460_v1 = vsel %vm637_vm2, %v2457_v24, %v2459_v33  ;;  %v7235_v17 = vmax.f32 %v5780_v47, 0.0  ;;  %v2467_v33 = vrot.slane %v6047_v62, 2 }
 0x284   : > { %2342 = vrot.lane.b32.xlu0 %v2272_v49, %s4615_s23  ;;  %2520 = vrot.lane.b32.xlu1 %v2450_v3, %s4614_s22  ;;  %v2145_v49 = vrot.slane %v7231_v19, 5  ;;  %v7232_v3 = vmax.f32 %v5769_v46, 0.0 }
 0x286   : > { %v2001_v57 = vrot.slane %v7232_v3, 1  ;;  %v2193_v25 = vsel %vm267_vm1, %v6005_v15, %v2145_v49  ;;  %v2291_v49 = vrot.slane %v6047_v62, 1  ;;  %v2147_v3 = vrot.slane %v7235_v17, 5 }
 0x287   : > { %v2288_v63 = vrot.slane %v2193_v25, 1  ;;  %v7240_v17 = vmax.f32 %v5724_v29, 0.0 }
 0x288   : > { %2518 = vrot.lane.b32.xlu0 %v2448_v39, %s4614_s22  ;;  %2348 = vrot.lane.b32.xlu1 %v2279_v44, %s4615_s23  ;;  %v2456_v39 = vrot.slane %v6202_v34, 2  ;;  %v6224_v46 = vsel %vm267_vm1, %v2001_v57, %v6000_v45  ;;  %v7233_v44 = vmax.f32 %v5775_v31, 0.0  ;;  %v2195_v47 = vsel %vm267_vm1, %v6061_v27, %v2147_v3 }
 0x289   : > { %v2285_v28 = vrot.slane %v6224_v46, 1  ;;  %v2289_v45 = vsel %vm460_vm3, %v2286_v23, %v2288_v63  ;;  %v2461_v41 = vrot.slane %v6224_v46, 2  ;;  %v2298_v63 = vrot.slane %v2195_v47, 1 }
 0x28a   : > { %v2146_v59 = vrot.slane %v7233_v44, 5  ;;  %v2458_v15 = vsel %vm637_vm2, %v2456_v39, %v2457_v24  ;;  %v7237_v44 = vmax.f32 %v5784_v7, 0.0  ;;  %v2005_v3 = vrot.slane %v7240_v17, 1 }
 0x28b   : > { %v2287_v40 = vsel %vm460_vm3, %v2285_v28, %v2286_v23  ;;  %v2296_v23 = vrot.slane %v6089_v61, 1  ;;  %v7238_v28 = vmax.f32 %v5782_v14, 0.0 }
 0x28c   : > { %2346 = vrot.lane.b32.xlu0 %v2277_v13, %s4615_s23  ;;  %2524 = vrot.lane.b32.xlu1 %v2455_v35, %s4614_s22  ;;  %v2002_v13 = vrot.slane %v7234_v58, 1  ;;  %v2464_v35 = vrot.slane %v2193_v25, 2  ;;  %v2194_v31 = vsel %vm267_vm1, %v6015_v0, %v2146_v59  ;;  %v2463_v0 = vsel %vm637_vm2, %v2461_v41, %v2462_v12 }
 0x28d   : > { %v2469_v25 = vrot.slane %v2194_v31, 2  ;;  %v2148_v59 = vrot.slane %v7237_v44, 5  ;;  %v2004_v58 = vrot.slane %v7238_v28, 1 }
 0x28e   : > { %v6246_v43 = vsel %vm267_vm1, %v2002_v13, %v6011_v20  ;;  %v2465_v19 = vsel %vm637_vm2, %v2462_v12, %v2464_v35  ;;  %v2472_v13 = vrot.slane %v6089_v61, 2 }
 0x28f   : > { %v2290_v57 = vrot.slane %v6246_v43, 1  ;;  %v2466_v39 = vrot.slane %v6246_v43, 2  ;;  %v2196_v7 = vsel %vm267_vm1, %v6077_v48, %v2148_v59  ;;  %v6290_v14 = vsel %vm267_vm1, %v2004_v58, %v6073_v51 }
 0x290   : > { %2522 = vrot.lane.b32.xlu0 %v2453_v50, %s4614_s22  ;;  %2352 = vrot.lane.b32.xlu1 %v2284_v16, %s4615_s23  ;;  %v2293_v50 = vrot.slane %v2194_v31, 1  ;;  %v7236_v16 = vmax.f32 %v5777_v30, 0.0  ;;  %v2303_v41 = vrot.slane %v2196_v7, 1 }
 0x291   : > { %v2468_v27 = vsel %vm637_vm2, %v2466_v39, %v2467_v33 }
 0x292   : > { %v2003_v24 = vrot.slane %v7236_v16, 1  ;;  %v2294_v20 = vsel %vm460_vm3, %v2291_v49, %v2293_v50  ;;  %v2300_v50 = vrot.slane %v6290_v14, 1  ;;  %v2479_v16 = vrot.slane %v2196_v7, 2 }
 0x294   : > { %2350 = vrot.lane.b32.xlu0 %v2282_v18, %s4615_s23  ;;  %2528 = vrot.lane.b32.xlu1 %v2460_v1, %s4614_s22  ;;  %v2292_v18 = vsel %vm460_vm3, %v2290_v57, %v2291_v49  ;;  %v6268_v30 = vsel %vm267_vm1, %v2003_v24, %v6057_v38  ;;  %v2470_v1 = vsel %vm637_vm2, %v2467_v33, %v2469_v25  ;;  %v2477_v57 = vrot.slane %v6109_v5, 2 }
 0x295   : > { %v2299_v38 = vsel %vm460_vm3, %v2296_v23, %v2298_v63  ;;  %v2471_v35 = vrot.slane %v6268_v30, 2  ;;  %v6312_v33 = vsel %vm267_vm1, %v2005_v3, %v6095_v4  ;;  %v2482_v63 = vrot.slane %v6122_v60, 2 }
 0x296   : > { %v2480_v25 = vsel %vm637_vm2, %v2477_v57, %v2479_v16  ;;  %v7242_v16 = vld [vmem:[#allocation3_spill] sm:$0xff] }
 0x297   : > { %v2473_v48 = vsel %vm637_vm2, %v2471_v35, %v2472_v13 }
 0x298   : > { %2526 = vrot.lane.b32.xlu0 %v2458_v15, %s4614_s22  ;;  %2356 = vrot.lane.b32.xlu1 %v2289_v45, %s4615_s23  ;;  %v2295_v15 = vrot.slane %v6268_v30, 1  ;;  %v2474_v45 = vrot.slane %v2195_v47, 2  ;;  %v2306_v47 = vrot.slane %v6122_v60, 1 }
 0x29a   : > { %v2297_v12 = vsel %vm460_vm3, %v2295_v15, %v2296_v23  ;;  %v2475_v31 = vsel %vm637_vm2, %v2472_v13, %v2474_v45 }
 0x29c   : > { %2354 = vrot.lane.b32.xlu0 %v2287_v40, %s4615_s23  ;;  %2532 = vrot.lane.b32.xlu1 %v2465_v19, %s4614_s22  ;;  %v2301_v40 = vrot.slane %v6109_v5, 1  ;;  %v7239_v19 = vmax.f32 %v5787_v10, 0.0 }
 0x29e   : > { %v2149_v49 = vrot.slane %v7239_v19, 5  ;;  %v2302_v24 = vsel %vm460_vm3, %v2300_v50, %v2301_v40 }
 0x2a0   : > { %2530 = vrot.lane.b32.xlu0 %v2463_v0, %s4614_s22  ;;  %2360 = vrot.lane.b32.xlu1 %v2294_v20, %s4615_s23  ;;  %v2304_v0 = vsel %vm460_vm3, %v2301_v40, %v2303_v41  ;;  %v2197_v10 = vsel %vm267_vm1, %v6099_v56, %v2149_v49  ;;  %v2476_v20 = vrot.slane %v6290_v14, 2 }
 0x2a1   : > { %v2484_v44 = vrot.slane %v2197_v10, 2 }
 0x2a2   : > { %v2478_v56 = vsel %vm637_vm2, %v2476_v20, %v2477_v57 }
 0x2a3   : > { %v2485_v13 = vsel %vm637_vm2, %v2482_v63, %v2484_v44 }
 0x2a4   : > { %2358 = vrot.lane.b32.xlu0 %v2292_v18, %s4615_s23  ;;  %2536 = vrot.lane.b32.xlu1 %v2470_v1, %s4614_s22  ;;  %v2308_v18 = vrot.slane %v2197_v10, 1  ;;  %v2305_v1 = vrot.slane %v6312_v33, 1 }
 0x2a6   : > { %v2309_v4 = vsel %vm460_vm3, %v2306_v47, %v2308_v18  ;;  %v2307_v58 = vsel %vm460_vm3, %v2305_v1, %v2306_v47  ;;  %v7244_v1 = vld [vmem:[#allocation4_spill] sm:$0xff] }
 0x2a8   : > { %2534 = vrot.lane.b32.xlu0 %v2468_v27, %s4614_s22  ;;  %2364 = vrot.lane.b32.xlu1 %v2299_v38, %s4615_s23  ;;  %v2481_v38 = vrot.slane %v6312_v33, 2 }
 0x2aa   : > { %v2483_v7 = vsel %vm637_vm2, %v2481_v38, %v2482_v63  ;;  %v7246_v38 = vld [vmem:[#allocation5_spill] sm:$0xff] }
 0x2ac   : > { %2362 = vrot.lane.b32.xlu0 %v2297_v12, %s4615_s23  ;;  %2540 = vrot.lane.b32.xlu1 %v2475_v31, %s4614_s22 }
 0x2b0   : > { %2538 = vrot.lane.b32.xlu0 %v2473_v48, %s4614_s22  ;;  %v2313_v51 = vpop.permute.xlu1 %2312  ;;  %2368 = vrot.lane.b32.xlu1 %v2304_v0, %s4615_s23  ;;  %v7241_v48 = vld [vmem:[#allocation2_spill] sm:$0xff] }
 0x2b1   : > { %v2583_v23 = vsel %vm814_vm4, %v5751_v32, %v2313_v51 }
 0x2b4   : > { %2366 = vrot.lane.b32.xlu0 %v2302_v24, %s4615_s23  ;;  %2544 = vrot.lane.b32.xlu1 %v2480_v25, %s4614_s22  ;;  %v2489_v39 = vpop.permute.xlu1 %2488  ;;  %v7243_v24 = vld [vmem:[#allocation6_spill] sm:$0xff] }
 0x2b5   : > { %v2615_v27 = vsel %vm847_vm5, %v2583_v23, %v2489_v39 }
 0x2b6   : > { %v2311_v29 = vpop.permute.xlu0 %2310 }
 0x2b7   : > { %v2582_v59 = vsel %vm814_vm4, %v5790_v26, %v2311_v29  ;;  %v4005_v26 = vld [vmem:[%s7185_s2 + $0x20] sm:$0xff] }
 0x2b8   : > { %2542 = vrot.lane.b32.xlu0 %v2478_v56, %s4614_s22  ;;  %2372 = vrot.lane.b32.xlu1 %v2309_v4, %s4615_s23  ;;  %v7245_v4 = vld [vmem:[#allocation7_spill] sm:$0xff] }
 0x2ba   : > { %v2487_v15 = vpop.permute.xlu0 %2486  ;;  %v2317_v32 = vpop.permute.xlu1 %2316 }
 0x2bb   : > { %v2614_v28 = vsel %vm847_vm5, %v2582_v59, %v2487_v15  ;;  %v2585_v35 = vsel %vm814_vm4, %v5823_v21, %v2317_v32 }
 0x2bc   : > { %2370 = vrot.lane.b32.xlu0 %v2307_v58, %s4615_s23  ;;  %4408 = vmatprep.mubr.msk.f32.mxu1 %vm885_vm6, %v2614_v28  ;;  %s7062_s23 = scalar_lea.vmem %s7186_s3, %s4042_s18 }
 0x2bd   : > { %4409 = vmatmul.mubr.msk.f32.vlgmr.msra.gmra.mxu1 %vm885_vm6, %v2615_v27  ;;  %2548 = vrot.lane.b32.xlu1 %v2485_v13, %s4614_s22 }
 0x2be   : > { %v2315_v45 = vpop.permute.xlu0 %2314  ;;  %4509 = vmatpush3.msk.msra.mxu1 %vm982_vm0, %v6141_v53  ;;  %v2493_v12 = vpop.permute.xlu1 %2492 }
 0x2bf   : > { %4510 = vmatprep.subr.mxu1 %v4005_v26  ;;  %v2584_v31 = vsel %vm814_vm4, %v5827_v55, %v2315_v45  ;;  %v6348_v40 = vsel %vm847_vm5, %v2585_v35, %v2493_v12 }
 0x2c0   : > { %2546 = vrot.lane.b32.xlu0 %v2483_v7, %s4614_s22  ;;  %4511 = vmatpush3.msra.mxu1 %v4005_v26  ;;  %v7247_v26 = vld [vmem:[#allocation8_spill] sm:$0xff] }
 0x2c2   : > { %v2491_v41 = vpop.permute.xlu0 %2490  ;;  %v2321_v53 = vpop.permute.xlu1 %2320 }
 0x2c3   : > { %v6351_v19 = vsel %vm847_vm5, %v2584_v31, %v2491_v41  ;;  %v2587_v49 = vsel %vm814_vm4, %v5830_v11, %v2321_v53 }
 0x2c4   : > { %4411 = vmatprep.mubr.msk.f32.mxu1 %vm885_vm6, %v6351_v19  ;;  %4460 = vmatprep.mubr.msk.f32.mxu0 %vm885_vm6, %v6351_v19 }
 0x2c5   : > { %4412 = vmatmul.mubr.msk.f32.gmra.mxu1 %vm885_vm6, %v6348_v40  ;;  %4461 = vmatmul.mubr.msk.f32.vlgmr.msra.gmra.mxu0 %vm885_vm6, %v6348_v40 }
 0x2c6   : > { %4463 = vmatprep.mubr.msk.f32.mxu0 %vm885_vm6, %v2614_v28  ;;  %v2319_v21 = vpop.permute.xlu0 %2318  ;;  %v2497_v55 = vpop.permute.xlu1 %2496 }
 0x2c7   : > { %v2586_v50 = vsel %vm814_vm4, %v7241_v48, %v2319_v21  ;;  %v6368_v17 = vsel %vm847_vm5, %v2587_v49, %v2497_v55 }
 0x2c9   : > { %4464 = vmatmul.mubr.msk.f32.gmra.mxu0 %vm885_vm6, %v2615_v27 }
 0x2ca   : > { %4466 = vmatprep.mubr.msk.f32.mxu0 %vm885_vm6, %v6351_v19  ;;  %v2495_v3 = vpop.permute.xlu0 %2494  ;;  %v2325_v0 = vpop.permute.xlu1 %2324 }
 0x2cb   : > { %v6373_v51 = vsel %vm847_vm5, %v2586_v50, %v2495_v3  ;;  %v2589_v10 = vsel %vm814_vm4, %v7242_v16, %v2325_v0 }
 0x2cc   : > { %4414 = vmatprep.mubr.msk.f32.mxu1 %vm885_vm6, %v6373_v51 }
 0x2cd   : > { %4415 = vmatmul.mubr.msk.f32.gmra.mxu1 %vm885_vm6, %v6368_v17  ;;  %4467 = vmatmul.mubr.msk.f32.gmra.mxu0 %vm885_vm6, %v6348_v40 }
 0x2ce   : > { %4469 = vmatprep.mubr.msk.f32.mxu0 %vm885_vm6, %v6373_v51  ;;  %v2323_v11 = vpop.permute.xlu0 %2322  ;;  %v2501_v57 = vpop.permute.xlu1 %2500 }
 0x2cf   : > { %v2588_v20 = vsel %vm814_vm4, %v7243_v24, %v2323_v11  ;;  %v6390_v29 = vsel %vm847_vm5, %v2589_v10, %v2501_v57 }
 0x2d1   : > { %4470 = vmatmul.mubr.msk.f32.gmra.mxu0 %vm885_vm6, %v6368_v17 }
 0x2d2   : > { %v2499_v25 = vpop.permute.xlu0 %2498  ;;  %v2329_v18 = vpop.permute.xlu1 %2328 }
 0x2d3   : > { %v6393_v47 = vsel %vm847_vm5, %v2588_v20, %v2499_v25  ;;  %v2591_v23 = vsel %vm814_vm4, %v7244_v1, %v2329_v18 }
 0x2d4   : > { %4417 = vmatprep.mubr.msk.f32.mxu1 %vm885_vm6, %v6393_v47  ;;  %4472 = vmatprep.mubr.msk.f32.mxu0 %vm885_vm6, %v6393_v47 }
 0x2d5   : > { %4418 = vmatmul.mubr.msk.f32.gmra.mxu1 %vm885_vm6, %v6390_v29  ;;  %4473 = vmatmul.mubr.msk.f32.gmra.mxu0 %vm885_vm6, %v6390_v29 }
 0x2d6   : > { %v2327_v39 = vpop.permute.xlu0 %2326  ;;  %v2505_v56 = vpop.permute.xlu1 %2504 }
 0x2d7   : > { %v2590_v63 = vsel %vm814_vm4, %v7245_v4, %v2327_v39  ;;  %v6408_v44 = vsel %vm847_vm5, %v2591_v23, %v2505_v56 }
 0x2da   : > { %v2503_v59 = vpop.permute.xlu0 %2502  ;;  %v2333_v15 = vpop.permute.xlu1 %2332 }
 0x2db   : > { %v6411_v27 = vsel %vm847_vm5, %v2590_v63, %v2503_v59  ;;  %v2593_v32 = vsel %vm814_vm4, %v7246_v38, %v2333_v15 }
 0x2dc   : > { %4420 = vmatprep.mubr.msk.f32.mxu1 %vm885_vm6, %v6411_v27  ;;  %4475 = vmatprep.mubr.msk.f32.mxu0 %vm885_vm6, %v6411_v27 }
 0x2dd   : > { %4421 = vmatmul.mubr.msk.f32.gmra.mxu1 %vm885_vm6, %v6408_v44  ;;  %4476 = vmatmul.mubr.msk.f32.gmra.mxu0 %vm885_vm6, %v6408_v44 }
 0x2de   : > { %v2331_v28 = vpop.permute.xlu0 %2330  ;;  %v2509_v58 = vpop.permute.xlu1 %2508 }
 0x2df   : > { %v2592_v13 = vsel %vm814_vm4, %v7247_v26, %v2331_v28  ;;  %v6426_v45 = vsel %vm847_vm5, %v2593_v32, %v2509_v58 }
 0x2e2   : > { %v2507_v7 = vpop.permute.xlu0 %2506  ;;  %v2337_v35 = vpop.permute.xlu1 %2336 }
 0x2e3   : > { %v6429_v12 = vsel %vm847_vm5, %v2592_v13, %v2507_v7  ;;  %v2595_v53 = vsel %vm814_vm4, %v5920_v37, %v2337_v35 }
 0x2e4   : > { %4423 = vmatprep.mubr.msk.f32.mxu1 %vm885_vm6, %v6429_v12  ;;  %4478 = vmatprep.mubr.msk.f32.mxu0 %vm885_vm6, %v6429_v12 }
 0x2e5   : > { %4424 = vmatmul.mubr.msk.f32.gmra.mxu1 %vm885_vm6, %v6426_v45  ;;  %4479 = vmatmul.mubr.msk.f32.gmra.mxu0 %vm885_vm6, %v6426_v45 }
 0x2e6   : > { %v2335_v31 = vpop.permute.xlu0 %2334  ;;  %v2513_v41 = vpop.permute.xlu1 %2512 }
 0x2e7   : > { %v2594_v21 = vsel %vm814_vm4, %v6084_v8, %v2335_v31  ;;  %v6444_v55 = vsel %vm847_vm5, %v2595_v53, %v2513_v41 }
 0x2ea   : > { %v2511_v49 = vpop.permute.xlu0 %2510  ;;  %v2341_v50 = vpop.permute.xlu1 %2340 }
 0x2eb   : > { %v6447_v48 = vsel %vm847_vm5, %v2594_v21, %v2511_v49  ;;  %v2597_v3 = vsel %vm814_vm4, %v5943_v54, %v2341_v50 }
 0x2ec   : > { %4426 = vmatprep.mubr.msk.f32.mxu1 %vm885_vm6, %v6447_v48  ;;  %4481 = vmatprep.mubr.msk.f32.mxu0 %vm885_vm6, %v6447_v48 }
 0x2ed   : > { %4427 = vmatmul.mubr.msk.f32.gmra.mxu1 %vm885_vm6, %v6444_v55  ;;  %4482 = vmatmul.mubr.msk.f32.gmra.mxu0 %vm885_vm6, %v6444_v55 }
 0x2ee   : > { %v2339_v37 = vpop.permute.xlu0 %2338  ;;  %v2517_v8 = vpop.permute.xlu1 %2516 }
 0x2ef   : > { %v2596_v0 = vsel %vm814_vm4, %v6129_v36, %v2339_v37  ;;  %v6462_v11 = vsel %vm847_vm5, %v2597_v3, %v2517_v8 }
 0x2f2   : > { %v2515_v57 = vpop.permute.xlu0 %2514  ;;  %v2345_v10 = vpop.permute.xlu1 %2344 }
 0x2f3   : > { %v6465_v16 = vsel %vm847_vm5, %v2596_v0, %v2515_v57  ;;  %v2599_v24 = vsel %vm814_vm4, %v5972_v2, %v2345_v10 }
 0x2f4   : > { %4429 = vmatprep.mubr.msk.f32.mxu1 %vm885_vm6, %v6465_v16  ;;  %4484 = vmatprep.mubr.msk.f32.mxu0 %vm885_vm6, %v6465_v16 }
 0x2f5   : > { %4430 = vmatmul.mubr.msk.f32.gmra.mxu1 %vm885_vm6, %v6462_v11  ;;  %4485 = vmatmul.mubr.msk.f32.gmra.mxu0 %vm885_vm6, %v6462_v11 }
 0x2f6   : > { %v2343_v54 = vpop.permute.xlu0 %2342  ;;  %v2521_v36 = vpop.permute.xlu1 %2520 }
 0x2f7   : > { %v2598_v20 = vsel %vm814_vm4, %v6158_v9, %v2343_v54  ;;  %v6480_v25 = vsel %vm847_vm5, %v2599_v24, %v2521_v36 }
 0x2fa   : > { %v2519_v18 = vpop.permute.xlu0 %2518  ;;  %v2349_v56 = vpop.permute.xlu1 %2348 }
 0x2fb   : > { %v6483_v39 = vsel %vm847_vm5, %v2598_v20, %v2519_v18  ;;  %v2601_v1 = vsel %vm814_vm4, %v5994_v42, %v2349_v56 }
 0x2fc   : > { %4432 = vmatprep.mubr.msk.f32.mxu1 %vm885_vm6, %v6483_v39  ;;  %4487 = vmatprep.mubr.msk.f32.mxu0 %vm885_vm6, %v6483_v39 }
 0x2fd   : > { %4433 = vmatmul.mubr.msk.f32.gmra.mxu1 %vm885_vm6, %v6480_v25  ;;  %4488 = vmatmul.mubr.msk.f32.gmra.mxu0 %vm885_vm6, %v6480_v25 }
 0x2fe   : > { %v2347_v2 = vpop.permute.xlu0 %2346  ;;  %v2525_v9 = vpop.permute.xlu1 %2524 }
 0x2ff   : > { %v2600_v23 = vsel %vm814_vm4, %v6180_v6, %v2347_v2  ;;  %v6498_v4 = vsel %vm847_vm5, %v2601_v1, %v2525_v9 }
 0x302   : > { %v2523_v63 = vpop.permute.xlu0 %2522  ;;  %v2353_v15 = vpop.permute.xlu1 %2352 }
 0x303   : > { %v6501_v59 = vsel %vm847_vm5, %v2600_v23, %v2523_v63  ;;  %v2603_v28 = vsel %vm814_vm4, %v6023_v52, %v2353_v15 }
 0x304   : > { %4435 = vmatprep.mubr.msk.f32.mxu1 %vm885_vm6, %v6501_v59  ;;  %4490 = vmatprep.mubr.msk.f32.mxu0 %vm885_vm6, %v6501_v59 }
 0x305   : > { %4436 = vmatmul.mubr.msk.f32.gmra.mxu1 %vm885_vm6, %v6498_v4  ;;  %4491 = vmatmul.mubr.msk.f32.gmra.mxu0 %vm885_vm6, %v6498_v4 }
 0x306   : > { %v2351_v42 = vpop.permute.xlu0 %2350  ;;  %v2529_v6 = vpop.permute.xlu1 %2528 }
 0x307   : > { %v2602_v58 = vsel %vm814_vm4, %v6202_v34, %v2351_v42  ;;  %v6516_v38 = vsel %vm847_vm5, %v2603_v28, %v2529_v6 }
 0x30a   : > { %v2527_v32 = vpop.permute.xlu0 %2526  ;;  %v2357_v13 = vpop.permute.xlu1 %2356 }
 0x30b   : > { %v6519_v26 = vsel %vm847_vm5, %v2602_v58, %v2527_v32  ;;  %v2605_v7 = vsel %vm814_vm4, %v6042_v22, %v2357_v13 }
 0x30c   : > { %4438 = vmatprep.mubr.msk.f32.mxu1 %vm885_vm6, %v6519_v26  ;;  %4493 = vmatprep.mubr.msk.f32.mxu0 %vm885_vm6, %v6519_v26 }
 0x30d   : > { %4439 = vmatmul.mubr.msk.f32.gmra.mxu1 %vm885_vm6, %v6516_v38  ;;  %4494 = vmatmul.mubr.msk.f32.gmra.mxu0 %vm885_vm6, %v6516_v38 }
 0x30e   : > { %v2355_v52 = vpop.permute.xlu0 %2354  ;;  %v2533_v34 = vpop.permute.xlu1 %2532 }
 0x30f   : > { %v2604_v35 = vsel %vm814_vm4, %v6224_v46, %v2355_v52  ;;  %v6534_v31 = vsel %vm847_vm5, %v2605_v7, %v2533_v34 }
 0x312   : > { %v2531_v41 = vpop.permute.xlu0 %2530  ;;  %v2361_v21 = vpop.permute.xlu1 %2360 }
 0x313   : > { %v6537_v53 = vsel %vm847_vm5, %v2604_v35, %v2531_v41  ;;  %v2607_v49 = vsel %vm814_vm4, %v6047_v62, %v2361_v21 }
 0x314   : > { %4441 = vmatprep.mubr.msk.f32.mxu1 %vm885_vm6, %v6537_v53  ;;  %4496 = vmatprep.mubr.msk.f32.mxu0 %vm885_vm6, %v6537_v53 }
 0x315   : > { %4442 = vmatmul.mubr.msk.f32.gmra.mxu1 %vm885_vm6, %v6534_v31  ;;  %4497 = vmatmul.mubr.msk.f32.gmra.mxu0 %vm885_vm6, %v6534_v31 }
 0x316   : > { %v2359_v22 = vpop.permute.xlu0 %2358  ;;  %v2537_v46 = vpop.permute.xlu1 %2536 }
 0x317   : > { %v2606_v50 = vsel %vm814_vm4, %v6246_v43, %v2359_v22  ;;  %v6552_v37 = vsel %vm847_vm5, %v2607_v49, %v2537_v46 }
 0x31a   : > { %v2535_v8 = vpop.permute.xlu0 %2534  ;;  %v2365_v0 = vpop.permute.xlu1 %2364 }
 0x31b   : > { %v2638_v3 = vsel %vm847_vm5, %v2606_v50, %v2535_v8  ;;  %v2609_v43 = vsel %vm814_vm4, %v6089_v61, %v2365_v0 }
 0x31c   : > { %4444 = vmatprep.mubr.msk.f32.mxu1 %vm885_vm6, %v2638_v3  ;;  %4499 = vmatprep.mubr.msk.f32.mxu0 %vm885_vm6, %v2638_v3 }
 0x31d   : > { %4445 = vmatmul.mubr.msk.f32.gmra.mxu1 %vm885_vm6, %v6552_v37  ;;  %4500 = vmatmul.mubr.msk.f32.gmra.mxu0 %vm885_vm6, %v6552_v37 }
 0x31e   : > { %v2363_v62 = vpop.permute.xlu0 %2362  ;;  %v2541_v57 = vpop.permute.xlu1 %2540 }
 0x31f   : > { %v2608_v10 = vsel %vm814_vm4, %v6268_v30, %v2363_v62  ;;  %v2641_v54 = vsel %vm847_vm5, %v2609_v43, %v2541_v57 }
 0x322   : > { %v2539_v36 = vpop.permute.xlu0 %2538  ;;  %v2369_v20 = vpop.permute.xlu1 %2368 }
 0x323   : > { %v2640_v24 = vsel %vm847_vm5, %v2608_v10, %v2539_v36  ;;  %v2611_v61 = vsel %vm814_vm4, %v6109_v5, %v2369_v20 }
 0x324   : > { %4447 = vmatprep.mubr.msk.f32.mxu1 %vm885_vm6, %v2640_v24  ;;  %4502 = vmatprep.mubr.msk.f32.mxu0 %vm885_vm6, %v2640_v24 }
 0x325   : > { %4448 = vmatmul.mubr.msk.f32.gmra.mxu1 %vm885_vm6, %v2641_v54  ;;  %4503 = vmatmul.mubr.msk.f32.gmra.mxu0 %vm885_vm6, %v2641_v54 }
 0x326   : > { %v2367_v18 = vpop.permute.xlu0 %2366  ;;  %v2545_v56 = vpop.permute.xlu1 %2544 }
 0x327   : > { %v2610_v30 = vsel %vm814_vm4, %v6290_v14, %v2367_v18  ;;  %v2643_v2 = vsel %vm847_vm5, %v2611_v61, %v2545_v56 }
 0x32a   : > { %v2543_v9 = vpop.permute.xlu0 %2542  ;;  %v2373_v23 = vpop.permute.xlu1 %2372 }
 0x32b   : > { %v2642_v1 = vsel %vm847_vm5, %v2610_v30, %v2543_v9  ;;  %v2613_v5 = vsel %vm814_vm4, %v6122_v60, %v2373_v23 }
 0x32c   : > { %4450 = vmatprep.mubr.msk.f32.mxu1 %vm885_vm6, %v2642_v1  ;;  %4505 = vmatprep.mubr.msk.f32.mxu0 %vm885_vm6, %v2642_v1 }
 0x32d   : > { %4451 = vmatmul.mubr.msk.f32.gmra.mxu1 %vm885_vm6, %v2643_v2  ;;  %4506 = vmatmul.mubr.msk.f32.gmra.mxu0 %vm885_vm6, %v2643_v2 }
 0x32e   : > { %v2371_v63 = vpop.permute.xlu0 %2370 }
 0x32f   : > { %v2549_v15 = vpop.permute.xlu1 %2548  ;;  %v2612_v14 = vsel %vm814_vm4, %v6312_v33, %v2371_v63 }
 0x330   : > { %v2645_v42 = vsel %vm847_vm5, %v2613_v5, %v2549_v15 }
 0x332   : > { %v2547_v6 = vpop.permute.xlu0 %2546 }
 0x333   : > { %v2644_v28 = vsel %vm847_vm5, %v2612_v14, %v2547_v6 }
 0x334   : > { %4453 = vmatprep.mubr.msk.f32.mxu1 %vm885_vm6, %v2644_v28 }
 0x335   : > { %4454 = vmatmul.mubr.msk.f32.gmra.mxu1 %vm885_vm6, %v2645_v42 }
 0x336   : > { %4512 = vmatprep.mubr.msk.f32.mxu1 %vm885_vm6, %v6351_v19 }
 0x339   : > { %4513 = vmatmul.mubr.msk.f32.vlgmr.msra.gmra.mxu1 %vm885_vm6, %v6348_v40 }
 0x33a   : > { %4515 = vmatprep.mubr.msk.f32.mxu1 %vm885_vm6, %v6373_v51 }
 0x33d   : > { %4516 = vmatmul.mubr.msk.f32.gmra.mxu1 %vm885_vm6, %v6368_v17 }
 0x33e   : > { %4518 = vmatprep.mubr.msk.f32.mxu1 %vm885_vm6, %v6393_v47 }
 0x341   : > { %4519 = vmatmul.mubr.msk.f32.gmra.mxu1 %vm885_vm6, %v6390_v29 }
 0x342   : > { %4521 = vmatprep.mubr.msk.f32.mxu1 %vm885_vm6, %v6411_v27 }
 0x345   : > { %4522 = vmatmul.mubr.msk.f32.gmra.mxu1 %vm885_vm6, %v6408_v44 }
 0x346   : > { %4524 = vmatprep.mubr.msk.f32.mxu1 %vm885_vm6, %v6429_v12 }
 0x349   : > { %4525 = vmatmul.mubr.msk.f32.gmra.mxu1 %vm885_vm6, %v6426_v45 }
 0x34a   : > { %4527 = vmatprep.mubr.msk.f32.mxu1 %vm885_vm6, %v6447_v48 }
 0x34d   : > { %4528 = vmatmul.mubr.msk.f32.gmra.mxu1 %vm885_vm6, %v6444_v55 }
 0x34e   : > { %4530 = vmatprep.mubr.msk.f32.mxu1 %vm885_vm6, %v6465_v16 }
 0x351   : > { %4531 = vmatmul.mubr.msk.f32.gmra.mxu1 %vm885_vm6, %v6462_v11 }
 0x352   : > { %4533 = vmatprep.mubr.msk.f32.mxu1 %vm885_vm6, %v6483_v39 }
 0x355   : > { %4534 = vmatmul.mubr.msk.f32.gmra.mxu1 %vm885_vm6, %v6480_v25 }
 0x356   : > { %4536 = vmatprep.mubr.msk.f32.mxu1 %vm885_vm6, %v6501_v59 }
 0x359   : > { %4537 = vmatmul.mubr.msk.f32.gmra.mxu1 %vm885_vm6, %v6498_v4 }
 0x35a   : > { %4539 = vmatprep.mubr.msk.f32.mxu1 %vm885_vm6, %v6519_v26 }
 0x35d   : > { %4540 = vmatmul.mubr.msk.f32.gmra.mxu1 %vm885_vm6, %v6516_v38 }
 0x35e   : > { %4542 = vmatprep.mubr.msk.f32.mxu1 %vm885_vm6, %v6537_v53 }
 0x361   : > { %4543 = vmatmul.mubr.msk.f32.gmra.mxu1 %vm885_vm6, %v6534_v31 }
 0x362   : > { %4545 = vmatprep.mubr.msk.f32.mxu1 %vm885_vm6, %v2638_v3 }
 0x365   : > { %4546 = vmatmul.mubr.msk.f32.gmra.mxu1 %vm885_vm6, %v6552_v37 }
 0x366   : > { %4548 = vmatprep.mubr.msk.f32.mxu1 %vm885_vm6, %v2640_v24 }
 0x369   : > { %4549 = vmatmul.mubr.msk.f32.gmra.mxu1 %vm885_vm6, %v2641_v54 }
 0x36a   : > { %4551 = vmatprep.mubr.msk.f32.mxu1 %vm885_vm6, %v2642_v1 }
 0x36d   : > { %4552 = vmatmul.mubr.msk.f32.gmra.mxu1 %vm885_vm6, %v2643_v2 }
 0x36e   : > { %4554 = vmatprep.mubr.msk.f32.mxu1 %vm885_vm6, %v2644_v28 }
 0x371   : > { %4555 = vmatmul.mubr.msk.f32.gmra.mxu1 %vm885_vm6, %v2645_v42 }
 0x372   : > { %4557 = vmatprep.mubr.msk.f32.mxu1 %vm885_vm6, %v2642_v1 }
 0x375   : > { %4558 = vmatmul.mubr.msk.f32.gmra.mxu1 %vm885_vm6, %v2643_v2 }
 0x37d   : > { %v4410_v60 = vpop.f32.mrf.mxu1 }
 0x37f   : > { %v2816_v33 = vpop.f32.mrf.mxu1 }
 0x385   : > { %v4413_v40 = vpop.f32.mrf.mxu1  ;;  %v4462_v39 = vpop.f32.mrf.mxu0 }
 0x386   : > { %v3050_v43 = vadd.f32 %v4462_v39, %v4410_v60 }
 0x387   : > { %v2826_v19 = vpop.f32.mrf.mxu1  ;;  %v3044_v58 = vpop.f32.mrf.mxu0 }
 0x388   : > { %v3045_v36 = vadd.f32 %v3044_v58, %v2816_v33 }
 0x389   : > { %v4465_v32 = vpop.f32.mrf.mxu0 }
 0x38a   : > { %v3060_v56 = vadd.f32 %v4465_v32, %v4413_v40 }
 0x38b   : > { %v3054_v13 = vpop.f32.mrf.mxu0 }
 0x38c   : > { %v3055_v30 = vadd.f32 %v3054_v13, %v2826_v19 }
 0x38d   : > { %v4416_v17 = vpop.f32.mrf.mxu1  ;;  %v4468_v7 = vpop.f32.mrf.mxu0 }
 0x38e   : > { %v3070_v14 = vadd.f32 %v4468_v7, %v4416_v17 }
 0x38f   : > { %v2836_v51 = vpop.f32.mrf.mxu1  ;;  %v3064_v31 = vpop.f32.mrf.mxu0 }
 0x390   : > { %v3065_v33 = vadd.f32 %v3064_v31, %v2836_v51 }
 0x391   : > { %v4471_v53 = vpop.f32.mrf.mxu0 }
 0x393   : > { %v3074_v46 = vpop.f32.mrf.mxu0 }
 0x395   : > { %v6644_v29 = vpop.f32.mrf.mxu1  ;;  %v4474_v50 = vpop.f32.mrf.mxu0 }
 0x396   : > { %v3080_v51 = vadd.f32 %v4471_v53, %v6644_v29 }
 0x397   : > { %v6646_v47 = vpop.f32.mrf.mxu1  ;;  %v3084_v8 = vpop.f32.mrf.mxu0 }
 0x39d   : > { %v6648_v44 = vpop.f32.mrf.mxu1  ;;  %v6692_v0 = vpop.f32.mrf.mxu0 }
 0x39f   : > { %v6650_v27 = vpop.f32.mrf.mxu1  ;;  %v6698_v10 = vpop.f32.mrf.mxu0 }
 0x3a5   : > { %v6652_v45 = vpop.f32.mrf.mxu1  ;;  %v6700_v24 = vpop.f32.mrf.mxu0 }
 0x3a7   : > { %v6654_v12 = vpop.f32.mrf.mxu1  ;;  %v6706_v9 = vpop.f32.mrf.mxu0 }
 0x3ad   : > { %v6656_v55 = vpop.f32.mrf.mxu1  ;;  %v6716_v42 = vpop.f32.mrf.mxu0 }
 0x3af   : > { %v6658_v48 = vpop.f32.mrf.mxu1  ;;  %v6733_v31 = vpop.f32.mrf.mxu0 }
 0x3b5   : > { %v6660_v11 = vpop.f32.mrf.mxu1 }
 0x3b7   : > { %v6662_v16 = vpop.f32.mrf.mxu1 }
 0x3bd   : > { %v6664_v25 = vpop.f32.mrf.mxu1 }
 0x3bf   : > { %v6666_v4 = vpop.f32.mrf.mxu1 }
 0x3c5   : > { %v6668_v59 = vpop.f32.mrf.mxu1 }
 0x3c7   : > { %v6670_v38 = vpop.f32.mrf.mxu1 }
 0x3cd   : > { %v6672_v26 = vpop.f32.mrf.mxu1 }
 0x3cf   : > { %v6674_v52 = vpop.f32.mrf.mxu1 }
 0x3d5   : > { %v6676_v34 = vpop.f32.mrf.mxu1 }
 0x3d7   : > { %v6678_v35 = vpop.f32.mrf.mxu1 }
 0x3dd   : > { %v6680_v41 = vpop.f32.mrf.mxu1 }
 0x3df   : > { %v6682_v21 = vpop.f32.mrf.mxu1 }
 0x3e5   : > { %v6684_v22 = vpop.f32.mrf.mxu1 }
 0x3e7   : > { %v6686_v49 = vpop.f32.mrf.mxu1 }
 0x3ed   : > { %v6688_v37 = vpop.f32.mrf.mxu1 }
 0x3ef   : > { %v6690_v3 = vpop.f32.mrf.mxu1 }
 0x3f5   : > { %v6694_v62 = vpop.f32.mrf.mxu1 }
 0x3f7   : > { %v6696_v57 = vpop.f32.mrf.mxu1 }
 0x3f9   : > { %v4514_v54 = vpop.f32.mrf.mxu1 }
 0x3fa   : > { %v6702_v20 = vadd.f32 %v4514_v54, %v3050_v43 }
 0x3fb   : > { %v3275_v18 = vpop.f32.mrf.mxu1 }
 0x3fc   : > { %v6704_v61 = vadd.f32 %v3275_v18, %v3045_v36  ;;  %v3536_v1 = vmul.f32 %v6702_v20, %v6702_v20  ;;  %v3467_v6 = vsel %vm814_vm4, %v6702_v20, 0.0 }
 0x3fd   : > { %v4517_v2 = vpop.f32.mrf.mxu1 }
 0x3fe   : > { %v3466_v23 = vsel %vm814_vm4, %v6704_v61, 0.0  ;;  %v3535_v63 = vmul.f32 %v6704_v61, %v6704_v61  ;;  %v6714_v15 = vadd.f32 %v4517_v2, %v3060_v56  ;;  %v3568_v58 = vsel %vm814_vm4, %v3536_v1, 0.0 }
 0x3ff   : > { %v3285_v5 = vpop.f32.mrf.mxu1  ;;  %v3468_v40 = vadd.f32 %v3467_v6, %v3466_v23 }
 0x400   : > { %v3567_v28 = vsel %vm814_vm4, %v3535_v63, 0.0  ;;  %v6721_v60 = vadd.f32 %v3285_v5, %v3055_v30  ;;  %v3538_v19 = vmul.f32 %v6714_v15, %v6714_v15  ;;  %v3471_v36 = vsel %vm814_vm4, %v6714_v15, 0.0  ;;  %v6742_v5 = vpop.f32.mrf.mxu0 }
 0x401   : > { %v4520_v39 = vpop.f32.mrf.mxu1  ;;  %v3569_v7 = vadd.f32 %v3568_v58, %v3567_v28  ;;  %v3075_v30 = vadd.f32 %v3074_v46, %v6646_v47  ;;  %v3085_v58 = vadd.f32 %v3084_v8, %v6650_v27 }
 0x402   : > { %v3469_v17 = vsel %vm814_vm4, %v6721_v60, 0.0  ;;  %v3537_v32 = vmul.f32 %v6721_v60, %v6721_v60  ;;  %v6730_v13 = vadd.f32 %v4520_v39, %v3070_v14  ;;  %v3572_v2 = vsel %vm814_vm4, %v3538_v19, 0.0 }
 0x403   : > { %v3470_v43 = vadd.f32 %v3469_v17, %v3468_v40  ;;  %v3295_v54 = vpop.f32.mrf.mxu1 }
 0x404   : > { %v3570_v18 = vsel %vm814_vm4, %v3537_v32, 0.0  ;;  %v6738_v56 = vadd.f32 %v3295_v54, %v3065_v33  ;;  %v3540_v29 = vmul.f32 %v6730_v13, %v6730_v13  ;;  %v3090_v33 = vadd.f32 %v4474_v50, %v6648_v44  ;;  %v6761_v54 = vpop.f32.mrf.mxu0 }
 0x405   : > { %v3571_v1 = vadd.f32 %v3570_v18, %v3569_v7  ;;  %v3472_v23 = vadd.f32 %v3471_v36, %v3470_v43  ;;  %v4523_v63 = vpop.f32.mrf.mxu1  ;;  %v3475_v40 = vsel %vm814_vm4, %v6730_v13, 0.0 }
 0x406   : > { %v3473_v53 = vsel %vm814_vm4, %v6738_v56, 0.0  ;;  %v3539_v14 = vmul.f32 %v6738_v56, %v6738_v56  ;;  %v6750_v6 = vadd.f32 %v4523_v63, %v3080_v51  ;;  %v3576_v51 = vsel %vm814_vm4, %v3540_v29, 0.0 }
 0x407   : > { %v3474_v28 = vadd.f32 %v3473_v53, %v3472_v23  ;;  %v3573_v47 = vadd.f32 %v3572_v2, %v3571_v1  ;;  %v3305_v46 = vpop.f32.mrf.mxu1  ;;  %v6772_v2 = vpop.f32.mrf.mxu0  ;;  %v3095_v29 = vadd.f32 %v6698_v10, %v6654_v12  ;;  %v3110_v12 = vadd.f32 %v6700_v24, %v6656_v55 }
 0x408   : > { %v3574_v19 = vsel %vm814_vm4, %v3539_v14, 0.0  ;;  %v6756_v39 = vadd.f32 %v3305_v46, %v3075_v30  ;;  %v3542_v32 = vmul.f32 %v6750_v6, %v6750_v6  ;;  %v3100_v30 = vadd.f32 %v6692_v0, %v6652_v45 }
 0x409   : > { %v3575_v17 = vadd.f32 %v3574_v19, %v3573_v47  ;;  %v3476_v7 = vadd.f32 %v3475_v40, %v3474_v28  ;;  %v4526_v43 = vpop.f32.mrf.mxu1  ;;  %v3479_v1 = vsel %vm814_vm4, %v6750_v6, 0.0  ;;  %v3134_v10 = vpop.f32.mrf.mxu0 }
 0x40a   : > { %v3477_v44 = vsel %vm814_vm4, %v6756_v39, 0.0  ;;  %v3541_v50 = vmul.f32 %v6756_v39, %v6756_v39  ;;  %v6768_v36 = vadd.f32 %v4526_v43, %v3090_v33  ;;  %v3580_v53 = vsel %vm814_vm4, %v3542_v32, 0.0 }
 0x40b   : > { %v3478_v18 = vadd.f32 %v3477_v44, %v3476_v7  ;;  %v3577_v27 = vadd.f32 %v3576_v51, %v3575_v17  ;;  %v3315_v8 = vpop.f32.mrf.mxu1  ;;  %v3105_v43 = vadd.f32 %v6706_v9, %v6658_v48  ;;  %v3120_v9 = vadd.f32 %v6716_v42, %v6660_v11 }
 0x40c   : > { %v3578_v23 = vsel %vm814_vm4, %v3541_v50, 0.0  ;;  %v6777_v63 = vadd.f32 %v3315_v8, %v3085_v58  ;;  %v3544_v45 = vmul.f32 %v6768_v36, %v6768_v36  ;;  %v3483_v17 = vsel %vm814_vm4, %v6768_v36, 0.0 }
 0x40d   : > { %v3579_v14 = vadd.f32 %v3578_v23, %v3577_v27  ;;  %v3480_v28 = vadd.f32 %v3479_v1, %v3478_v18  ;;  %v4529_v47 = vpop.f32.mrf.mxu1  ;;  %v4492_v27 = vpop.f32.mrf.mxu0 }
 0x40e   : > { %v3481_v0 = vsel %vm814_vm4, %v6777_v63, 0.0  ;;  %v3543_v46 = vmul.f32 %v6777_v63, %v6777_v63  ;;  %v6788_v33 = vadd.f32 %v4529_v47, %v3100_v30  ;;  %v3584_v55 = vsel %vm814_vm4, %v3544_v45, 0.0 }
 0x40f   : > { %v3482_v40 = vadd.f32 %v3481_v0, %v3480_v28  ;;  %v3581_v19 = vadd.f32 %v3580_v53, %v3579_v14  ;;  %v3325_v58 = vpop.f32.mrf.mxu1  ;;  %v3115_v28 = vadd.f32 %v6733_v31, %v6662_v16  ;;  %v3130_v31 = vadd.f32 %v6742_v5, %v6664_v25 }
 0x410   : > { %v3582_v32 = vsel %vm814_vm4, %v3543_v46, 0.0  ;;  %v6795_v7 = vadd.f32 %v3325_v58, %v3095_v29  ;;  %v3546_v44 = vmul.f32 %v6788_v33, %v6788_v33  ;;  %v3487_v29 = vsel %vm814_vm4, %v6788_v33, 0.0 }
 0x411   : > { %v3583_v51 = vadd.f32 %v3582_v32, %v3581_v19  ;;  %v3484_v50 = vadd.f32 %v3483_v17, %v3482_v40  ;;  %v4532_v18 = vpop.f32.mrf.mxu1  ;;  %v3144_v40 = vpop.f32.mrf.mxu0 }
 0x412   : > { %v3485_v24 = vsel %vm814_vm4, %v6795_v7, 0.0  ;;  %v3545_v8 = vmul.f32 %v6795_v7, %v6795_v7  ;;  %v6806_v30 = vadd.f32 %v4532_v18, %v3110_v12  ;;  %v3588_v47 = vsel %vm814_vm4, %v3546_v44, 0.0 }
 0x413   : > { %v3486_v1 = vadd.f32 %v3485_v24, %v3484_v50  ;;  %v3585_v23 = vadd.f32 %v3584_v55, %v3583_v51  ;;  %v3335_v48 = vpop.f32.mrf.mxu1  ;;  %v4495_v32 = vpop.f32.mrf.mxu0  ;;  %v3125_v50 = vadd.f32 %v6761_v54, %v6666_v4  ;;  %v3140_v4 = vadd.f32 %v6772_v2, %v6668_v59 }
 0x414   : > { %v3586_v53 = vsel %vm814_vm4, %v3545_v8, 0.0  ;;  %v6813_v14 = vadd.f32 %v3335_v48, %v3105_v43  ;;  %v3548_v19 = vmul.f32 %v6806_v30, %v6806_v30  ;;  %v3491_v43 = vsel %vm814_vm4, %v6806_v30, 0.0 }
 0x415   : > { %v3587_v45 = vadd.f32 %v3586_v53, %v3585_v23  ;;  %v3488_v0 = vadd.f32 %v3487_v29, %v3486_v1  ;;  %v4535_v46 = vpop.f32.mrf.mxu1  ;;  %v3154_v54 = vpop.f32.mrf.mxu0 }
 0x416   : > { %v3489_v11 = vsel %vm814_vm4, %v6813_v14, 0.0  ;;  %v3547_v42 = vmul.f32 %v6813_v14, %v6813_v14  ;;  %v6824_v58 = vadd.f32 %v4535_v46, %v3120_v9  ;;  %v3592_v1 = vsel %vm814_vm4, %v3548_v19, 0.0 }
 0x417   : > { %v3490_v12 = vadd.f32 %v3489_v11, %v3488_v0  ;;  %v3589_v17 = vadd.f32 %v3588_v47, %v3587_v45  ;;  %v3345_v16 = vpop.f32.mrf.mxu1  ;;  %v3135_v45 = vadd.f32 %v3134_v10, %v6670_v38  ;;  %v3150_v10 = vadd.f32 %v4492_v27, %v6672_v26 }
 0x418   : > { %v3590_v51 = vsel %vm814_vm4, %v3547_v42, 0.0  ;;  %v6831_v44 = vadd.f32 %v3345_v16, %v3115_v28  ;;  %v3550_v55 = vmul.f32 %v6824_v58, %v6824_v58  ;;  %v3495_v53 = vsel %vm814_vm4, %v6824_v58, 0.0  ;;  %v4498_v42 = vpop.f32.mrf.mxu0 }
 0x419   : > { %v3591_v18 = vadd.f32 %v3590_v51, %v3589_v17  ;;  %v3492_v24 = vadd.f32 %v3491_v43, %v3490_v12  ;;  %v4538_v8 = vpop.f32.mrf.mxu1 }
 0x41a   : > { %v3493_v25 = vsel %vm814_vm4, %v6831_v44, 0.0  ;;  %v3549_v5 = vmul.f32 %v6831_v44, %v6831_v44  ;;  %v6842_v23 = vadd.f32 %v4538_v8, %v3130_v31  ;;  %v3596_v0 = vsel %vm814_vm4, %v3550_v55, 0.0 }
 0x41b   : > { %v3494_v48 = vadd.f32 %v3493_v25, %v3492_v24  ;;  %v3593_v9 = vadd.f32 %v3592_v1, %v3591_v18  ;;  %v3355_v29 = vpop.f32.mrf.mxu1  ;;  %v3145_v18 = vadd.f32 %v3144_v40, %v6674_v52  ;;  %v3164_v25 = vpop.f32.mrf.mxu0  ;;  %v3160_v40 = vadd.f32 %v4495_v32, %v6676_v34 }
 0x41c   : > { %v3594_v28 = vsel %vm814_vm4, %v3549_v5, 0.0  ;;  %v6849_v47 = vadd.f32 %v3355_v29, %v3125_v50  ;;  %v3552_v12 = vmul.f32 %v6842_v23, %v6842_v23  ;;  %v3499_v43 = vsel %vm814_vm4, %v6842_v23, 0.0 }
 0x41d   : > { %v3595_v46 = vadd.f32 %v3594_v28, %v3593_v9  ;;  %v3496_v19 = vadd.f32 %v3495_v53, %v3494_v48  ;;  %v4541_v11 = vpop.f32.mrf.mxu1 }
 0x41e   : > { %v3497_v59 = vsel %vm814_vm4, %v6849_v47, 0.0  ;;  %v3551_v2 = vmul.f32 %v6849_v47, %v6849_v47  ;;  %v6859_v17 = vadd.f32 %v4541_v11, %v3140_v4  ;;  %v3600_v5 = vsel %vm814_vm4, %v3552_v12, 0.0  ;;  %v4501_v4 = vpop.f32.mrf.mxu0 }
 0x41f   : > { %v3498_v16 = vadd.f32 %v3497_v59, %v3496_v19  ;;  %v3597_v31 = vadd.f32 %v3596_v0, %v3595_v46  ;;  %v3365_v38 = vpop.f32.mrf.mxu1  ;;  %v3155_v0 = vadd.f32 %v3154_v54, %v6678_v35  ;;  %v3170_v35 = vadd.f32 %v4498_v42, %v6680_v41 }
 0x420   : > { %v3598_v51 = vsel %vm814_vm4, %v3551_v2, 0.0  ;;  %v6865_v50 = vadd.f32 %v3365_v38, %v3135_v45  ;;  %v3554_v24 = vmul.f32 %v6859_v17, %v6859_v17  ;;  %v3503_v53 = vsel %vm814_vm4, %v6859_v17, 0.0  ;;  %v3174_v54 = vpop.f32.mrf.mxu0 }
 0x421   : > { %v3599_v55 = vadd.f32 %v3598_v51, %v3597_v31  ;;  %v3500_v8 = vadd.f32 %v3499_v43, %v3498_v16  ;;  %v4544_v1 = vpop.f32.mrf.mxu1 }
 0x422   : > { %v3501_v26 = vsel %vm814_vm4, %v6865_v50, 0.0  ;;  %v3553_v27 = vmul.f32 %v6865_v50, %v6865_v50  ;;  %v6875_v48 = vadd.f32 %v4544_v1, %v3150_v10  ;;  %v3604_v46 = vsel %vm814_vm4, %v3554_v24, 0.0 }
 0x423   : > { %v3502_v9 = vadd.f32 %v3501_v26, %v3500_v8  ;;  %v3601_v29 = vadd.f32 %v3600_v5, %v3599_v55  ;;  %v3375_v52 = vpop.f32.mrf.mxu1  ;;  %v4504_v5 = vpop.f32.mrf.mxu0 }
 0x424   : > { %v3602_v28 = vsel %vm814_vm4, %v3553_v27, 0.0  ;;  %v6881_v45 = vadd.f32 %v3375_v52, %v3145_v18  ;;  %v3556_v59 = vmul.f32 %v6875_v48, %v6875_v48  ;;  %v3507_v10 = vsel %vm814_vm4, %v6875_v48, 0.0 }
 0x425   : > { %v3603_v19 = vadd.f32 %v3602_v28, %v3601_v29  ;;  %v3504_v11 = vadd.f32 %v3503_v53, %v3502_v9  ;;  %v4547_v12 = vpop.f32.mrf.mxu1  ;;  %v3165_v18 = vadd.f32 %v3164_v25, %v6682_v21  ;;  %v3180_v25 = vadd.f32 %v4501_v4, %v6684_v22 }
 0x426   : > { %v3505_v34 = vsel %vm814_vm4, %v6881_v45, 0.0  ;;  %v3555_v32 = vmul.f32 %v6881_v45, %v6881_v45  ;;  %v6891_v2 = vadd.f32 %v4547_v12, %v3160_v40  ;;  %v3608_v26 = vsel %vm814_vm4, %v3556_v59, 0.0  ;;  %v3184_v12 = vpop.f32.mrf.mxu0 }
 0x427   : > { %v3506_v16 = vadd.f32 %v3505_v34, %v3504_v11  ;;  %v3605_v31 = vadd.f32 %v3604_v46, %v3603_v19  ;;  %v3385_v38 = vpop.f32.mrf.mxu1  ;;  %v3175_v28 = vadd.f32 %v3174_v54, %v6686_v49 }
 0x428   : > { %v3606_v43 = vsel %vm814_vm4, %v3555_v32, 0.0  ;;  %v6897_v51 = vadd.f32 %v3385_v38, %v3155_v0  ;;  %v3558_v24 = vmul.f32 %v6891_v2, %v6891_v2  ;;  %v3511_v52 = vsel %vm814_vm4, %v6891_v2, 0.0  ;;  %v4507_v38 = vpop.f32.mrf.mxu0 }
 0x429   : > { %v3607_v55 = vadd.f32 %v3606_v43, %v3605_v31  ;;  %v3508_v8 = vadd.f32 %v3507_v10, %v3506_v16  ;;  %v4550_v1 = vpop.f32.mrf.mxu1  ;;  %v3190_v31 = vadd.f32 %v4504_v5, %v6688_v37  ;;  %v3185_v43 = vadd.f32 %v3184_v12, %v6690_v3 }
 0x42a   : > { %v3509_v41 = vsel %vm814_vm4, %v6897_v51, 0.0  ;;  %v3557_v42 = vmul.f32 %v6897_v51, %v6897_v51  ;;  %v6907_v27 = vadd.f32 %v4550_v1, %v3170_v35  ;;  %v3612_v0 = vsel %vm814_vm4, %v3558_v24, 0.0  ;;  %v3194_v3 = vpop.f32.mrf.mxu0 }
 0x42b   : > { %v3510_v9 = vadd.f32 %v3509_v41, %v3508_v8  ;;  %v3609_v29 = vadd.f32 %v3608_v26, %v3607_v55  ;;  %v3395_v21 = vpop.f32.mrf.mxu1 }
 0x42c   : > { %v3610_v40 = vsel %vm814_vm4, %v3557_v42, 0.0  ;;  %v6913_v53 = vadd.f32 %v3395_v21, %v3165_v18  ;;  %v3560_v59 = vmul.f32 %v6907_v27, %v6907_v27  ;;  %v3515_v35 = vsel %vm814_vm4, %v6907_v27, 0.0 }
 0x42d   : > { %v3611_v46 = vadd.f32 %v3610_v40, %v3609_v29  ;;  %v3512_v19 = vadd.f32 %v3511_v52, %v3510_v9  ;;  %v4553_v11 = vpop.f32.mrf.mxu1  ;;  %v3200_v29 = vadd.f32 %v4507_v38, %v6694_v62  ;;  %v3195_v40 = vadd.f32 %v3194_v3, %v6696_v57 }
 0x42e   : > { %v3513_v22 = vsel %vm814_vm4, %v6913_v53, 0.0  ;;  %v3559_v4 = vmul.f32 %v6913_v53, %v6913_v53  ;;  %v6923_v34 = vadd.f32 %v4553_v11, %v3180_v25  ;;  %v3616_v1 = vsel %vm814_vm4, %v3560_v59, 0.0 }
 0x42f   : > { %v3514_v32 = vadd.f32 %v3513_v22, %v3512_v19  ;;  %v3613_v16 = vadd.f32 %v3612_v0, %v3611_v46  ;;  %v3405_v49 = vpop.f32.mrf.mxu1 }
 0x430   : > { %v3614_v54 = vsel %vm814_vm4, %v3559_v4, 0.0  ;;  %v6929_v10 = vadd.f32 %v3405_v49, %v3175_v28  ;;  %v3562_v55 = vmul.f32 %v6923_v34, %v6923_v34  ;;  %v3519_v21 = vsel %vm814_vm4, %v6923_v34, 0.0 }
 0x431   : > { %v3615_v18 = vadd.f32 %v3614_v54, %v3613_v16  ;;  %v3516_v24 = vadd.f32 %v3515_v35, %v3514_v32  ;;  %v4556_v8 = vpop.f32.mrf.mxu1 }
 0x432   : > { %v3517_v37 = vsel %vm814_vm4, %v6929_v10, 0.0  ;;  %v3561_v5 = vmul.f32 %v6929_v10, %v6929_v10  ;;  %v6939_v26 = vadd.f32 %v4556_v8, %v3190_v31  ;;  %v3620_v28 = vsel %vm814_vm4, %v3562_v55, 0.0 }
 0x433   : > { %v3518_v41 = vadd.f32 %v3517_v37, %v3516_v24  ;;  %v3617_v42 = vadd.f32 %v3616_v1, %v3615_v18  ;;  %v3415_v9 = vpop.f32.mrf.mxu1 }
 0x434   : > { %v3618_v25 = vsel %vm814_vm4, %v3561_v5, 0.0  ;;  %v6945_v52 = vadd.f32 %v3415_v9, %v3185_v43  ;;  %v3564_v11 = vmul.f32 %v6939_v26, %v6939_v26  ;;  %v3523_v57 = vsel %vm814_vm4, %v6939_v26, 0.0 }
 0x435   : > { %v3619_v0 = vadd.f32 %v3618_v25, %v3617_v42  ;;  %v3520_v46 = vadd.f32 %v3519_v21, %v3518_v41  ;;  %v4559_v19 = vpop.f32.mrf.mxu1 }
 0x436   : > { %v3521_v62 = vsel %vm814_vm4, %v6945_v52, 0.0  ;;  %v3563_v12 = vmul.f32 %v6945_v52, %v6945_v52  ;;  %v6955_v59 = vadd.f32 %v4559_v19, %v3200_v29  ;;  %v3624_v35 = vsel %vm814_vm4, %v3564_v11, 0.0 }
 0x437   : > { %v3522_v22 = vadd.f32 %v3521_v62, %v3520_v46  ;;  %v3621_v4 = vadd.f32 %v3620_v28, %v3619_v0  ;;  %v3425_v32 = vpop.f32.mrf.mxu1 }
 0x438   : > { %v3622_v16 = vsel %vm814_vm4, %v3563_v12, 0.0  ;;  %v6960_v49 = vadd.f32 %v3425_v32, %v3195_v40  ;;  %v3566_v54 = vmul.f32 %v6955_v59, %v6955_v59  ;;  %v3527_v8 = vsel %vm814_vm4, %v6955_v59, 0.0 }
 0x439   : > { %v3623_v31 = vadd.f32 %v3622_v16, %v3621_v4  ;;  %v3524_v38 = vadd.f32 %v3523_v57, %v3522_v22 }
 0x43a   : > { %v3525_v43 = vsel %vm814_vm4, %v6960_v49, 0.0  ;;  %v3565_v18 = vmul.f32 %v6960_v49, %v6960_v49  ;;  %v3628_v41 = vsel %vm814_vm4, %v3566_v54, 0.0 }
 0x43b   : > { %v3526_v55 = vadd.f32 %v3525_v43, %v3524_v38  ;;  %v3625_v24 = vadd.f32 %v3624_v35, %v3623_v31 }
 0x43c   : > { %v3626_v1 = vsel %vm814_vm4, %v3565_v18, 0.0 }
 0x43d   : > { %v3528_v37 = vadd.f32 %v3527_v8, %v3526_v55  ;;  %v3627_v5 = vadd.f32 %v3626_v1, %v3625_v24 }
 0x43f   : > { %v3529_v42 = vrot.slane %v3528_v37, 4  ;;  %v3629_v9 = vadd.f32 %v3628_v41, %v3627_v5 }
 0x441   : > { %v3530_v3 = vadd.f32 %v3529_v42, %v3528_v37  ;;  %v3630_v29 = vrot.slane %v3629_v9, 4 }
 0x443   : > { %v3531_v21 = vrot.slane %v3530_v3, 2  ;;  %v3631_v25 = vadd.f32 %v3630_v29, %v3629_v9 }
 0x445   : > { %v3532_v40 = vadd.f32 %v3531_v21, %v3530_v3  ;;  %v3632_v28 = vrot.slane %v3631_v25, 2 }
 0x447   : > { %v3533_v0 = vrot.slane %v3532_v40, 1  ;;  %v3633_v46 = vadd.f32 %v3632_v28, %v3631_v25 }
 0x449   : > { %v3534_v19 = vadd.f32 %v3533_v0, %v3532_v40  ;;  %v3634_v11 = vrot.slane %v3633_v46, 1 }
 0x44b   : > { %v3635_v62 = vadd.f32 %v3634_v11, %v3633_v46  ;;  %v6973_v12 = vmul.f32 0.00390625, %v3534_v19 }
 0x44d   : > { %v3637_v22 = vmul.f32 0.00390625, %v3635_v62  ;;  %v3638_v4 = vmul.f32 %v6973_v12, %v6973_v12  ;;  %v3650_v57 = vsub.f32 %v6795_v7, %v6973_v12  ;;  %v3651_v16 = vsub.f32 %v6788_v33, %v6973_v12 }
 0x44e   : > { %v3652_v31 = vsub.f32 %v6813_v14, %v6973_v12  ;;  %v3653_v38 = vsub.f32 %v6806_v30, %v6973_v12  ;;  %v3654_v35 = vsub.f32 %v6831_v44, %v6973_v12  ;;  %v3655_v54 = vsub.f32 %v6824_v58, %v6973_v12 }
 0x44f   : > { %v3639_v32 = vsub.f32 %v3637_v22, %v3638_v4  ;;  %v3656_v43 = vsub.f32 %v6849_v47, %v6973_v12  ;;  %v3657_v7 = vsub.f32 %v6842_v23, %v6973_v12  ;;  %v3658_v33 = vsub.f32 %v6865_v50, %v6973_v12 }
 0x450   : > { %v3659_v14 = vsub.f32 %v6859_v17, %v6973_v12  ;;  %v3661_v30 = vsub.f32 %v6875_v48, %v6973_v12  ;;  %v3663_v44 = vsub.f32 %v6891_v2, %v6973_v12  ;;  %v3665_v58 = vsub.f32 %v6907_v27, %v6973_v12 }
 0x451   : > { %v3667_v47 = vsub.f32 %v6923_v34, %v6973_v12  ;;  %v3669_v23 = vsub.f32 %v6939_v26, %v6973_v12  ;;  %v3671_v50 = vsub.f32 %v6955_v59, %v6973_v12  ;;  %v3672_v18 = vadd.f32 1e-05, %v3639_v32 }
 0x452   : > { %v3640_v17 = vsub.f32 %v6704_v61, %v6973_v12  ;;  %v3641_v48 = vsub.f32 %v6702_v20, %v6973_v12  ;;  %v3642_v2 = vsub.f32 %v6721_v60, %v6973_v12  ;;  %v3643_v27 = vsub.f32 %v6714_v15, %v6973_v12 }
 0x453   : > { %4572 = vrsqrt.f32 %v3672_v18  ;;  %v3644_v34 = vsub.f32 %v6738_v56, %v6973_v12  ;;  %v3645_v26 = vsub.f32 %v6730_v13, %v6973_v12  ;;  %v3646_v59 = vsub.f32 %v6756_v39, %v6973_v12  ;;  %v4581_v18 = vld [vmem:[%s4660_s21 + $0x38] sm:$0xff] }
 0x454   : > { %v3647_v61 = vsub.f32 %v6750_v6, %v6973_v12  ;;  %v3648_v20 = vsub.f32 %v6777_v63, %v6973_v12  ;;  %v3649_v60 = vsub.f32 %v6768_v36, %v6973_v12  ;;  %v3660_v15 = vsub.f32 %v6881_v45, %v6973_v12 }
 0x455   : > { %v3662_v56 = vsub.f32 %v6897_v51, %v6973_v12  ;;  %v3664_v13 = vsub.f32 %v6913_v53, %v6973_v12  ;;  %v3666_v39 = vsub.f32 %v6929_v10, %v6973_v12  ;;  %v3668_v6 = vsub.f32 %v6945_v52, %v6973_v12 }
 0x456   : > { %v3670_v63 = vsub.f32 %v6960_v49, %v6973_v12 }
 0x460   : > { %v4573_v55 = vpop.eup %4572 }
 0x461   : > { %v3674_v36 = vmul.f32 %v4573_v55, %v3640_v17  ;;  %v3675_v24 = vmul.f32 %v4573_v55, %v3641_v48  ;;  %v3676_v8 = vmul.f32 %v4573_v55, %v3642_v2  ;;  %v3677_v45 = vmul.f32 %v4573_v55, %v3643_v27  ;;  %v4582_v48 = vld [vmem:[%s4660_s21 + $0x40] sm:$0xff]  ;;  %v4583_v27 = vld [vmem:[%s4660_s21 + $0x48] sm:$0xff] }
 0x462   : > { %v3678_v1 = vmul.f32 %v4573_v55, %v3644_v34  ;;  %v3679_v37 = vmul.f32 %v4573_v55, %v3645_v26  ;;  %v3680_v51 = vmul.f32 %v4573_v55, %v3646_v59  ;;  %v3681_v5 = vmul.f32 %v4573_v55, %v3647_v61  ;;  %v4584_v26 = vld [vmem:[%s4660_s21 + $0x50] sm:$0xff]  ;;  %v4585_v61 = vld [vmem:[%s4660_s21 + $0x58] sm:$0xff] }
 0x463   : > { %v3682_v41 = vmul.f32 %v4573_v55, %v3648_v20  ;;  %v3683_v42 = vmul.f32 %v4573_v55, %v3649_v60  ;;  %v3684_v53 = vmul.f32 %v4573_v55, %v3650_v57  ;;  %v3685_v9 = vmul.f32 %v4573_v55, %v3651_v16  ;;  %v4586_v60 = vld [vmem:[%s4660_s21 + $0x60] sm:$0xff] }
 0x464   : > { %v3686_v3 = vmul.f32 %v4573_v55, %v3652_v31  ;;  %v3687_v10 = vmul.f32 %v4573_v55, %v3653_v38  ;;  %v3688_v29 = vmul.f32 %v4573_v55, %v3654_v35  ;;  %v3689_v52 = vmul.f32 %v4573_v55, %v3655_v54  ;;  %v4574_v31 = vld [vmem:[%s4660_s21] sm:$0xff]  ;;  %v4575_v35 = vld [vmem:[%s4660_s21 + $0x8] sm:$0xff] }
 0x465   : > { %v3690_v21 = vmul.f32 %v4573_v55, %v3656_v43  ;;  %v3691_v25 = vmul.f32 %v4573_v55, %v3657_v7  ;;  %v3692_v49 = vmul.f32 %v4573_v55, %v3658_v33  ;;  %v3693_v40 = vmul.f32 %v4573_v55, %v3659_v14  ;;  %v4576_v43 = vld [vmem:[%s4660_s21 + $0x10] sm:$0xff]  ;;  %v4577_v33 = vld [vmem:[%s4660_s21 + $0x18] sm:$0xff] }
 0x466   : > { %v7041_v28 = vmul.f32 %v4573_v55, %v3660_v15  ;;  %v7043_v0 = vmul.f32 %v4573_v55, %v3661_v30  ;;  %v7045_v46 = vmul.f32 %v4573_v55, %v3662_v56  ;;  %v7047_v19 = vmul.f32 %v4573_v55, %v3663_v44  ;;  %v4578_v30 = vld [vmem:[%s4660_s21 + $0x20] sm:$0xff]  ;;  %v4587_v56 = vld [vmem:[%s4660_s21 + $0x68] sm:$0xff] }
 0x467   : > { %v7049_v11 = vmul.f32 %v4573_v55, %v3664_v13  ;;  %v7051_v62 = vmul.f32 %v4573_v55, %v3665_v58  ;;  %v7053_v12 = vmul.f32 %v4573_v55, %v3666_v39  ;;  %v7055_v22 = vmul.f32 %v4573_v55, %v3667_v47  ;;  %v4579_v58 = vld [vmem:[%s4660_s21 + $0x28] sm:$0xff]  ;;  %v4588_v13 = vld [vmem:[%s4660_s21 + $0x70] sm:$0xff] }
 0x468   : > { %v7064_v4 = vmul.f32 %v4573_v55, %v3668_v6  ;;  %v7066_v32 = vmul.f32 %v4573_v55, %v3669_v23  ;;  %v7068_v57 = vmul.f32 %v4573_v55, %v3670_v63  ;;  %v7070_v16 = vmul.f32 %v4573_v55, %v3671_v50  ;;  %v4580_v23 = vld [vmem:[%s4660_s21 + $0x30] sm:$0xff]  ;;  %v4589_v6 = vld [vmem:[%s4660_s21 + $0x78] sm:$0xff] }
 0x469   : > { %v3706_v38 = vadd.f32 %v4574_v31, %v3674_v36  ;;  %v3707_v54 = vadd.f32 %v4575_v35, %v3675_v24  ;;  %v3708_v7 = vadd.f32 %v4576_v43, %v3676_v8  ;;  %v3709_v14 = vadd.f32 %v4577_v33, %v3677_v45  ;;  %v4590_v36 = vld [vmem:[%s4660_s21 + $0x80] sm:$0xff]  ;;  %v4591_v8 = vld [vmem:[%s4660_s21 + $0x88] sm:$0xff]  ;;  %v4604_v31 = vld [vmem:[%s4660_s21 + $0xf0] sm:$0xff] }
 0x46a   : > { %v3710_v44 = vadd.f32 %v4578_v30, %v3678_v1  ;;  %v3711_v47 = vadd.f32 %v4579_v58, %v3679_v37  ;;  %v3712_v50 = vadd.f32 %v4580_v23, %v3680_v51  ;;  %v3713_v17 = vadd.f32 %v4581_v18, %v3681_v5  ;;  %v4592_v1 = vld [vmem:[%s4660_s21 + $0x90] sm:$0xff]  ;;  %v4593_v51 = vld [vmem:[%s4660_s21 + $0x98] sm:$0xff] }
 0x46b   : > { %v3714_v2 = vadd.f32 %v4582_v48, %v3682_v41  ;;  %v3715_v34 = vadd.f32 %v4583_v27, %v3683_v42  ;;  %v3716_v59 = vadd.f32 %v4584_v26, %v3684_v53  ;;  %v3717_v20 = vadd.f32 %v4585_v61, %v3685_v9  ;;  %3738 = vst.msk [vmem:[%s7062_s23] sm:$0xff] %vm814_vm4, %v3706_v38  ;;  %v4594_v41 = vld [vmem:[%s4660_s21 + $0xa0] sm:$0xff]  ;;  %v4595_v53 = vld [vmem:[%s4660_s21 + $0xa8] sm:$0xff]  ;;  %v4605_v35 = vld [vmem:[%s4660_s21 + $0xf8] sm:$0xff] }
 0x46c   : > { %3739 = vst.msk [vmem:[%s7062_s23 + $0x8] sm:$0xff] %vm814_vm4, %v3707_v54  ;;  %3740 = vst.msk [vmem:[%s7062_s23 + $0x10] sm:$0xff] %vm814_vm4, %v3708_v7  ;;  %v3718_v15 = vadd.f32 %v4586_v60, %v3686_v3  ;;  %v3719_v55 = vadd.f32 %v4587_v56, %v3687_v10  ;;  %v3720_v39 = vadd.f32 %v4588_v13, %v3688_v29  ;;  %v4596_v3 = vld [vmem:[%s4660_s21 + $0xb0] sm:$0xff]  ;;  %v4597_v29 = vld [vmem:[%s4660_s21 + $0xb8] sm:$0xff] }
 0x46d   : > { %3741 = vst.msk [vmem:[%s7062_s23 + $0x18] sm:$0xff] %vm814_vm4, %v3709_v14  ;;  %v3721_v63 = vadd.f32 %v4589_v6, %v3689_v52  ;;  %3742 = vst.msk [vmem:[%s7062_s23 + $0x20] sm:$0xff] %vm814_vm4, %v3710_v44  ;;  %v3722_v24 = vadd.f32 %v4590_v36, %v3690_v21  ;;  %v3723_v45 = vadd.f32 %v4591_v8, %v3691_v25  ;;  %v4598_v21 = vld [vmem:[%s4660_s21 + $0xc0] sm:$0xff] }
 0x46e   : > { %3743 = vst.msk [vmem:[%s7062_s23 + $0x28] sm:$0xff] %vm814_vm4, %v3711_v47  ;;  %3744 = vst.msk [vmem:[%s7062_s23 + $0x30] sm:$0xff] %vm814_vm4, %v3712_v50  ;;  %v3724_v37 = vadd.f32 %v4592_v1, %v3692_v49  ;;  %v3725_v5 = vadd.f32 %v4593_v51, %v3693_v40  ;;  %v3726_v42 = vadd.f32 %v4594_v41, %v7041_v28  ;;  %v4599_v49 = vld [vmem:[%s4660_s21 + $0xc8] sm:$0xff]  ;;  %v4600_v28 = vld [vmem:[%s4660_s21 + $0xd0] sm:$0xff] }
 0x46f   : > { %3745 = vst.msk [vmem:[%s7062_s23 + $0x38] sm:$0xff] %vm814_vm4, %v3713_v17  ;;  %3746 = vst.msk [vmem:[%s7062_s23 + $0x40] sm:$0xff] %vm814_vm4, %v3714_v2  ;;  %v3727_v9 = vadd.f32 %v4595_v53, %v7043_v0  ;;  %v3728_v10 = vadd.f32 %v4596_v3, %v7045_v46  ;;  %v3729_v52 = vadd.f32 %v4597_v29, %v7047_v19  ;;  %v4601_v46 = vld [vmem:[%s4660_s21 + $0xd8] sm:$0xff] }
 0x470   : > { %3747 = vst.msk [vmem:[%s7062_s23 + $0x48] sm:$0xff] %vm814_vm4, %v3715_v34  ;;  %3748 = vst.msk [vmem:[%s7062_s23 + $0x50] sm:$0xff] %vm814_vm4, %v3716_v59  ;;  %v3730_v25 = vadd.f32 %v4598_v21, %v7049_v11  ;;  %v3731_v40 = vadd.f32 %v4599_v49, %v7051_v62  ;;  %v3732_v0 = vadd.f32 %v4600_v28, %v7053_v12  ;;  %v4602_v11 = vld [vmem:[%s4660_s21 + $0xe0] sm:$0xff]  ;;  %v4603_v12 = vld [vmem:[%s4660_s21 + $0xe8] sm:$0xff] }
 0x471   : > { %3749 = vst.msk [vmem:[%s7062_s23 + $0x58] sm:$0xff] %vm814_vm4, %v3717_v20  ;;  %3750 = vst.msk [vmem:[%s7062_s23 + $0x60] sm:$0xff] %vm814_vm4, %v3718_v15  ;;  %v3733_v19 = vadd.f32 %v4601_v46, %v7055_v22  ;;  %v3734_v62 = vadd.f32 %v4602_v11, %v7064_v4  ;;  %v3735_v22 = vadd.f32 %v4603_v12, %v7066_v32 }
 0x472   : > { %3751 = vst.msk [vmem:[%s7062_s23 + $0x68] sm:$0xff] %vm814_vm4, %v3719_v55  ;;  %3752 = vst.msk [vmem:[%s7062_s23 + $0x70] sm:$0xff] %vm814_vm4, %v3720_v39  ;;  %v3736_v38 = vadd.f32 %v4604_v31, %v7068_v57  ;;  %v3737_v54 = vadd.f32 %v4605_v35, %v7070_v16 }
 0x473   : > { %3753 = vst.msk [vmem:[%s7062_s23 + $0x78] sm:$0xff] %vm814_vm4, %v3721_v63  ;;  %3754 = vst.msk [vmem:[%s7062_s23 + $0x80] sm:$0xff] %vm814_vm4, %v3722_v24 }
 0x474   : > { %3755 = vst.msk [vmem:[%s7062_s23 + $0x88] sm:$0xff] %vm814_vm4, %v3723_v45  ;;  %3756 = vst.msk [vmem:[%s7062_s23 + $0x90] sm:$0xff] %vm814_vm4, %v3724_v37 }
 0x475   : > { %3757 = vst.msk [vmem:[%s7062_s23 + $0x98] sm:$0xff] %vm814_vm4, %v3725_v5  ;;  %3758 = vst.msk [vmem:[%s7062_s23 + $0xa0] sm:$0xff] %vm814_vm4, %v3726_v42 }
 0x476   : > { %3759 = vst.msk [vmem:[%s7062_s23 + $0xa8] sm:$0xff] %vm814_vm4, %v3727_v9  ;;  %3760 = vst.msk [vmem:[%s7062_s23 + $0xb0] sm:$0xff] %vm814_vm4, %v3728_v10 }
 0x477   : > { %3761 = vst.msk [vmem:[%s7062_s23 + $0xb8] sm:$0xff] %vm814_vm4, %v3729_v52  ;;  %3762 = vst.msk [vmem:[%s7062_s23 + $0xc0] sm:$0xff] %vm814_vm4, %v3730_v25 }
 0x478   : > { %3763 = vst.msk [vmem:[%s7062_s23 + $0xc8] sm:$0xff] %vm814_vm4, %v3731_v40  ;;  %3764 = vst.msk [vmem:[%s7062_s23 + $0xd0] sm:$0xff] %vm814_vm4, %v3732_v0 }
 0x479   : > { %3765 = vst.msk [vmem:[%s7062_s23 + $0xd8] sm:$0xff] %vm814_vm4, %v3733_v19  ;;  %3766 = vst.msk [vmem:[%s7062_s23 + $0xe0] sm:$0xff] %vm814_vm4, %v3734_v62 }
 0x47a   : > { %3767 = vst.msk [vmem:[%s7062_s23 + $0xe8] sm:$0xff] %vm814_vm4, %v3735_v22  ;;  %3768 = vst.msk [vmem:[%s7062_s23 + $0xf0] sm:$0xff] %vm814_vm4, %v3736_v38 }
 0x47b   : > { %3769 = vst.msk [vmem:[%s7062_s23 + $0xf8] sm:$0xff] %vm814_vm4, %v3737_v54 }
 0x47c PF: > { %s13_s12 = sadd.s32 1, %s4612_s12  }
 0x47d   : > { %p10_p4 = scmp.ge.s32.totalorder %s13_s12, 4  }
 0x47f   :  { %12 = sbr.rel (!%p10_p4) target bundleno = 1 (0x1), region = 66 }

</bundles_post_ra>
